<compile_context>
chip_gen: v5e
topology: v5e:2x2
jax: 0.10.0
libtpu: 0.0.40
codegen_flags: <defaults>
</compile_context>

<pallas_src>
import math
import functools

import jax
import jax.numpy as jnp
from jax.experimental import pallas as pl
from jax.experimental.pallas import tpu as pltpu

# ----------------------------- config (synthetic EncoderConfig) ---------------
EMBED_DIM = 32          # config.embedding_dimension
NUM_HEADS = 4           # config.num_attention_heads
HEAD_DIM = EMBED_DIM // NUM_HEADS
INTERMEDIATE = 64       # config.intermediate_size
NUM_LAYERS = 2          # config.num_encoder_layers
LN_EPS = 1e-5           # torch nn.LayerNorm default

# packed-weight layout (per layer):
#   rows 0:D     cols 0:3D        -> W_qkv (D, 3D)
#   rows 0:D     cols 3D:4D       -> W_o   (D, D)
#   rows 0:D     cols 4D:4D+I     -> W_ff1 (D, I)
#   rows D:D+I   cols 0:D         -> W_ff2 (I, D)
W_ROWS = EMBED_DIM + INTERMEDIATE                     # 96
W_COLS = 4 * EMBED_DIM + INTERMEDIATE                 # 192
# packed bias/gain layout (per layer): one (8, 128) tile, one vector per row:
#   0:g1  1:b1  2:b_qkv(3D)  3:b_o  4:g2  5:b2  6:b_ff1(I)  7:b_ff2
VEC_ROWS, VEC_COLS = 8, 128


# ----------------------------- fused whole-stack kernel ------------------------
def _layer_norm(h, g, b):
    mu = jnp.mean(h, axis=-1, keepdims=True)
    c = h - mu
    var = jnp.mean(c * c, axis=-1, keepdims=True)
    return c * jax.lax.rsqrt(var + LN_EPS) * g + b


def _encoder_stack_kernel(x_ref, w_ref, v_ref, out_ref,
                          *, seq, num_layers, num_heads, head_dim):
    """One grid step processes `rows = x_ref.shape[0]` rows (one or more batch slabs)
    through ALL encoder layers.  All weights are VMEM-resident for the whole call."""
    D = num_heads * head_dim
    I = INTERMEDIATE
    rows = x_ref.shape[0]
    batch_local = rows // seq
    inv_sqrt_hd = 1.0 / math.sqrt(head_dim)
    inv_sqrt_2 = 1.0 / math.sqrt(2.0)

    # Batches are fully independent -> process each (S, D) slab through the whole
    # stack and write it out once.  No cross-batch relayouts, no scratch round-trip.
    for b in range(batch_local):
        r0 = b * seq
        h = x_ref[r0:r0 + seq, :]                                   # (S, D) fp32

        for l in range(num_layers):                                 # static unroll, L=2
            # ---- unpack this layer's packed weights (static ref slices) ----
            w_qkv = w_ref[l, 0:D, 0:3 * D]                          # (D, 3D)
            w_f1 = w_ref[l, 0:D, 4 * D:4 * D + I]                   # (D, I)
            w_f2 = w_ref[l, D:D + I, 0:D]                           # (I, D)

            g1 = v_ref[l, 0:1, 0:D]
            b1 = v_ref[l, 1:2, 0:D]
            b_qkv = v_ref[l, 2:3, 0:3 * D]
            b_o = v_ref[l, 3:4, 0:D]
            g2 = v_ref[l, 4:5, 0:D]
            b2 = v_ref[l, 5:6, 0:D]
            b_f1 = v_ref[l, 6:7, 0:I]
            b_f2 = v_ref[l, 7:8, 0:D]

            # ---- layer_norm_before + fused QKV projection ----
            ln1 = _layer_norm(h, g1, b1)
            qkv = jnp.dot(ln1, w_qkv,
                          preferred_element_type=jnp.float32) + b_qkv   # (S, 3D)

            # ---- multi-head self-attention, unrolled over heads ----
            # The output projection is folded per head:
            #   attn += (softmax(q k^T / sqrt(hd)) @ v) @ W_o[c0:c0+hd, :]
            # which removes the context-assembly scratch + masked stores entirely.
            attn = jnp.zeros((seq, D), jnp.float32)
            for hh in range(num_heads):
                c0 = hh * head_dim
                qb = qkv[:, c0:c0 + head_dim]                       # (S, hd)
                kb = qkv[:, D + c0:D + c0 + head_dim]               # (S, hd)
                vb = qkv[:, 2 * D + c0:2 * D + c0 + head_dim]       # (S, hd)

                # scores = q @ k^T  (contract last dims; no materialized transpose)
                s = jax.lax.dot_general(qb, kb, (((1,), (1,)), ((), ())),
                                        preferred_element_type=jnp.float32)
                s = s * inv_sqrt_hd
                s = s - jnp.max(s, axis=-1, keepdims=True)
                e = jnp.exp(s)
                p = e * pl.reciprocal(jnp.sum(e, axis=-1, keepdims=True),
                                      approx=True)

                ctx = jnp.dot(p, vb, preferred_element_type=jnp.float32)   # (S, hd)
                w_o_h = w_ref[l, c0:c0 + head_dim, 3 * D:4 * D]             # (hd, D)
                attn = attn + jnp.dot(ctx, w_o_h,
                                      preferred_element_type=jnp.float32)  # (S, D)

            attn = attn + b_o

            # residual 1 (adds the un-normalized input, as in the PyTorch code)
            h1 = attn + h

            # ---- layer_norm_after + MLP ----
            ln2 = _layer_norm(h1, g2, b2)
            ff = jnp.dot(ln2, w_f1, preferred_element_type=jnp.float32) + b_f1
            ff = 0.5 * ff * (1.0 + jax.lax.erf(ff * inv_sqrt_2))    # exact GELU
            ff = jnp.dot(ff, w_f2, preferred_element_type=jnp.float32) + b_f2

            # residual 2 (adds the post-LN activation, exactly like the PyTorch code)
            h = ff + ln2

        out_ref[r0:r0 + seq, :] = h


def encoder_forward(x, w_all, v_all, *, batch_parallel=False):
    """x: (B, S, D) fp32.  w_all: (L, 96, 192), v_all: (L, 8, 128) packed params.

    batch_parallel=False (default): one grid step processes everything (best on
    v5e/v6e, single TensorCore -> no extra step overhead).
    batch_parallel=True: grid=(B,) with a "parallel" axis so the independent batch
    slabs are sharded across the 2 TensorCores on v7x inside one launch.
    """
    B, S, D = x.shape
    BS = B * S
    L = w_all.shape[0]
    x2 = x.reshape(BS, D)

    G = B if batch_parallel else 1
    rows = BS // G                               # rows handled per grid step

    kernel = functools.partial(_encoder_stack_kernel,
                               seq=S, num_layers=L,
                               num_heads=NUM_HEADS, head_dim=HEAD_DIM)

    out = pl.pallas_call(
        kernel,
        out_shape=jax.ShapeDtypeStruct((BS, D), jnp.float32),
        grid=(G,),
        in_specs=[
            pl.BlockSpec((rows, D), lambda g: (g, 0)),               # activation slab
            pl.BlockSpec((L, W_ROWS, W_COLS), lambda g: (0, 0, 0)),  # all matrices, resident
            pl.BlockSpec((L, VEC_ROWS, VEC_COLS), lambda g: (0, 0, 0)),  # all vectors, resident
        ],
        out_specs=pl.BlockSpec((rows, D), lambda g: (g, 0)),
        compiler_params=pltpu.CompilerParams(
            dimension_semantics=("parallel",)),
    )(x2, w_all, v_all)
    return out.reshape(B, S, D)


# ----------------------------- deterministic parameter init --------------------
def init_layer_params(key):
    ks = jax.random.split(key, 8)
    scale = 0.02

    def lin(k, fan_in, fan_out):
        return scale * jax.random.normal(k, (fan_in, fan_out), jnp.float32)

    return {
        "g1": jnp.ones((1, EMBED_DIM), jnp.float32),
        "b1": jnp.zeros((1, EMBED_DIM), jnp.float32),
        "wq": lin(ks[0], EMBED_DIM, EMBED_DIM),
        "bq": scale * jax.random.normal(ks[1], (1, EMBED_DIM), jnp.float32),
        "wk": lin(ks[2], EMBED_DIM, EMBED_DIM),
        "bk": jnp.zeros((1, EMBED_DIM), jnp.float32),
        "wv": lin(ks[3], EMBED_DIM, EMBED_DIM),
        "bv": jnp.zeros((1, EMBED_DIM), jnp.float32),
        "wo": lin(ks[4], EMBED_DIM, EMBED_DIM),
        "bo": jnp.zeros((1, EMBED_DIM), jnp.float32),
        "g2": jnp.ones((1, EMBED_DIM), jnp.float32),
        "b2": jnp.zeros((1, EMBED_DIM), jnp.float32),
        "w1": lin(ks[5], EMBED_DIM, INTERMEDIATE),
        "bf1": jnp.zeros((1, INTERMEDIATE), jnp.float32),
        "w2": lin(ks[6], INTERMEDIATE, EMBED_DIM),
        "bf2": jnp.zeros((1, EMBED_DIM), jnp.float32),
    }


def pack_layer_params(p):
    """Pack one layer's params into one (96,192) weight tile + one (8,128) vector tile."""
    D, I = EMBED_DIM, INTERMEDIATE
    w = jnp.zeros((W_ROWS, W_COLS), jnp.float32)
    w = w.at[:D, 0:3 * D].set(jnp.concatenate([p["wq"], p["wk"], p["wv"]], axis=1))
    w = w.at[:D, 3 * D:4 * D].set(p["wo"])
    w = w.at[:D, 4 * D:4 * D + I].set(p["w1"])
    w = w.at[D:D + I, 0:D].set(p["w2"])

    v = jnp.zeros((VEC_ROWS, VEC_COLS), jnp.float32)
    v = v.at[0, :D].set(p["g1"][0])
    v = v.at[1, :D].set(p["b1"][0])
    v = v.at[2, :3 * D].set(jnp.concatenate([p["bq"][0], p["bk"][0], p["bv"][0]]))
    v = v.at[3, :D].set(p["bo"][0])
    v = v.at[4, :D].set(p["g2"][0])
    v = v.at[5, :D].set(p["b2"][0])
    v = v.at[6, :I].set(p["bf1"][0])
    v = v.at[7, :D].set(p["bf2"][0])
    return w, v


# ----------------------------- pure-JAX reference (for verification) ----------
def ref_layer(x, p):
    def ln(h, g, b):
        mu = jnp.mean(h, axis=-1, keepdims=True)
        var = jnp.mean((h - mu) ** 2, axis=-1, keepdims=True)
        return (h - mu) / jnp.sqrt(var + LN_EPS) * g + b

    B, S, D = x.shape
    ln1 = ln(x, p["g1"][0], p["b1"][0])
    q = ln1 @ p["wq"] + p["bq"][0]
    k = ln1 @ p["wk"] + p["bk"][0]
    v = ln1 @ p["wv"] + p["bv"][0]
    qh = q.reshape(B, S, NUM_HEADS, HEAD_DIM).transpose(0, 2, 1, 3)
    kh = k.reshape(B, S, NUM_HEADS, HEAD_DIM).transpose(0, 2, 1, 3)
    vh = v.reshape(B, S, NUM_HEADS, HEAD_DIM).transpose(0, 2, 1, 3)
    sc = jnp.einsum("bhqd,bhkd->bhqk", qh, kh) / math.sqrt(HEAD_DIM)
    pr = jax.nn.softmax(sc, axis=-1)
    ctx = jnp.einsum("bhqk,bhkd->bhqd", pr, vh).transpose(0, 2, 1, 3).reshape(B, S, D)
    attn = ctx @ p["wo"] + p["bo"][0]
    h1 = attn + x
    ln2 = ln(h1, p["g2"][0], p["b2"][0])
    ff = ln2 @ p["w1"] + p["bf1"][0]
    ff = 0.5 * ff * (1.0 + jax.lax.erf(ff / math.sqrt(2.0)))
    ff = ff @ p["w2"] + p["bf2"][0]
    return ff + ln2


# ----------------------------- driver ------------------------------------------
if __name__ == "__main__":
    key = jax.random.PRNGKey(0)
    k_in, *k_layers = jax.random.split(key, NUM_LAYERS + 1)

    B, S = 2, 8
    x = jax.random.normal(k_in, (B, S, EMBED_DIM), jnp.float32)

    params = [init_layer_params(k) for k in k_layers]
    packed = [pack_layer_params(p) for p in params]
    w_all = jnp.stack([w for w, _ in packed])     # (L, 96, 192)
    v_all = jnp.stack([v for _, v in packed])     # (L, 8, 128)

    # default path (single grid step; on v7x call with batch_parallel=True for megacore)
    out = encoder_forward(x, w_all, v_all)

    ref = x
    for p in params:
        ref = ref_layer(ref, p)

    out = jax.block_until_ready(out)
    ref = jax.block_until_ready(ref)

    assert out.shape == (B, S, EMBED_DIM)
    err = float(jnp.max(jnp.abs(out - ref)))
    # tolerance accounts for approx EUP reciprocal in softmax + rsqrt in LayerNorm
    assert err < 2e-3, f"mismatch vs pure-JAX reference: max abs err = {err}"
    print("KERNEL_OK")
</pallas_src>

<mosaic_0001>
module attributes {stable_mosaic.version = 11 : i64} {
  func.func @_encoder_stack_kernel(%arg0: i32, %arg1: memref<16x32xf32, #tpu.memory_space<vmem>>, %arg2: memref<2x96x192xf32, #tpu.memory_space<vmem>>, %arg3: memref<2x8x128xf32, #tpu.memory_space<vmem>>, %arg4: memref<16x32xf32, #tpu.memory_space<vmem>>) attributes {dimension_semantics = [#tpu.dimension_semantics<parallel>], iteration_bounds = array<i64: 1>, scalar_prefetch = 0 : i64, scratch_operands = 0 : i64, tpu.core_type = #tpu.core_type<tc>, window_params = [{transform_indices = @transform_0, window_bounds = array<i64: 16, 32>}, {pipeline_mode = #tpu.pipeline_mode<synchronous>, transform_indices = @transform_1, window_bounds = array<i64: 2, 96, 192>}, {pipeline_mode = #tpu.pipeline_mode<synchronous>, transform_indices = @transform_2, window_bounds = array<i64: 2, 8, 128>}, {transform_indices = @transform_3, window_bounds = array<i64: 16, 32>}]} {
    %c0 = arith.constant 0 : index
    %c0_0 = arith.constant 0 : index
    %0 = vector.load %arg1[%c0, %c0_0] : memref<16x32xf32, #tpu.memory_space<vmem>>, vector<8x32xf32>
    %c0_1 = arith.constant 0 : index
    %c0_2 = arith.constant 0 : index
    %c0_3 = arith.constant 0 : index
    %1 = vector.load %arg2[%c0_1, %c0_2, %c0_3] : memref<2x96x192xf32, #tpu.memory_space<vmem>>, vector<1x32x96xf32>
    %2 = vector.shape_cast %1 : vector<1x32x96xf32> to vector<32x96xf32>
    %c0_4 = arith.constant 0 : index
    %c0_5 = arith.constant 0 : index
    %c128 = arith.constant 128 : index
    %3 = vector.load %arg2[%c0_4, %c0_5, %c128] : memref<2x96x192xf32, #tpu.memory_space<vmem>>, vector<1x32x64xf32>
    %4 = vector.shape_cast %3 : vector<1x32x64xf32> to vector<32x64xf32>
    %c0_6 = arith.constant 0 : index
    %c32 = arith.constant 32 : index
    %c0_7 = arith.constant 0 : index
    %5 = vector.load %arg2[%c0_6, %c32, %c0_7] : memref<2x96x192xf32, #tpu.memory_space<vmem>>, vector<1x64x32xf32>
    %6 = vector.shape_cast %5 : vector<1x64x32xf32> to vector<64x32xf32>
    %c0_8 = arith.constant 0 : index
    %c0_9 = arith.constant 0 : index
    %c0_10 = arith.constant 0 : index
    %7 = vector.load %arg3[%c0_8, %c0_9, %c0_10] : memref<2x8x128xf32, #tpu.memory_space<vmem>>, vector<1x1x32xf32>
    %8 = vector.shape_cast %7 : vector<1x1x32xf32> to vector<1x32xf32>
    %c0_11 = arith.constant 0 : index
    %c1 = arith.constant 1 : index
    %c0_12 = arith.constant 0 : index
    %9 = vector.load %arg3[%c0_11, %c1, %c0_12] : memref<2x8x128xf32, #tpu.memory_space<vmem>>, vector<1x1x32xf32>
    %10 = vector.shape_cast %9 : vector<1x1x32xf32> to vector<1x32xf32>
    %c0_13 = arith.constant 0 : index
    %c2 = arith.constant 2 : index
    %c0_14 = arith.constant 0 : index
    %11 = vector.load %arg3[%c0_13, %c2, %c0_14] : memref<2x8x128xf32, #tpu.memory_space<vmem>>, vector<1x1x96xf32>
    %12 = vector.shape_cast %11 : vector<1x1x96xf32> to vector<1x96xf32>
    %c0_15 = arith.constant 0 : index
    %c3 = arith.constant 3 : index
    %c0_16 = arith.constant 0 : index
    %13 = vector.load %arg3[%c0_15, %c3, %c0_16] : memref<2x8x128xf32, #tpu.memory_space<vmem>>, vector<1x1x32xf32>
    %14 = vector.shape_cast %13 : vector<1x1x32xf32> to vector<1x32xf32>
    %c0_17 = arith.constant 0 : index
    %c4 = arith.constant 4 : index
    %c0_18 = arith.constant 0 : index
    %15 = vector.load %arg3[%c0_17, %c4, %c0_18] : memref<2x8x128xf32, #tpu.memory_space<vmem>>, vector<1x1x32xf32>
    %16 = vector.shape_cast %15 : vector<1x1x32xf32> to vector<1x32xf32>
    %c0_19 = arith.constant 0 : index
    %c5 = arith.constant 5 : index
    %c0_20 = arith.constant 0 : index
    %17 = vector.load %arg3[%c0_19, %c5, %c0_20] : memref<2x8x128xf32, #tpu.memory_space<vmem>>, vector<1x1x32xf32>
    %18 = vector.shape_cast %17 : vector<1x1x32xf32> to vector<1x32xf32>
    %c0_21 = arith.constant 0 : index
    %c6 = arith.constant 6 : index
    %c0_22 = arith.constant 0 : index
    %19 = vector.load %arg3[%c0_21, %c6, %c0_22] : memref<2x8x128xf32, #tpu.memory_space<vmem>>, vector<1x1x64xf32>
    %20 = vector.shape_cast %19 : vector<1x1x64xf32> to vector<1x64xf32>
    %c0_23 = arith.constant 0 : index
    %c7 = arith.constant 7 : index
    %c0_24 = arith.constant 0 : index
    %21 = vector.load %arg3[%c0_23, %c7, %c0_24] : memref<2x8x128xf32, #tpu.memory_space<vmem>>, vector<1x1x32xf32>
    %22 = vector.shape_cast %21 : vector<1x1x32xf32> to vector<1x32xf32>
    %cst = arith.constant dense<0.000000e+00> : vector<8xf32>
    %23 = vector.multi_reduction <add>, %0, %cst [1] : vector<8x32xf32> to vector<8xf32>
    %24 = vector.shape_cast %23 : vector<8xf32> to vector<8x1xf32>
    %cst_25 = arith.constant 3.200000e+01 : f32
    %25 = vector.broadcast %cst_25 : f32 to vector<8x1xf32>
    %26 = arith.divf %24, %25 : vector<8x1xf32>
    %27 = vector.broadcast %26 : vector<8x1xf32> to vector<8x32xf32>
    %28 = arith.subf %0, %27 : vector<8x32xf32>
    %29 = arith.mulf %28, %28 : vector<8x32xf32>
    %cst_26 = arith.constant dense<0.000000e+00> : vector<8xf32>
    %30 = vector.multi_reduction <add>, %29, %cst_26 [1] : vector<8x32xf32> to vector<8xf32>
    %31 = vector.shape_cast %30 : vector<8xf32> to vector<8x1xf32>
    %cst_27 = arith.constant 3.200000e+01 : f32
    %32 = vector.broadcast %cst_27 : f32 to vector<8x1xf32>
    %33 = arith.divf %31, %32 : vector<8x1xf32>
    %cst_28 = arith.constant 9.99999974E-6 : f32
    %34 = vector.broadcast %cst_28 : f32 to vector<8x1xf32>
    %35 = arith.addf %33, %34 : vector<8x1xf32>
    %36 = math.rsqrt %35 : vector<8x1xf32>
    %37 = vector.broadcast %36 : vector<8x1xf32> to vector<8x32xf32>
    %38 = arith.mulf %28, %37 : vector<8x32xf32>
    %39 = vector.broadcast %8 : vector<1x32xf32> to vector<8x32xf32>
    %40 = arith.mulf %38, %39 : vector<8x32xf32>
    %41 = vector.broadcast %10 : vector<1x32xf32> to vector<8x32xf32>
    %42 = arith.addf %40, %41 : vector<8x32xf32>
    %cst_29 = arith.constant dense<0.000000e+00> : vector<8x96xf32>
    %43 = tpu.matmul %42, %2, %cst_29 {dimension_numbers = #tpu.dot_dimension_numbers<[1], [0], [0], [1], [0, 0, 1, 1], [], []>} : vector<8x32xf32>, vector<32x96xf32>, vector<8x96xf32> -> vector<8x96xf32>
    %44 = vector.broadcast %12 : vector<1x96xf32> to vector<8x96xf32>
    %45 = arith.addf %43, %44 : vector<8x96xf32>
    %cst_30 = arith.constant 0.000000e+00 : f32
    %46 = vector.broadcast %cst_30 : f32 to vector<8x32xf32>
    %47 = vector.extract_strided_slice %45 {offsets = [0, 0], sizes = [8, 8], strides = [1, 1]} : vector<8x96xf32> to vector<8x8xf32>
    %48 = vector.extract_strided_slice %45 {offsets = [0, 32], sizes = [8, 8], strides = [1, 1]} : vector<8x96xf32> to vector<8x8xf32>
    %49 = vector.extract_strided_slice %45 {offsets = [0, 64], sizes = [8, 8], strides = [1, 1]} : vector<8x96xf32> to vector<8x8xf32>
    %cst_31 = arith.constant dense<0.000000e+00> : vector<8x8xf32>
    %50 = tpu.matmul %47, %48, %cst_31 {dimension_numbers = #tpu.dot_dimension_numbers<[1], [1], [0], [0], [0, 0, 1, 0], [], []>} : vector<8x8xf32>, vector<8x8xf32>, vector<8x8xf32> -> vector<8x8xf32>
    %cst_32 = arith.constant 0.353553385 : f32
    %51 = vector.broadcast %cst_32 : f32 to vector<8x8xf32>
    %52 = arith.mulf %50, %51 : vector<8x8xf32>
    %cst_33 = arith.constant dense<0xFF800000> : vector<8xf32>
    %53 = vector.multi_reduction <maximumf>, %52, %cst_33 [1] : vector<8x8xf32> to vector<8xf32>
    %54 = vector.shape_cast %53 : vector<8xf32> to vector<8x1xf32>
    %55 = vector.broadcast %54 : vector<8x1xf32> to vector<8x8xf32>
    %56 = arith.subf %52, %55 : vector<8x8xf32>
    %57 = math.exp %56 : vector<8x8xf32>
    %cst_34 = arith.constant dense<0.000000e+00> : vector<8xf32>
    %58 = vector.multi_reduction <add>, %57, %cst_34 [1] : vector<8x8xf32> to vector<8xf32>
    %59 = vector.shape_cast %58 : vector<8xf32> to vector<8x1xf32>
    %60 = tpu.reciprocal %59 {approx = true} : vector<8x1xf32> -> vector<8x1xf32>
    %61 = vector.broadcast %60 : vector<8x1xf32> to vector<8x8xf32>
    %62 = arith.mulf %57, %61 : vector<8x8xf32>
    %cst_35 = arith.constant dense<0.000000e+00> : vector<8x8xf32>
    %63 = tpu.matmul %62, %49, %cst_35 {dimension_numbers = #tpu.dot_dimension_numbers<[1], [0], [0], [1], [0, 0, 1, 1], [], []>} : vector<8x8xf32>, vector<8x8xf32>, vector<8x8xf32> -> vector<8x8xf32>
    %c0_36 = arith.constant 0 : index
    %c0_37 = arith.constant 0 : index
    %c96 = arith.constant 96 : index
    %64 = vector.load %arg2[%c0_36, %c0_37, %c96] : memref<2x96x192xf32, #tpu.memory_space<vmem>>, vector<1x8x32xf32>
    %65 = vector.shape_cast %64 : vector<1x8x32xf32> to vector<8x32xf32>
    %cst_38 = arith.constant dense<0.000000e+00> : vector<8x32xf32>
    %66 = tpu.matmul %63, %65, %cst_38 {dimension_numbers = #tpu.dot_dimension_numbers<[1], [0], [0], [1], [0, 0, 1, 1], [], []>} : vector<8x8xf32>, vector<8x32xf32>, vector<8x32xf32> -> vector<8x32xf32>
    %67 = arith.addf %46, %66 : vector<8x32xf32>
    %68 = vector.extract_strided_slice %45 {offsets = [0, 8], sizes = [8, 8], strides = [1, 1]} : vector<8x96xf32> to vector<8x8xf32>
    %69 = vector.extract_strided_slice %45 {offsets = [0, 40], sizes = [8, 8], strides = [1, 1]} : vector<8x96xf32> to vector<8x8xf32>
    %70 = vector.extract_strided_slice %45 {offsets = [0, 72], sizes = [8, 8], strides = [1, 1]} : vector<8x96xf32> to vector<8x8xf32>
    %cst_39 = arith.constant dense<0.000000e+00> : vector<8x8xf32>
    %71 = tpu.matmul %68, %69, %cst_39 {dimension_numbers = #tpu.dot_dimension_numbers<[1], [1], [0], [0], [0, 0, 1, 0], [], []>} : vector<8x8xf32>, vector<8x8xf32>, vector<8x8xf32> -> vector<8x8xf32>
    %cst_40 = arith.constant 0.353553385 : f32
    %72 = vector.broadcast %cst_40 : f32 to vector<8x8xf32>
    %73 = arith.mulf %71, %72 : vector<8x8xf32>
    %cst_41 = arith.constant dense<0xFF800000> : vector<8xf32>
    %74 = vector.multi_reduction <maximumf>, %73, %cst_41 [1] : vector<8x8xf32> to vector<8xf32>
    %75 = vector.shape_cast %74 : vector<8xf32> to vector<8x1xf32>
    %76 = vector.broadcast %75 : vector<8x1xf32> to vector<8x8xf32>
    %77 = arith.subf %73, %76 : vector<8x8xf32>
    %78 = math.exp %77 : vector<8x8xf32>
    %cst_42 = arith.constant dense<0.000000e+00> : vector<8xf32>
    %79 = vector.multi_reduction <add>, %78, %cst_42 [1] : vector<8x8xf32> to vector<8xf32>
    %80 = vector.shape_cast %79 : vector<8xf32> to vector<8x1xf32>
    %81 = tpu.reciprocal %80 {approx = true} : vector<8x1xf32> -> vector<8x1xf32>
    %82 = vector.broadcast %81 : vector<8x1xf32> to vector<8x8xf32>
    %83 = arith.mulf %78, %82 : vector<8x8xf32>
    %cst_43 = arith.constant dense<0.000000e+00> : vector<8x8xf32>
    %84 = tpu.matmul %83, %70, %cst_43 {dimension_numbers = #tpu.dot_dimension_numbers<[1], [0], [0], [1], [0, 0, 1, 1], [], []>} : vector<8x8xf32>, vector<8x8xf32>, vector<8x8xf32> -> vector<8x8xf32>
    %c0_44 = arith.constant 0 : index
    %c8 = arith.constant 8 : index
    %c96_45 = arith.constant 96 : index
    %85 = vector.load %arg2[%c0_44, %c8, %c96_45] : memref<2x96x192xf32, #tpu.memory_space<vmem>>, vector<1x8x32xf32>
    %86 = vector.shape_cast %85 : vector<1x8x32xf32> to vector<8x32xf32>
    %cst_46 = arith.constant dense<0.000000e+00> : vector<8x32xf32>
    %87 = tpu.matmul %84, %86, %cst_46 {dimension_numbers = #tpu.dot_dimension_numbers<[1], [0], [0], [1], [0, 0, 1, 1], [], []>} : vector<8x8xf32>, vector<8x32xf32>, vector<8x32xf32> -> vector<8x32xf32>
    %88 = arith.addf %67, %87 : vector<8x32xf32>
    %89 = vector.extract_strided_slice %45 {offsets = [0, 16], sizes = [8, 8], strides = [1, 1]} : vector<8x96xf32> to vector<8x8xf32>
    %90 = vector.extract_strided_slice %45 {offsets = [0, 48], sizes = [8, 8], strides = [1, 1]} : vector<8x96xf32> to vector<8x8xf32>
    %91 = vector.extract_strided_slice %45 {offsets = [0, 80], sizes = [8, 8], strides = [1, 1]} : vector<8x96xf32> to vector<8x8xf32>
    %cst_47 = arith.constant dense<0.000000e+00> : vector<8x8xf32>
    %92 = tpu.matmul %89, %90, %cst_47 {dimension_numbers = #tpu.dot_dimension_numbers<[1], [1], [0], [0], [0, 0, 1, 0], [], []>} : vector<8x8xf32>, vector<8x8xf32>, vector<8x8xf32> -> vector<8x8xf32>
    %cst_48 = arith.constant 0.353553385 : f32
    %93 = vector.broadcast %cst_48 : f32 to vector<8x8xf32>
    %94 = arith.mulf %92, %93 : vector<8x8xf32>
    %cst_49 = arith.constant dense<0xFF800000> : vector<8xf32>
    %95 = vector.multi_reduction <maximumf>, %94, %cst_49 [1] : vector<8x8xf32> to vector<8xf32>
    %96 = vector.shape_cast %95 : vector<8xf32> to vector<8x1xf32>
    %97 = vector.broadcast %96 : vector<8x1xf32> to vector<8x8xf32>
    %98 = arith.subf %94, %97 : vector<8x8xf32>
    %99 = math.exp %98 : vector<8x8xf32>
    %cst_50 = arith.constant dense<0.000000e+00> : vector<8xf32>
    %100 = vector.multi_reduction <add>, %99, %cst_50 [1] : vector<8x8xf32> to vector<8xf32>
    %101 = vector.shape_cast %100 : vector<8xf32> to vector<8x1xf32>
    %102 = tpu.reciprocal %101 {approx = true} : vector<8x1xf32> -> vector<8x1xf32>
    %103 = vector.broadcast %102 : vector<8x1xf32> to vector<8x8xf32>
    %104 = arith.mulf %99, %103 : vector<8x8xf32>
    %cst_51 = arith.constant dense<0.000000e+00> : vector<8x8xf32>
    %105 = tpu.matmul %104, %91, %cst_51 {dimension_numbers = #tpu.dot_dimension_numbers<[1], [0], [0], [1], [0, 0, 1, 1], [], []>} : vector<8x8xf32>, vector<8x8xf32>, vector<8x8xf32> -> vector<8x8xf32>
    %c0_52 = arith.constant 0 : index
    %c16 = arith.constant 16 : index
    %c96_53 = arith.constant 96 : index
    %106 = vector.load %arg2[%c0_52, %c16, %c96_53] : memref<2x96x192xf32, #tpu.memory_space<vmem>>, vector<1x8x32xf32>
    %107 = vector.shape_cast %106 : vector<1x8x32xf32> to vector<8x32xf32>
    %cst_54 = arith.constant dense<0.000000e+00> : vector<8x32xf32>
    %108 = tpu.matmul %105, %107, %cst_54 {dimension_numbers = #tpu.dot_dimension_numbers<[1], [0], [0], [1], [0, 0, 1, 1], [], []>} : vector<8x8xf32>, vector<8x32xf32>, vector<8x32xf32> -> vector<8x32xf32>
    %109 = arith.addf %88, %108 : vector<8x32xf32>
    %110 = vector.extract_strided_slice %45 {offsets = [0, 24], sizes = [8, 8], strides = [1, 1]} : vector<8x96xf32> to vector<8x8xf32>
    %111 = vector.extract_strided_slice %45 {offsets = [0, 56], sizes = [8, 8], strides = [1, 1]} : vector<8x96xf32> to vector<8x8xf32>
    %112 = vector.extract_strided_slice %45 {offsets = [0, 88], sizes = [8, 8], strides = [1, 1]} : vector<8x96xf32> to vector<8x8xf32>
    %cst_55 = arith.constant dense<0.000000e+00> : vector<8x8xf32>
    %113 = tpu.matmul %110, %111, %cst_55 {dimension_numbers = #tpu.dot_dimension_numbers<[1], [1], [0], [0], [0, 0, 1, 0], [], []>} : vector<8x8xf32>, vector<8x8xf32>, vector<8x8xf32> -> vector<8x8xf32>
    %cst_56 = arith.constant 0.353553385 : f32
    %114 = vector.broadcast %cst_56 : f32 to vector<8x8xf32>
    %115 = arith.mulf %113, %114 : vector<8x8xf32>
    %cst_57 = arith.constant dense<0xFF800000> : vector<8xf32>
    %116 = vector.multi_reduction <maximumf>, %115, %cst_57 [1] : vector<8x8xf32> to vector<8xf32>
    %117 = vector.shape_cast %116 : vector<8xf32> to vector<8x1xf32>
    %118 = vector.broadcast %117 : vector<8x1xf32> to vector<8x8xf32>
    %119 = arith.subf %115, %118 : vector<8x8xf32>
    %120 = math.exp %119 : vector<8x8xf32>
    %cst_58 = arith.constant dense<0.000000e+00> : vector<8xf32>
    %121 = vector.multi_reduction <add>, %120, %cst_58 [1] : vector<8x8xf32> to vector<8xf32>
    %122 = vector.shape_cast %121 : vector<8xf32> to vector<8x1xf32>
    %123 = tpu.reciprocal %122 {approx = true} : vector<8x1xf32> -> vector<8x1xf32>
    %124 = vector.broadcast %123 : vector<8x1xf32> to vector<8x8xf32>
    %125 = arith.mulf %120, %124 : vector<8x8xf32>
    %cst_59 = arith.constant dense<0.000000e+00> : vector<8x8xf32>
    %126 = tpu.matmul %125, %112, %cst_59 {dimension_numbers = #tpu.dot_dimension_numbers<[1], [0], [0], [1], [0, 0, 1, 1], [], []>} : vector<8x8xf32>, vector<8x8xf32>, vector<8x8xf32> -> vector<8x8xf32>
    %c0_60 = arith.constant 0 : index
    %c24 = arith.constant 24 : index
    %c96_61 = arith.constant 96 : index
    %127 = vector.load %arg2[%c0_60, %c24, %c96_61] : memref<2x96x192xf32, #tpu.memory_space<vmem>>, vector<1x8x32xf32>
    %128 = vector.shape_cast %127 : vector<1x8x32xf32> to vector<8x32xf32>
    %cst_62 = arith.constant dense<0.000000e+00> : vector<8x32xf32>
    %129 = tpu.matmul %126, %128, %cst_62 {dimension_numbers = #tpu.dot_dimension_numbers<[1], [0], [0], [1], [0, 0, 1, 1], [], []>} : vector<8x8xf32>, vector<8x32xf32>, vector<8x32xf32> -> vector<8x32xf32>
    %130 = arith.addf %109, %129 : vector<8x32xf32>
    %131 = vector.broadcast %14 : vector<1x32xf32> to vector<8x32xf32>
    %132 = arith.addf %130, %131 : vector<8x32xf32>
    %133 = arith.addf %132, %0 : vector<8x32xf32>
    %cst_63 = arith.constant dense<0.000000e+00> : vector<8xf32>
    %134 = vector.multi_reduction <add>, %133, %cst_63 [1] : vector<8x32xf32> to vector<8xf32>
    %135 = vector.shape_cast %134 : vector<8xf32> to vector<8x1xf32>
    %cst_64 = arith.constant 3.200000e+01 : f32
    %136 = vector.broadcast %cst_64 : f32 to vector<8x1xf32>
    %137 = arith.divf %135, %136 : vector<8x1xf32>
    %138 = vector.broadcast %137 : vector<8x1xf32> to vector<8x32xf32>
    %139 = arith.subf %133, %138 : vector<8x32xf32>
    %140 = arith.mulf %139, %139 : vector<8x32xf32>
    %cst_65 = arith.constant dense<0.000000e+00> : vector<8xf32>
    %141 = vector.multi_reduction <add>, %140, %cst_65 [1] : vector<8x32xf32> to vector<8xf32>
    %142 = vector.shape_cast %141 : vector<8xf32> to vector<8x1xf32>
    %cst_66 = arith.constant 3.200000e+01 : f32
    %143 = vector.broadcast %cst_66 : f32 to vector<8x1xf32>
    %144 = arith.divf %142, %143 : vector<8x1xf32>
    %cst_67 = arith.constant 9.99999974E-6 : f32
    %145 = vector.broadcast %cst_67 : f32 to vector<8x1xf32>
    %146 = arith.addf %144, %145 : vector<8x1xf32>
    %147 = math.rsqrt %146 : vector<8x1xf32>
    %148 = vector.broadcast %147 : vector<8x1xf32> to vector<8x32xf32>
    %149 = arith.mulf %139, %148 : vector<8x32xf32>
    %150 = vector.broadcast %16 : vector<1x32xf32> to vector<8x32xf32>
    %151 = arith.mulf %149, %150 : vector<8x32xf32>
    %152 = vector.broadcast %18 : vector<1x32xf32> to vector<8x32xf32>
    %153 = arith.addf %151, %152 : vector<8x32xf32>
    %cst_68 = arith.constant dense<0.000000e+00> : vector<8x64xf32>
    %154 = tpu.matmul %153, %4, %cst_68 {dimension_numbers = #tpu.dot_dimension_numbers<[1], [0], [0], [1], [0, 0, 1, 1], [], []>} : vector<8x32xf32>, vector<32x64xf32>, vector<8x64xf32> -> vector<8x64xf32>
    %155 = vector.broadcast %20 : vector<1x64xf32> to vector<8x64xf32>
    %156 = arith.addf %154, %155 : vector<8x64xf32>
    %cst_69 = arith.constant 5.000000e-01 : f32
    %157 = vector.broadcast %cst_69 : f32 to vector<8x64xf32>
    %158 = arith.mulf %157, %156 : vector<8x64xf32>
    %cst_70 = arith.constant 0.707106769 : f32
    %159 = vector.broadcast %cst_70 : f32 to vector<8x64xf32>
    %160 = arith.mulf %156, %159 : vector<8x64xf32>
    %161 = math.erf %160 : vector<8x64xf32>
    %cst_71 = arith.constant 1.000000e+00 : f32
    %162 = vector.broadcast %cst_71 : f32 to vector<8x64xf32>
    %163 = arith.addf %162, %161 : vector<8x64xf32>
    %164 = arith.mulf %158, %163 : vector<8x64xf32>
    %cst_72 = arith.constant dense<0.000000e+00> : vector<8x32xf32>
    %165 = tpu.matmul %164, %6, %cst_72 {dimension_numbers = #tpu.dot_dimension_numbers<[1], [0], [0], [1], [0, 0, 1, 1], [], []>} : vector<8x64xf32>, vector<64x32xf32>, vector<8x32xf32> -> vector<8x32xf32>
    %166 = vector.broadcast %22 : vector<1x32xf32> to vector<8x32xf32>
    %167 = arith.addf %165, %166 : vector<8x32xf32>
    %168 = arith.addf %167, %153 : vector<8x32xf32>
    %c1_73 = arith.constant 1 : index
    %c0_74 = arith.constant 0 : index
    %c0_75 = arith.constant 0 : index
    %169 = vector.load %arg2[%c1_73, %c0_74, %c0_75] : memref<2x96x192xf32, #tpu.memory_space<vmem>>, vector<1x32x96xf32>
    %170 = vector.shape_cast %169 : vector<1x32x96xf32> to vector<32x96xf32>
    %c1_76 = arith.constant 1 : index
    %c0_77 = arith.constant 0 : index
    %c128_78 = arith.constant 128 : index
    %171 = vector.load %arg2[%c1_76, %c0_77, %c128_78] : memref<2x96x192xf32, #tpu.memory_space<vmem>>, vector<1x32x64xf32>
    %172 = vector.shape_cast %171 : vector<1x32x64xf32> to vector<32x64xf32>
    %c1_79 = arith.constant 1 : index
    %c32_80 = arith.constant 32 : index
    %c0_81 = arith.constant 0 : index
    %173 = vector.load %arg2[%c1_79, %c32_80, %c0_81] : memref<2x96x192xf32, #tpu.memory_space<vmem>>, vector<1x64x32xf32>
    %174 = vector.shape_cast %173 : vector<1x64x32xf32> to vector<64x32xf32>
    %c1_82 = arith.constant 1 : index
    %c0_83 = arith.constant 0 : index
    %c0_84 = arith.constant 0 : index
    %175 = vector.load %arg3[%c1_82, %c0_83, %c0_84] : memref<2x8x128xf32, #tpu.memory_space<vmem>>, vector<1x1x32xf32>
    %176 = vector.shape_cast %175 : vector<1x1x32xf32> to vector<1x32xf32>
    %c1_85 = arith.constant 1 : index
    %c1_86 = arith.constant 1 : index
    %c0_87 = arith.constant 0 : index
    %177 = vector.load %arg3[%c1_85, %c1_86, %c0_87] : memref<2x8x128xf32, #tpu.memory_space<vmem>>, vector<1x1x32xf32>
    %178 = vector.shape_cast %177 : vector<1x1x32xf32> to vector<1x32xf32>
    %c1_88 = arith.constant 1 : index
    %c2_89 = arith.constant 2 : index
    %c0_90 = arith.constant 0 : index
    %179 = vector.load %arg3[%c1_88, %c2_89, %c0_90] : memref<2x8x128xf32, #tpu.memory_space<vmem>>, vector<1x1x96xf32>
    %180 = vector.shape_cast %179 : vector<1x1x96xf32> to vector<1x96xf32>
    %c1_91 = arith.constant 1 : index
    %c3_92 = arith.constant 3 : index
    %c0_93 = arith.constant 0 : index
    %181 = vector.load %arg3[%c1_91, %c3_92, %c0_93] : memref<2x8x128xf32, #tpu.memory_space<vmem>>, vector<1x1x32xf32>
    %182 = vector.shape_cast %181 : vector<1x1x32xf32> to vector<1x32xf32>
    %c1_94 = arith.constant 1 : index
    %c4_95 = arith.constant 4 : index
    %c0_96 = arith.constant 0 : index
    %183 = vector.load %arg3[%c1_94, %c4_95, %c0_96] : memref<2x8x128xf32, #tpu.memory_space<vmem>>, vector<1x1x32xf32>
    %184 = vector.shape_cast %183 : vector<1x1x32xf32> to vector<1x32xf32>
    %c1_97 = arith.constant 1 : index
    %c5_98 = arith.constant 5 : index
    %c0_99 = arith.constant 0 : index
    %185 = vector.load %arg3[%c1_97, %c5_98, %c0_99] : memref<2x8x128xf32, #tpu.memory_space<vmem>>, vector<1x1x32xf32>
    %186 = vector.shape_cast %185 : vector<1x1x32xf32> to vector<1x32xf32>
    %c1_100 = arith.constant 1 : index
    %c6_101 = arith.constant 6 : index
    %c0_102 = arith.constant 0 : index
    %187 = vector.load %arg3[%c1_100, %c6_101, %c0_102] : memref<2x8x128xf32, #tpu.memory_space<vmem>>, vector<1x1x64xf32>
    %188 = vector.shape_cast %187 : vector<1x1x64xf32> to vector<1x64xf32>
    %c1_103 = arith.constant 1 : index
    %c7_104 = arith.constant 7 : index
    %c0_105 = arith.constant 0 : index
    %189 = vector.load %arg3[%c1_103, %c7_104, %c0_105] : memref<2x8x128xf32, #tpu.memory_space<vmem>>, vector<1x1x32xf32>
    %190 = vector.shape_cast %189 : vector<1x1x32xf32> to vector<1x32xf32>
    %cst_106 = arith.constant dense<0.000000e+00> : vector<8xf32>
    %191 = vector.multi_reduction <add>, %168, %cst_106 [1] : vector<8x32xf32> to vector<8xf32>
    %192 = vector.shape_cast %191 : vector<8xf32> to vector<8x1xf32>
    %cst_107 = arith.constant 3.200000e+01 : f32
    %193 = vector.broadcast %cst_107 : f32 to vector<8x1xf32>
    %194 = arith.divf %192, %193 : vector<8x1xf32>
    %195 = vector.broadcast %194 : vector<8x1xf32> to vector<8x32xf32>
    %196 = arith.subf %168, %195 : vector<8x32xf32>
    %197 = arith.mulf %196, %196 : vector<8x32xf32>
    %cst_108 = arith.constant dense<0.000000e+00> : vector<8xf32>
    %198 = vector.multi_reduction <add>, %197, %cst_108 [1] : vector<8x32xf32> to vector<8xf32>
    %199 = vector.shape_cast %198 : vector<8xf32> to vector<8x1xf32>
    %cst_109 = arith.constant 3.200000e+01 : f32
    %200 = vector.broadcast %cst_109 : f32 to vector<8x1xf32>
    %201 = arith.divf %199, %200 : vector<8x1xf32>
    %cst_110 = arith.constant 9.99999974E-6 : f32
    %202 = vector.broadcast %cst_110 : f32 to vector<8x1xf32>
    %203 = arith.addf %201, %202 : vector<8x1xf32>
    %204 = math.rsqrt %203 : vector<8x1xf32>
    %205 = vector.broadcast %204 : vector<8x1xf32> to vector<8x32xf32>
    %206 = arith.mulf %196, %205 : vector<8x32xf32>
    %207 = vector.broadcast %176 : vector<1x32xf32> to vector<8x32xf32>
    %208 = arith.mulf %206, %207 : vector<8x32xf32>
    %209 = vector.broadcast %178 : vector<1x32xf32> to vector<8x32xf32>
    %210 = arith.addf %208, %209 : vector<8x32xf32>
    %cst_111 = arith.constant dense<0.000000e+00> : vector<8x96xf32>
    %211 = tpu.matmul %210, %170, %cst_111 {dimension_numbers = #tpu.dot_dimension_numbers<[1], [0], [0], [1], [0, 0, 1, 1], [], []>} : vector<8x32xf32>, vector<32x96xf32>, vector<8x96xf32> -> vector<8x96xf32>
    %212 = vector.broadcast %180 : vector<1x96xf32> to vector<8x96xf32>
    %213 = arith.addf %211, %212 : vector<8x96xf32>
    %cst_112 = arith.constant 0.000000e+00 : f32
    %214 = vector.broadcast %cst_112 : f32 to vector<8x32xf32>
    %215 = vector.extract_strided_slice %213 {offsets = [0, 0], sizes = [8, 8], strides = [1, 1]} : vector<8x96xf32> to vector<8x8xf32>
    %216 = vector.extract_strided_slice %213 {offsets = [0, 32], sizes = [8, 8], strides = [1, 1]} : vector<8x96xf32> to vector<8x8xf32>
    %217 = vector.extract_strided_slice %213 {offsets = [0, 64], sizes = [8, 8], strides = [1, 1]} : vector<8x96xf32> to vector<8x8xf32>
    %cst_113 = arith.constant dense<0.000000e+00> : vector<8x8xf32>
    %218 = tpu.matmul %215, %216, %cst_113 {dimension_numbers = #tpu.dot_dimension_numbers<[1], [1], [0], [0], [0, 0, 1, 0], [], []>} : vector<8x8xf32>, vector<8x8xf32>, vector<8x8xf32> -> vector<8x8xf32>
    %cst_114 = arith.constant 0.353553385 : f32
    %219 = vector.broadcast %cst_114 : f32 to vector<8x8xf32>
    %220 = arith.mulf %218, %219 : vector<8x8xf32>
    %cst_115 = arith.constant dense<0xFF800000> : vector<8xf32>
    %221 = vector.multi_reduction <maximumf>, %220, %cst_115 [1] : vector<8x8xf32> to vector<8xf32>
    %222 = vector.shape_cast %221 : vector<8xf32> to vector<8x1xf32>
    %223 = vector.broadcast %222 : vector<8x1xf32> to vector<8x8xf32>
    %224 = arith.subf %220, %223 : vector<8x8xf32>
    %225 = math.exp %224 : vector<8x8xf32>
    %cst_116 = arith.constant dense<0.000000e+00> : vector<8xf32>
    %226 = vector.multi_reduction <add>, %225, %cst_116 [1] : vector<8x8xf32> to vector<8xf32>
    %227 = vector.shape_cast %226 : vector<8xf32> to vector<8x1xf32>
    %228 = tpu.reciprocal %227 {approx = true} : vector<8x1xf32> -> vector<8x1xf32>
    %229 = vector.broadcast %228 : vector<8x1xf32> to vector<8x8xf32>
    %230 = arith.mulf %225, %229 : vector<8x8xf32>
    %cst_117 = arith.constant dense<0.000000e+00> : vector<8x8xf32>
    %231 = tpu.matmul %230, %217, %cst_117 {dimension_numbers = #tpu.dot_dimension_numbers<[1], [0], [0], [1], [0, 0, 1, 1], [], []>} : vector<8x8xf32>, vector<8x8xf32>, vector<8x8xf32> -> vector<8x8xf32>
    %c1_118 = arith.constant 1 : index
    %c0_119 = arith.constant 0 : index
    %c96_120 = arith.constant 96 : index
    %232 = vector.load %arg2[%c1_118, %c0_119, %c96_120] : memref<2x96x192xf32, #tpu.memory_space<vmem>>, vector<1x8x32xf32>
    %233 = vector.shape_cast %232 : vector<1x8x32xf32> to vector<8x32xf32>
    %cst_121 = arith.constant dense<0.000000e+00> : vector<8x32xf32>
    %234 = tpu.matmul %231, %233, %cst_121 {dimension_numbers = #tpu.dot_dimension_numbers<[1], [0], [0], [1], [0, 0, 1, 1], [], []>} : vector<8x8xf32>, vector<8x32xf32>, vector<8x32xf32> -> vector<8x32xf32>
    %235 = arith.addf %214, %234 : vector<8x32xf32>
    %236 = vector.extract_strided_slice %213 {offsets = [0, 8], sizes = [8, 8], strides = [1, 1]} : vector<8x96xf32> to vector<8x8xf32>
    %237 = vector.extract_strided_slice %213 {offsets = [0, 40], sizes = [8, 8], strides = [1, 1]} : vector<8x96xf32> to vector<8x8xf32>
    %238 = vector.extract_strided_slice %213 {offsets = [0, 72], sizes = [8, 8], strides = [1, 1]} : vector<8x96xf32> to vector<8x8xf32>
    %cst_122 = arith.constant dense<0.000000e+00> : vector<8x8xf32>
    %239 = tpu.matmul %236, %237, %cst_122 {dimension_numbers = #tpu.dot_dimension_numbers<[1], [1], [0], [0], [0, 0, 1, 0], [], []>} : vector<8x8xf32>, vector<8x8xf32>, vector<8x8xf32> -> vector<8x8xf32>
    %cst_123 = arith.constant 0.353553385 : f32
    %240 = vector.broadcast %cst_123 : f32 to vector<8x8xf32>
    %241 = arith.mulf %239, %240 : vector<8x8xf32>
    %cst_124 = arith.constant dense<0xFF800000> : vector<8xf32>
    %242 = vector.multi_reduction <maximumf>, %241, %cst_124 [1] : vector<8x8xf32> to vector<8xf32>
    %243 = vector.shape_cast %242 : vector<8xf32> to vector<8x1xf32>
    %244 = vector.broadcast %243 : vector<8x1xf32> to vector<8x8xf32>
    %245 = arith.subf %241, %244 : vector<8x8xf32>
    %246 = math.exp %245 : vector<8x8xf32>
    %cst_125 = arith.constant dense<0.000000e+00> : vector<8xf32>
    %247 = vector.multi_reduction <add>, %246, %cst_125 [1] : vector<8x8xf32> to vector<8xf32>
    %248 = vector.shape_cast %247 : vector<8xf32> to vector<8x1xf32>
    %249 = tpu.reciprocal %248 {approx = true} : vector<8x1xf32> -> vector<8x1xf32>
    %250 = vector.broadcast %249 : vector<8x1xf32> to vector<8x8xf32>
    %251 = arith.mulf %246, %250 : vector<8x8xf32>
    %cst_126 = arith.constant dense<0.000000e+00> : vector<8x8xf32>
    %252 = tpu.matmul %251, %238, %cst_126 {dimension_numbers = #tpu.dot_dimension_numbers<[1], [0], [0], [1], [0, 0, 1, 1], [], []>} : vector<8x8xf32>, vector<8x8xf32>, vector<8x8xf32> -> vector<8x8xf32>
    %c1_127 = arith.constant 1 : index
    %c8_128 = arith.constant 8 : index
    %c96_129 = arith.constant 96 : index
    %253 = vector.load %arg2[%c1_127, %c8_128, %c96_129] : memref<2x96x192xf32, #tpu.memory_space<vmem>>, vector<1x8x32xf32>
    %254 = vector.shape_cast %253 : vector<1x8x32xf32> to vector<8x32xf32>
    %cst_130 = arith.constant dense<0.000000e+00> : vector<8x32xf32>
    %255 = tpu.matmul %252, %254, %cst_130 {dimension_numbers = #tpu.dot_dimension_numbers<[1], [0], [0], [1], [0, 0, 1, 1], [], []>} : vector<8x8xf32>, vector<8x32xf32>, vector<8x32xf32> -> vector<8x32xf32>
    %256 = arith.addf %235, %255 : vector<8x32xf32>
    %257 = vector.extract_strided_slice %213 {offsets = [0, 16], sizes = [8, 8], strides = [1, 1]} : vector<8x96xf32> to vector<8x8xf32>
    %258 = vector.extract_strided_slice %213 {offsets = [0, 48], sizes = [8, 8], strides = [1, 1]} : vector<8x96xf32> to vector<8x8xf32>
    %259 = vector.extract_strided_slice %213 {offsets = [0, 80], sizes = [8, 8], strides = [1, 1]} : vector<8x96xf32> to vector<8x8xf32>
    %cst_131 = arith.constant dense<0.000000e+00> : vector<8x8xf32>
    %260 = tpu.matmul %257, %258, %cst_131 {dimension_numbers = #tpu.dot_dimension_numbers<[1], [1], [0], [0], [0, 0, 1, 0], [], []>} : vector<8x8xf32>, vector<8x8xf32>, vector<8x8xf32> -> vector<8x8xf32>
    %cst_132 = arith.constant 0.353553385 : f32
    %261 = vector.broadcast %cst_132 : f32 to vector<8x8xf32>
    %262 = arith.mulf %260, %261 : vector<8x8xf32>
    %cst_133 = arith.constant dense<0xFF800000> : vector<8xf32>
    %263 = vector.multi_reduction <maximumf>, %262, %cst_133 [1] : vector<8x8xf32> to vector<8xf32>
    %264 = vector.shape_cast %263 : vector<8xf32> to vector<8x1xf32>
    %265 = vector.broadcast %264 : vector<8x1xf32> to vector<8x8xf32>
    %266 = arith.subf %262, %265 : vector<8x8xf32>
    %267 = math.exp %266 : vector<8x8xf32>
    %cst_134 = arith.constant dense<0.000000e+00> : vector<8xf32>
    %268 = vector.multi_reduction <add>, %267, %cst_134 [1] : vector<8x8xf32> to vector<8xf32>
    %269 = vector.shape_cast %268 : vector<8xf32> to vector<8x1xf32>
    %270 = tpu.reciprocal %269 {approx = true} : vector<8x1xf32> -> vector<8x1xf32>
    %271 = vector.broadcast %270 : vector<8x1xf32> to vector<8x8xf32>
    %272 = arith.mulf %267, %271 : vector<8x8xf32>
    %cst_135 = arith.constant dense<0.000000e+00> : vector<8x8xf32>
    %273 = tpu.matmul %272, %259, %cst_135 {dimension_numbers = #tpu.dot_dimension_numbers<[1], [0], [0], [1], [0, 0, 1, 1], [], []>} : vector<8x8xf32>, vector<8x8xf32>, vector<8x8xf32> -> vector<8x8xf32>
    %c1_136 = arith.constant 1 : index
    %c16_137 = arith.constant 16 : index
    %c96_138 = arith.constant 96 : index
    %274 = vector.load %arg2[%c1_136, %c16_137, %c96_138] : memref<2x96x192xf32, #tpu.memory_space<vmem>>, vector<1x8x32xf32>
    %275 = vector.shape_cast %274 : vector<1x8x32xf32> to vector<8x32xf32>
    %cst_139 = arith.constant dense<0.000000e+00> : vector<8x32xf32>
    %276 = tpu.matmul %273, %275, %cst_139 {dimension_numbers = #tpu.dot_dimension_numbers<[1], [0], [0], [1], [0, 0, 1, 1], [], []>} : vector<8x8xf32>, vector<8x32xf32>, vector<8x32xf32> -> vector<8x32xf32>
    %277 = arith.addf %256, %276 : vector<8x32xf32>
    %278 = vector.extract_strided_slice %213 {offsets = [0, 24], sizes = [8, 8], strides = [1, 1]} : vector<8x96xf32> to vector<8x8xf32>
    %279 = vector.extract_strided_slice %213 {offsets = [0, 56], sizes = [8, 8], strides = [1, 1]} : vector<8x96xf32> to vector<8x8xf32>
    %280 = vector.extract_strided_slice %213 {offsets = [0, 88], sizes = [8, 8], strides = [1, 1]} : vector<8x96xf32> to vector<8x8xf32>
    %cst_140 = arith.constant dense<0.000000e+00> : vector<8x8xf32>
    %281 = tpu.matmul %278, %279, %cst_140 {dimension_numbers = #tpu.dot_dimension_numbers<[1], [1], [0], [0], [0, 0, 1, 0], [], []>} : vector<8x8xf32>, vector<8x8xf32>, vector<8x8xf32> -> vector<8x8xf32>
    %cst_141 = arith.constant 0.353553385 : f32
    %282 = vector.broadcast %cst_141 : f32 to vector<8x8xf32>
    %283 = arith.mulf %281, %282 : vector<8x8xf32>
    %cst_142 = arith.constant dense<0xFF800000> : vector<8xf32>
    %284 = vector.multi_reduction <maximumf>, %283, %cst_142 [1] : vector<8x8xf32> to vector<8xf32>
    %285 = vector.shape_cast %284 : vector<8xf32> to vector<8x1xf32>
    %286 = vector.broadcast %285 : vector<8x1xf32> to vector<8x8xf32>
    %287 = arith.subf %283, %286 : vector<8x8xf32>
    %288 = math.exp %287 : vector<8x8xf32>
    %cst_143 = arith.constant dense<0.000000e+00> : vector<8xf32>
    %289 = vector.multi_reduction <add>, %288, %cst_143 [1] : vector<8x8xf32> to vector<8xf32>
    %290 = vector.shape_cast %289 : vector<8xf32> to vector<8x1xf32>
    %291 = tpu.reciprocal %290 {approx = true} : vector<8x1xf32> -> vector<8x1xf32>
    %292 = vector.broadcast %291 : vector<8x1xf32> to vector<8x8xf32>
    %293 = arith.mulf %288, %292 : vector<8x8xf32>
    %cst_144 = arith.constant dense<0.000000e+00> : vector<8x8xf32>
    %294 = tpu.matmul %293, %280, %cst_144 {dimension_numbers = #tpu.dot_dimension_numbers<[1], [0], [0], [1], [0, 0, 1, 1], [], []>} : vector<8x8xf32>, vector<8x8xf32>, vector<8x8xf32> -> vector<8x8xf32>
    %c1_145 = arith.constant 1 : index
    %c24_146 = arith.constant 24 : index
    %c96_147 = arith.constant 96 : index
    %295 = vector.load %arg2[%c1_145, %c24_146, %c96_147] : memref<2x96x192xf32, #tpu.memory_space<vmem>>, vector<1x8x32xf32>
    %296 = vector.shape_cast %295 : vector<1x8x32xf32> to vector<8x32xf32>
    %cst_148 = arith.constant dense<0.000000e+00> : vector<8x32xf32>
    %297 = tpu.matmul %294, %296, %cst_148 {dimension_numbers = #tpu.dot_dimension_numbers<[1], [0], [0], [1], [0, 0, 1, 1], [], []>} : vector<8x8xf32>, vector<8x32xf32>, vector<8x32xf32> -> vector<8x32xf32>
    %298 = arith.addf %277, %297 : vector<8x32xf32>
    %299 = vector.broadcast %182 : vector<1x32xf32> to vector<8x32xf32>
    %300 = arith.addf %298, %299 : vector<8x32xf32>
    %301 = arith.addf %300, %168 : vector<8x32xf32>
    %cst_149 = arith.constant dense<0.000000e+00> : vector<8xf32>
    %302 = vector.multi_reduction <add>, %301, %cst_149 [1] : vector<8x32xf32> to vector<8xf32>
    %303 = vector.shape_cast %302 : vector<8xf32> to vector<8x1xf32>
    %cst_150 = arith.constant 3.200000e+01 : f32
    %304 = vector.broadcast %cst_150 : f32 to vector<8x1xf32>
    %305 = arith.divf %303, %304 : vector<8x1xf32>
    %306 = vector.broadcast %305 : vector<8x1xf32> to vector<8x32xf32>
    %307 = arith.subf %301, %306 : vector<8x32xf32>
    %308 = arith.mulf %307, %307 : vector<8x32xf32>
    %cst_151 = arith.constant dense<0.000000e+00> : vector<8xf32>
    %309 = vector.multi_reduction <add>, %308, %cst_151 [1] : vector<8x32xf32> to vector<8xf32>
    %310 = vector.shape_cast %309 : vector<8xf32> to vector<8x1xf32>
    %cst_152 = arith.constant 3.200000e+01 : f32
    %311 = vector.broadcast %cst_152 : f32 to vector<8x1xf32>
    %312 = arith.divf %310, %311 : vector<8x1xf32>
    %cst_153 = arith.constant 9.99999974E-6 : f32
    %313 = vector.broadcast %cst_153 : f32 to vector<8x1xf32>
    %314 = arith.addf %312, %313 : vector<8x1xf32>
    %315 = math.rsqrt %314 : vector<8x1xf32>
    %316 = vector.broadcast %315 : vector<8x1xf32> to vector<8x32xf32>
    %317 = arith.mulf %307, %316 : vector<8x32xf32>
    %318 = vector.broadcast %184 : vector<1x32xf32> to vector<8x32xf32>
    %319 = arith.mulf %317, %318 : vector<8x32xf32>
    %320 = vector.broadcast %186 : vector<1x32xf32> to vector<8x32xf32>
    %321 = arith.addf %319, %320 : vector<8x32xf32>
    %cst_154 = arith.constant dense<0.000000e+00> : vector<8x64xf32>
    %322 = tpu.matmul %321, %172, %cst_154 {dimension_numbers = #tpu.dot_dimension_numbers<[1], [0], [0], [1], [0, 0, 1, 1], [], []>} : vector<8x32xf32>, vector<32x64xf32>, vector<8x64xf32> -> vector<8x64xf32>
    %323 = vector.broadcast %188 : vector<1x64xf32> to vector<8x64xf32>
    %324 = arith.addf %322, %323 : vector<8x64xf32>
    %cst_155 = arith.constant 5.000000e-01 : f32
    %325 = vector.broadcast %cst_155 : f32 to vector<8x64xf32>
    %326 = arith.mulf %325, %324 : vector<8x64xf32>
    %cst_156 = arith.constant 0.707106769 : f32
    %327 = vector.broadcast %cst_156 : f32 to vector<8x64xf32>
    %328 = arith.mulf %324, %327 : vector<8x64xf32>
    %329 = math.erf %328 : vector<8x64xf32>
    %cst_157 = arith.constant 1.000000e+00 : f32
    %330 = vector.broadcast %cst_157 : f32 to vector<8x64xf32>
    %331 = arith.addf %330, %329 : vector<8x64xf32>
    %332 = arith.mulf %326, %331 : vector<8x64xf32>
    %cst_158 = arith.constant dense<0.000000e+00> : vector<8x32xf32>
    %333 = tpu.matmul %332, %174, %cst_158 {dimension_numbers = #tpu.dot_dimension_numbers<[1], [0], [0], [1], [0, 0, 1, 1], [], []>} : vector<8x64xf32>, vector<64x32xf32>, vector<8x32xf32> -> vector<8x32xf32>
    %334 = vector.broadcast %190 : vector<1x32xf32> to vector<8x32xf32>
    %335 = arith.addf %333, %334 : vector<8x32xf32>
    %336 = arith.addf %335, %321 : vector<8x32xf32>
    %c0_159 = arith.constant 0 : index
    %c0_160 = arith.constant 0 : index
    %337 = vector.load %arg4[%c0_159, %c0_160] : memref<16x32xf32, #tpu.memory_space<vmem>>, vector<8x32xf32>
    tpu.vector_store %arg4[%c0_159, %c0_160], %336 {strides = array<i32>} : memref<16x32xf32, #tpu.memory_space<vmem>>, vector<8x32xf32>,
    %c8_161 = arith.constant 8 : index
    %c0_162 = arith.constant 0 : index
    %338 = vector.load %arg1[%c8_161, %c0_162] : memref<16x32xf32, #tpu.memory_space<vmem>>, vector<8x32xf32>
    %c0_163 = arith.constant 0 : index
    %c0_164 = arith.constant 0 : index
    %c0_165 = arith.constant 0 : index
    %339 = vector.load %arg2[%c0_163, %c0_164, %c0_165] : memref<2x96x192xf32, #tpu.memory_space<vmem>>, vector<1x32x96xf32>
    %340 = vector.shape_cast %339 : vector<1x32x96xf32> to vector<32x96xf32>
    %c0_166 = arith.constant 0 : index
    %c0_167 = arith.constant 0 : index
    %c128_168 = arith.constant 128 : index
    %341 = vector.load %arg2[%c0_166, %c0_167, %c128_168] : memref<2x96x192xf32, #tpu.memory_space<vmem>>, vector<1x32x64xf32>
    %342 = vector.shape_cast %341 : vector<1x32x64xf32> to vector<32x64xf32>
    %c0_169 = arith.constant 0 : index
    %c32_170 = arith.constant 32 : index
    %c0_171 = arith.constant 0 : index
    %343 = vector.load %arg2[%c0_169, %c32_170, %c0_171] : memref<2x96x192xf32, #tpu.memory_space<vmem>>, vector<1x64x32xf32>
    %344 = vector.shape_cast %343 : vector<1x64x32xf32> to vector<64x32xf32>
    %c0_172 = arith.constant 0 : index
    %c0_173 = arith.constant 0 : index
    %c0_174 = arith.constant 0 : index
    %345 = vector.load %arg3[%c0_172, %c0_173, %c0_174] : memref<2x8x128xf32, #tpu.memory_space<vmem>>, vector<1x1x32xf32>
    %346 = vector.shape_cast %345 : vector<1x1x32xf32> to vector<1x32xf32>
    %c0_175 = arith.constant 0 : index
    %c1_176 = arith.constant 1 : index
    %c0_177 = arith.constant 0 : index
    %347 = vector.load %arg3[%c0_175, %c1_176, %c0_177] : memref<2x8x128xf32, #tpu.memory_space<vmem>>, vector<1x1x32xf32>
    %348 = vector.shape_cast %347 : vector<1x1x32xf32> to vector<1x32xf32>
    %c0_178 = arith.constant 0 : index
    %c2_179 = arith.constant 2 : index
    %c0_180 = arith.constant 0 : index
    %349 = vector.load %arg3[%c0_178, %c2_179, %c0_180] : memref<2x8x128xf32, #tpu.memory_space<vmem>>, vector<1x1x96xf32>
    %350 = vector.shape_cast %349 : vector<1x1x96xf32> to vector<1x96xf32>
    %c0_181 = arith.constant 0 : index
    %c3_182 = arith.constant 3 : index
    %c0_183 = arith.constant 0 : index
    %351 = vector.load %arg3[%c0_181, %c3_182, %c0_183] : memref<2x8x128xf32, #tpu.memory_space<vmem>>, vector<1x1x32xf32>
    %352 = vector.shape_cast %351 : vector<1x1x32xf32> to vector<1x32xf32>
    %c0_184 = arith.constant 0 : index
    %c4_185 = arith.constant 4 : index
    %c0_186 = arith.constant 0 : index
    %353 = vector.load %arg3[%c0_184, %c4_185, %c0_186] : memref<2x8x128xf32, #tpu.memory_space<vmem>>, vector<1x1x32xf32>
    %354 = vector.shape_cast %353 : vector<1x1x32xf32> to vector<1x32xf32>
    %c0_187 = arith.constant 0 : index
    %c5_188 = arith.constant 5 : index
    %c0_189 = arith.constant 0 : index
    %355 = vector.load %arg3[%c0_187, %c5_188, %c0_189] : memref<2x8x128xf32, #tpu.memory_space<vmem>>, vector<1x1x32xf32>
    %356 = vector.shape_cast %355 : vector<1x1x32xf32> to vector<1x32xf32>
    %c0_190 = arith.constant 0 : index
    %c6_191 = arith.constant 6 : index
    %c0_192 = arith.constant 0 : index
    %357 = vector.load %arg3[%c0_190, %c6_191, %c0_192] : memref<2x8x128xf32, #tpu.memory_space<vmem>>, vector<1x1x64xf32>
    %358 = vector.shape_cast %357 : vector<1x1x64xf32> to vector<1x64xf32>
    %c0_193 = arith.constant 0 : index
    %c7_194 = arith.constant 7 : index
    %c0_195 = arith.constant 0 : index
    %359 = vector.load %arg3[%c0_193, %c7_194, %c0_195] : memref<2x8x128xf32, #tpu.memory_space<vmem>>, vector<1x1x32xf32>
    %360 = vector.shape_cast %359 : vector<1x1x32xf32> to vector<1x32xf32>
    %cst_196 = arith.constant dense<0.000000e+00> : vector<8xf32>
    %361 = vector.multi_reduction <add>, %338, %cst_196 [1] : vector<8x32xf32> to vector<8xf32>
    %362 = vector.shape_cast %361 : vector<8xf32> to vector<8x1xf32>
    %cst_197 = arith.constant 3.200000e+01 : f32
    %363 = vector.broadcast %cst_197 : f32 to vector<8x1xf32>
    %364 = arith.divf %362, %363 : vector<8x1xf32>
    %365 = vector.broadcast %364 : vector<8x1xf32> to vector<8x32xf32>
    %366 = arith.subf %338, %365 : vector<8x32xf32>
    %367 = arith.mulf %366, %366 : vector<8x32xf32>
    %cst_198 = arith.constant dense<0.000000e+00> : vector<8xf32>
    %368 = vector.multi_reduction <add>, %367, %cst_198 [1] : vector<8x32xf32> to vector<8xf32>
    %369 = vector.shape_cast %368 : vector<8xf32> to vector<8x1xf32>
    %cst_199 = arith.constant 3.200000e+01 : f32
    %370 = vector.broadcast %cst_199 : f32 to vector<8x1xf32>
    %371 = arith.divf %369, %370 : vector<8x1xf32>
    %cst_200 = arith.constant 9.99999974E-6 : f32
    %372 = vector.broadcast %cst_200 : f32 to vector<8x1xf32>
    %373 = arith.addf %371, %372 : vector<8x1xf32>
    %374 = math.rsqrt %373 : vector<8x1xf32>
    %375 = vector.broadcast %374 : vector<8x1xf32> to vector<8x32xf32>
    %376 = arith.mulf %366, %375 : vector<8x32xf32>
    %377 = vector.broadcast %346 : vector<1x32xf32> to vector<8x32xf32>
    %378 = arith.mulf %376, %377 : vector<8x32xf32>
    %379 = vector.broadcast %348 : vector<1x32xf32> to vector<8x32xf32>
    %380 = arith.addf %378, %379 : vector<8x32xf32>
    %cst_201 = arith.constant dense<0.000000e+00> : vector<8x96xf32>
    %381 = tpu.matmul %380, %340, %cst_201 {dimension_numbers = #tpu.dot_dimension_numbers<[1], [0], [0], [1], [0, 0, 1, 1], [], []>} : vector<8x32xf32>, vector<32x96xf32>, vector<8x96xf32> -> vector<8x96xf32>
    %382 = vector.broadcast %350 : vector<1x96xf32> to vector<8x96xf32>
    %383 = arith.addf %381, %382 : vector<8x96xf32>
    %cst_202 = arith.constant 0.000000e+00 : f32
    %384 = vector.broadcast %cst_202 : f32 to vector<8x32xf32>
    %385 = vector.extract_strided_slice %383 {offsets = [0, 0], sizes = [8, 8], strides = [1, 1]} : vector<8x96xf32> to vector<8x8xf32>
    %386 = vector.extract_strided_slice %383 {offsets = [0, 32], sizes = [8, 8], strides = [1, 1]} : vector<8x96xf32> to vector<8x8xf32>
    %387 = vector.extract_strided_slice %383 {offsets = [0, 64], sizes = [8, 8], strides = [1, 1]} : vector<8x96xf32> to vector<8x8xf32>
    %cst_203 = arith.constant dense<0.000000e+00> : vector<8x8xf32>
    %388 = tpu.matmul %385, %386, %cst_203 {dimension_numbers = #tpu.dot_dimension_numbers<[1], [1], [0], [0], [0, 0, 1, 0], [], []>} : vector<8x8xf32>, vector<8x8xf32>, vector<8x8xf32> -> vector<8x8xf32>
    %cst_204 = arith.constant 0.353553385 : f32
    %389 = vector.broadcast %cst_204 : f32 to vector<8x8xf32>
    %390 = arith.mulf %388, %389 : vector<8x8xf32>
    %cst_205 = arith.constant dense<0xFF800000> : vector<8xf32>
    %391 = vector.multi_reduction <maximumf>, %390, %cst_205 [1] : vector<8x8xf32> to vector<8xf32>
    %392 = vector.shape_cast %391 : vector<8xf32> to vector<8x1xf32>
    %393 = vector.broadcast %392 : vector<8x1xf32> to vector<8x8xf32>
    %394 = arith.subf %390, %393 : vector<8x8xf32>
    %395 = math.exp %394 : vector<8x8xf32>
    %cst_206 = arith.constant dense<0.000000e+00> : vector<8xf32>
    %396 = vector.multi_reduction <add>, %395, %cst_206 [1] : vector<8x8xf32> to vector<8xf32>
    %397 = vector.shape_cast %396 : vector<8xf32> to vector<8x1xf32>
    %398 = tpu.reciprocal %397 {approx = true} : vector<8x1xf32> -> vector<8x1xf32>
    %399 = vector.broadcast %398 : vector<8x1xf32> to vector<8x8xf32>
    %400 = arith.mulf %395, %399 : vector<8x8xf32>
    %cst_207 = arith.constant dense<0.000000e+00> : vector<8x8xf32>
    %401 = tpu.matmul %400, %387, %cst_207 {dimension_numbers = #tpu.dot_dimension_numbers<[1], [0], [0], [1], [0, 0, 1, 1], [], []>} : vector<8x8xf32>, vector<8x8xf32>, vector<8x8xf32> -> vector<8x8xf32>
    %c0_208 = arith.constant 0 : index
    %c0_209 = arith.constant 0 : index
    %c96_210 = arith.constant 96 : index
    %402 = vector.load %arg2[%c0_208, %c0_209, %c96_210] : memref<2x96x192xf32, #tpu.memory_space<vmem>>, vector<1x8x32xf32>
    %403 = vector.shape_cast %402 : vector<1x8x32xf32> to vector<8x32xf32>
    %cst_211 = arith.constant dense<0.000000e+00> : vector<8x32xf32>
    %404 = tpu.matmul %401, %403, %cst_211 {dimension_numbers = #tpu.dot_dimension_numbers<[1], [0], [0], [1], [0, 0, 1, 1], [], []>} : vector<8x8xf32>, vector<8x32xf32>, vector<8x32xf32> -> vector<8x32xf32>
    %405 = arith.addf %384, %404 : vector<8x32xf32>
    %406 = vector.extract_strided_slice %383 {offsets = [0, 8], sizes = [8, 8], strides = [1, 1]} : vector<8x96xf32> to vector<8x8xf32>
    %407 = vector.extract_strided_slice %383 {offsets = [0, 40], sizes = [8, 8], strides = [1, 1]} : vector<8x96xf32> to vector<8x8xf32>
    %408 = vector.extract_strided_slice %383 {offsets = [0, 72], sizes = [8, 8], strides = [1, 1]} : vector<8x96xf32> to vector<8x8xf32>
    %cst_212 = arith.constant dense<0.000000e+00> : vector<8x8xf32>
    %409 = tpu.matmul %406, %407, %cst_212 {dimension_numbers = #tpu.dot_dimension_numbers<[1], [1], [0], [0], [0, 0, 1, 0], [], []>} : vector<8x8xf32>, vector<8x8xf32>, vector<8x8xf32> -> vector<8x8xf32>
    %cst_213 = arith.constant 0.353553385 : f32
    %410 = vector.broadcast %cst_213 : f32 to vector<8x8xf32>
    %411 = arith.mulf %409, %410 : vector<8x8xf32>
    %cst_214 = arith.constant dense<0xFF800000> : vector<8xf32>
    %412 = vector.multi_reduction <maximumf>, %411, %cst_214 [1] : vector<8x8xf32> to vector<8xf32>
    %413 = vector.shape_cast %412 : vector<8xf32> to vector<8x1xf32>
    %414 = vector.broadcast %413 : vector<8x1xf32> to vector<8x8xf32>
    %415 = arith.subf %411, %414 : vector<8x8xf32>
    %416 = math.exp %415 : vector<8x8xf32>
    %cst_215 = arith.constant dense<0.000000e+00> : vector<8xf32>
    %417 = vector.multi_reduction <add>, %416, %cst_215 [1] : vector<8x8xf32> to vector<8xf32>
    %418 = vector.shape_cast %417 : vector<8xf32> to vector<8x1xf32>
    %419 = tpu.reciprocal %418 {approx = true} : vector<8x1xf32> -> vector<8x1xf32>
    %420 = vector.broadcast %419 : vector<8x1xf32> to vector<8x8xf32>
    %421 = arith.mulf %416, %420 : vector<8x8xf32>
    %cst_216 = arith.constant dense<0.000000e+00> : vector<8x8xf32>
    %422 = tpu.matmul %421, %408, %cst_216 {dimension_numbers = #tpu.dot_dimension_numbers<[1], [0], [0], [1], [0, 0, 1, 1], [], []>} : vector<8x8xf32>, vector<8x8xf32>, vector<8x8xf32> -> vector<8x8xf32>
    %c0_217 = arith.constant 0 : index
    %c8_218 = arith.constant 8 : index
    %c96_219 = arith.constant 96 : index
    %423 = vector.load %arg2[%c0_217, %c8_218, %c96_219] : memref<2x96x192xf32, #tpu.memory_space<vmem>>, vector<1x8x32xf32>
    %424 = vector.shape_cast %423 : vector<1x8x32xf32> to vector<8x32xf32>
    %cst_220 = arith.constant dense<0.000000e+00> : vector<8x32xf32>
    %425 = tpu.matmul %422, %424, %cst_220 {dimension_numbers = #tpu.dot_dimension_numbers<[1], [0], [0], [1], [0, 0, 1, 1], [], []>} : vector<8x8xf32>, vector<8x32xf32>, vector<8x32xf32> -> vector<8x32xf32>
    %426 = arith.addf %405, %425 : vector<8x32xf32>
    %427 = vector.extract_strided_slice %383 {offsets = [0, 16], sizes = [8, 8], strides = [1, 1]} : vector<8x96xf32> to vector<8x8xf32>
    %428 = vector.extract_strided_slice %383 {offsets = [0, 48], sizes = [8, 8], strides = [1, 1]} : vector<8x96xf32> to vector<8x8xf32>
    %429 = vector.extract_strided_slice %383 {offsets = [0, 80], sizes = [8, 8], strides = [1, 1]} : vector<8x96xf32> to vector<8x8xf32>
    %cst_221 = arith.constant dense<0.000000e+00> : vector<8x8xf32>
    %430 = tpu.matmul %427, %428, %cst_221 {dimension_numbers = #tpu.dot_dimension_numbers<[1], [1], [0], [0], [0, 0, 1, 0], [], []>} : vector<8x8xf32>, vector<8x8xf32>, vector<8x8xf32> -> vector<8x8xf32>
    %cst_222 = arith.constant 0.353553385 : f32
    %431 = vector.broadcast %cst_222 : f32 to vector<8x8xf32>
    %432 = arith.mulf %430, %431 : vector<8x8xf32>
    %cst_223 = arith.constant dense<0xFF800000> : vector<8xf32>
    %433 = vector.multi_reduction <maximumf>, %432, %cst_223 [1] : vector<8x8xf32> to vector<8xf32>
    %434 = vector.shape_cast %433 : vector<8xf32> to vector<8x1xf32>
    %435 = vector.broadcast %434 : vector<8x1xf32> to vector<8x8xf32>
    %436 = arith.subf %432, %435 : vector<8x8xf32>
    %437 = math.exp %436 : vector<8x8xf32>
    %cst_224 = arith.constant dense<0.000000e+00> : vector<8xf32>
    %438 = vector.multi_reduction <add>, %437, %cst_224 [1] : vector<8x8xf32> to vector<8xf32>
    %439 = vector.shape_cast %438 : vector<8xf32> to vector<8x1xf32>
    %440 = tpu.reciprocal %439 {approx = true} : vector<8x1xf32> -> vector<8x1xf32>
    %441 = vector.broadcast %440 : vector<8x1xf32> to vector<8x8xf32>
    %442 = arith.mulf %437, %441 : vector<8x8xf32>
    %cst_225 = arith.constant dense<0.000000e+00> : vector<8x8xf32>
    %443 = tpu.matmul %442, %429, %cst_225 {dimension_numbers = #tpu.dot_dimension_numbers<[1], [0], [0], [1], [0, 0, 1, 1], [], []>} : vector<8x8xf32>, vector<8x8xf32>, vector<8x8xf32> -> vector<8x8xf32>
    %c0_226 = arith.constant 0 : index
    %c16_227 = arith.constant 16 : index
    %c96_228 = arith.constant 96 : index
    %444 = vector.load %arg2[%c0_226, %c16_227, %c96_228] : memref<2x96x192xf32, #tpu.memory_space<vmem>>, vector<1x8x32xf32>
    %445 = vector.shape_cast %444 : vector<1x8x32xf32> to vector<8x32xf32>
    %cst_229 = arith.constant dense<0.000000e+00> : vector<8x32xf32>
    %446 = tpu.matmul %443, %445, %cst_229 {dimension_numbers = #tpu.dot_dimension_numbers<[1], [0], [0], [1], [0, 0, 1, 1], [], []>} : vector<8x8xf32>, vector<8x32xf32>, vector<8x32xf32> -> vector<8x32xf32>
    %447 = arith.addf %426, %446 : vector<8x32xf32>
    %448 = vector.extract_strided_slice %383 {offsets = [0, 24], sizes = [8, 8], strides = [1, 1]} : vector<8x96xf32> to vector<8x8xf32>
    %449 = vector.extract_strided_slice %383 {offsets = [0, 56], sizes = [8, 8], strides = [1, 1]} : vector<8x96xf32> to vector<8x8xf32>
    %450 = vector.extract_strided_slice %383 {offsets = [0, 88], sizes = [8, 8], strides = [1, 1]} : vector<8x96xf32> to vector<8x8xf32>
    %cst_230 = arith.constant dense<0.000000e+00> : vector<8x8xf32>
    %451 = tpu.matmul %448, %449, %cst_230 {dimension_numbers = #tpu.dot_dimension_numbers<[1], [1], [0], [0], [0, 0, 1, 0], [], []>} : vector<8x8xf32>, vector<8x8xf32>, vector<8x8xf32> -> vector<8x8xf32>
    %cst_231 = arith.constant 0.353553385 : f32
    %452 = vector.broadcast %cst_231 : f32 to vector<8x8xf32>
    %453 = arith.mulf %451, %452 : vector<8x8xf32>
    %cst_232 = arith.constant dense<0xFF800000> : vector<8xf32>
    %454 = vector.multi_reduction <maximumf>, %453, %cst_232 [1] : vector<8x8xf32> to vector<8xf32>
    %455 = vector.shape_cast %454 : vector<8xf32> to vector<8x1xf32>
    %456 = vector.broadcast %455 : vector<8x1xf32> to vector<8x8xf32>
    %457 = arith.subf %453, %456 : vector<8x8xf32>
    %458 = math.exp %457 : vector<8x8xf32>
    %cst_233 = arith.constant dense<0.000000e+00> : vector<8xf32>
    %459 = vector.multi_reduction <add>, %458, %cst_233 [1] : vector<8x8xf32> to vector<8xf32>
    %460 = vector.shape_cast %459 : vector<8xf32> to vector<8x1xf32>
    %461 = tpu.reciprocal %460 {approx = true} : vector<8x1xf32> -> vector<8x1xf32>
    %462 = vector.broadcast %461 : vector<8x1xf32> to vector<8x8xf32>
    %463 = arith.mulf %458, %462 : vector<8x8xf32>
    %cst_234 = arith.constant dense<0.000000e+00> : vector<8x8xf32>
    %464 = tpu.matmul %463, %450, %cst_234 {dimension_numbers = #tpu.dot_dimension_numbers<[1], [0], [0], [1], [0, 0, 1, 1], [], []>} : vector<8x8xf32>, vector<8x8xf32>, vector<8x8xf32> -> vector<8x8xf32>
    %c0_235 = arith.constant 0 : index
    %c24_236 = arith.constant 24 : index
    %c96_237 = arith.constant 96 : index
    %465 = vector.load %arg2[%c0_235, %c24_236, %c96_237] : memref<2x96x192xf32, #tpu.memory_space<vmem>>, vector<1x8x32xf32>
    %466 = vector.shape_cast %465 : vector<1x8x32xf32> to vector<8x32xf32>
    %cst_238 = arith.constant dense<0.000000e+00> : vector<8x32xf32>
    %467 = tpu.matmul %464, %466, %cst_238 {dimension_numbers = #tpu.dot_dimension_numbers<[1], [0], [0], [1], [0, 0, 1, 1], [], []>} : vector<8x8xf32>, vector<8x32xf32>, vector<8x32xf32> -> vector<8x32xf32>
    %468 = arith.addf %447, %467 : vector<8x32xf32>
    %469 = vector.broadcast %352 : vector<1x32xf32> to vector<8x32xf32>
    %470 = arith.addf %468, %469 : vector<8x32xf32>
    %471 = arith.addf %470, %338 : vector<8x32xf32>
    %cst_239 = arith.constant dense<0.000000e+00> : vector<8xf32>
    %472 = vector.multi_reduction <add>, %471, %cst_239 [1] : vector<8x32xf32> to vector<8xf32>
    %473 = vector.shape_cast %472 : vector<8xf32> to vector<8x1xf32>
    %cst_240 = arith.constant 3.200000e+01 : f32
    %474 = vector.broadcast %cst_240 : f32 to vector<8x1xf32>
    %475 = arith.divf %473, %474 : vector<8x1xf32>
    %476 = vector.broadcast %475 : vector<8x1xf32> to vector<8x32xf32>
    %477 = arith.subf %471, %476 : vector<8x32xf32>
    %478 = arith.mulf %477, %477 : vector<8x32xf32>
    %cst_241 = arith.constant dense<0.000000e+00> : vector<8xf32>
    %479 = vector.multi_reduction <add>, %478, %cst_241 [1] : vector<8x32xf32> to vector<8xf32>
    %480 = vector.shape_cast %479 : vector<8xf32> to vector<8x1xf32>
    %cst_242 = arith.constant 3.200000e+01 : f32
    %481 = vector.broadcast %cst_242 : f32 to vector<8x1xf32>
    %482 = arith.divf %480, %481 : vector<8x1xf32>
    %cst_243 = arith.constant 9.99999974E-6 : f32
    %483 = vector.broadcast %cst_243 : f32 to vector<8x1xf32>
    %484 = arith.addf %482, %483 : vector<8x1xf32>
    %485 = math.rsqrt %484 : vector<8x1xf32>
    %486 = vector.broadcast %485 : vector<8x1xf32> to vector<8x32xf32>
    %487 = arith.mulf %477, %486 : vector<8x32xf32>
    %488 = vector.broadcast %354 : vector<1x32xf32> to vector<8x32xf32>
    %489 = arith.mulf %487, %488 : vector<8x32xf32>
    %490 = vector.broadcast %356 : vector<1x32xf32> to vector<8x32xf32>
    %491 = arith.addf %489, %490 : vector<8x32xf32>
    %cst_244 = arith.constant dense<0.000000e+00> : vector<8x64xf32>
    %492 = tpu.matmul %491, %342, %cst_244 {dimension_numbers = #tpu.dot_dimension_numbers<[1], [0], [0], [1], [0, 0, 1, 1], [], []>} : vector<8x32xf32>, vector<32x64xf32>, vector<8x64xf32> -> vector<8x64xf32>
    %493 = vector.broadcast %358 : vector<1x64xf32> to vector<8x64xf32>
    %494 = arith.addf %492, %493 : vector<8x64xf32>
    %cst_245 = arith.constant 5.000000e-01 : f32
    %495 = vector.broadcast %cst_245 : f32 to vector<8x64xf32>
    %496 = arith.mulf %495, %494 : vector<8x64xf32>
    %cst_246 = arith.constant 0.707106769 : f32
    %497 = vector.broadcast %cst_246 : f32 to vector<8x64xf32>
    %498 = arith.mulf %494, %497 : vector<8x64xf32>
    %499 = math.erf %498 : vector<8x64xf32>
    %cst_247 = arith.constant 1.000000e+00 : f32
    %500 = vector.broadcast %cst_247 : f32 to vector<8x64xf32>
    %501 = arith.addf %500, %499 : vector<8x64xf32>
    %502 = arith.mulf %496, %501 : vector<8x64xf32>
    %cst_248 = arith.constant dense<0.000000e+00> : vector<8x32xf32>
    %503 = tpu.matmul %502, %344, %cst_248 {dimension_numbers = #tpu.dot_dimension_numbers<[1], [0], [0], [1], [0, 0, 1, 1], [], []>} : vector<8x64xf32>, vector<64x32xf32>, vector<8x32xf32> -> vector<8x32xf32>
    %504 = vector.broadcast %360 : vector<1x32xf32> to vector<8x32xf32>
    %505 = arith.addf %503, %504 : vector<8x32xf32>
    %506 = arith.addf %505, %491 : vector<8x32xf32>
    %c1_249 = arith.constant 1 : index
    %c0_250 = arith.constant 0 : index
    %c0_251 = arith.constant 0 : index
    %507 = vector.load %arg2[%c1_249, %c0_250, %c0_251] : memref<2x96x192xf32, #tpu.memory_space<vmem>>, vector<1x32x96xf32>
    %508 = vector.shape_cast %507 : vector<1x32x96xf32> to vector<32x96xf32>
    %c1_252 = arith.constant 1 : index
    %c0_253 = arith.constant 0 : index
    %c128_254 = arith.constant 128 : index
    %509 = vector.load %arg2[%c1_252, %c0_253, %c128_254] : memref<2x96x192xf32, #tpu.memory_space<vmem>>, vector<1x32x64xf32>
    %510 = vector.shape_cast %509 : vector<1x32x64xf32> to vector<32x64xf32>
    %c1_255 = arith.constant 1 : index
    %c32_256 = arith.constant 32 : index
    %c0_257 = arith.constant 0 : index
    %511 = vector.load %arg2[%c1_255, %c32_256, %c0_257] : memref<2x96x192xf32, #tpu.memory_space<vmem>>, vector<1x64x32xf32>
    %512 = vector.shape_cast %511 : vector<1x64x32xf32> to vector<64x32xf32>
    %c1_258 = arith.constant 1 : index
    %c0_259 = arith.constant 0 : index
    %c0_260 = arith.constant 0 : index
    %513 = vector.load %arg3[%c1_258, %c0_259, %c0_260] : memref<2x8x128xf32, #tpu.memory_space<vmem>>, vector<1x1x32xf32>
    %514 = vector.shape_cast %513 : vector<1x1x32xf32> to vector<1x32xf32>
    %c1_261 = arith.constant 1 : index
    %c1_262 = arith.constant 1 : index
    %c0_263 = arith.constant 0 : index
    %515 = vector.load %arg3[%c1_261, %c1_262, %c0_263] : memref<2x8x128xf32, #tpu.memory_space<vmem>>, vector<1x1x32xf32>
    %516 = vector.shape_cast %515 : vector<1x1x32xf32> to vector<1x32xf32>
    %c1_264 = arith.constant 1 : index
    %c2_265 = arith.constant 2 : index
    %c0_266 = arith.constant 0 : index
    %517 = vector.load %arg3[%c1_264, %c2_265, %c0_266] : memref<2x8x128xf32, #tpu.memory_space<vmem>>, vector<1x1x96xf32>
    %518 = vector.shape_cast %517 : vector<1x1x96xf32> to vector<1x96xf32>
    %c1_267 = arith.constant 1 : index
    %c3_268 = arith.constant 3 : index
    %c0_269 = arith.constant 0 : index
    %519 = vector.load %arg3[%c1_267, %c3_268, %c0_269] : memref<2x8x128xf32, #tpu.memory_space<vmem>>, vector<1x1x32xf32>
    %520 = vector.shape_cast %519 : vector<1x1x32xf32> to vector<1x32xf32>
    %c1_270 = arith.constant 1 : index
    %c4_271 = arith.constant 4 : index
    %c0_272 = arith.constant 0 : index
    %521 = vector.load %arg3[%c1_270, %c4_271, %c0_272] : memref<2x8x128xf32, #tpu.memory_space<vmem>>, vector<1x1x32xf32>
    %522 = vector.shape_cast %521 : vector<1x1x32xf32> to vector<1x32xf32>
    %c1_273 = arith.constant 1 : index
    %c5_274 = arith.constant 5 : index
    %c0_275 = arith.constant 0 : index
    %523 = vector.load %arg3[%c1_273, %c5_274, %c0_275] : memref<2x8x128xf32, #tpu.memory_space<vmem>>, vector<1x1x32xf32>
    %524 = vector.shape_cast %523 : vector<1x1x32xf32> to vector<1x32xf32>
    %c1_276 = arith.constant 1 : index
    %c6_277 = arith.constant 6 : index
    %c0_278 = arith.constant 0 : index
    %525 = vector.load %arg3[%c1_276, %c6_277, %c0_278] : memref<2x8x128xf32, #tpu.memory_space<vmem>>, vector<1x1x64xf32>
    %526 = vector.shape_cast %525 : vector<1x1x64xf32> to vector<1x64xf32>
    %c1_279 = arith.constant 1 : index
    %c7_280 = arith.constant 7 : index
    %c0_281 = arith.constant 0 : index
    %527 = vector.load %arg3[%c1_279, %c7_280, %c0_281] : memref<2x8x128xf32, #tpu.memory_space<vmem>>, vector<1x1x32xf32>
    %528 = vector.shape_cast %527 : vector<1x1x32xf32> to vector<1x32xf32>
    %cst_282 = arith.constant dense<0.000000e+00> : vector<8xf32>
    %529 = vector.multi_reduction <add>, %506, %cst_282 [1] : vector<8x32xf32> to vector<8xf32>
    %530 = vector.shape_cast %529 : vector<8xf32> to vector<8x1xf32>
    %cst_283 = arith.constant 3.200000e+01 : f32
    %531 = vector.broadcast %cst_283 : f32 to vector<8x1xf32>
    %532 = arith.divf %530, %531 : vector<8x1xf32>
    %533 = vector.broadcast %532 : vector<8x1xf32> to vector<8x32xf32>
    %534 = arith.subf %506, %533 : vector<8x32xf32>
    %535 = arith.mulf %534, %534 : vector<8x32xf32>
    %cst_284 = arith.constant dense<0.000000e+00> : vector<8xf32>
    %536 = vector.multi_reduction <add>, %535, %cst_284 [1] : vector<8x32xf32> to vector<8xf32>
    %537 = vector.shape_cast %536 : vector<8xf32> to vector<8x1xf32>
    %cst_285 = arith.constant 3.200000e+01 : f32
    %538 = vector.broadcast %cst_285 : f32 to vector<8x1xf32>
    %539 = arith.divf %537, %538 : vector<8x1xf32>
    %cst_286 = arith.constant 9.99999974E-6 : f32
    %540 = vector.broadcast %cst_286 : f32 to vector<8x1xf32>
    %541 = arith.addf %539, %540 : vector<8x1xf32>
    %542 = math.rsqrt %541 : vector<8x1xf32>
    %543 = vector.broadcast %542 : vector<8x1xf32> to vector<8x32xf32>
    %544 = arith.mulf %534, %543 : vector<8x32xf32>
    %545 = vector.broadcast %514 : vector<1x32xf32> to vector<8x32xf32>
    %546 = arith.mulf %544, %545 : vector<8x32xf32>
    %547 = vector.broadcast %516 : vector<1x32xf32> to vector<8x32xf32>
    %548 = arith.addf %546, %547 : vector<8x32xf32>
    %cst_287 = arith.constant dense<0.000000e+00> : vector<8x96xf32>
    %549 = tpu.matmul %548, %508, %cst_287 {dimension_numbers = #tpu.dot_dimension_numbers<[1], [0], [0], [1], [0, 0, 1, 1], [], []>} : vector<8x32xf32>, vector<32x96xf32>, vector<8x96xf32> -> vector<8x96xf32>
    %550 = vector.broadcast %518 : vector<1x96xf32> to vector<8x96xf32>
    %551 = arith.addf %549, %550 : vector<8x96xf32>
    %cst_288 = arith.constant 0.000000e+00 : f32
    %552 = vector.broadcast %cst_288 : f32 to vector<8x32xf32>
    %553 = vector.extract_strided_slice %551 {offsets = [0, 0], sizes = [8, 8], strides = [1, 1]} : vector<8x96xf32> to vector<8x8xf32>
    %554 = vector.extract_strided_slice %551 {offsets = [0, 32], sizes = [8, 8], strides = [1, 1]} : vector<8x96xf32> to vector<8x8xf32>
    %555 = vector.extract_strided_slice %551 {offsets = [0, 64], sizes = [8, 8], strides = [1, 1]} : vector<8x96xf32> to vector<8x8xf32>
    %cst_289 = arith.constant dense<0.000000e+00> : vector<8x8xf32>
    %556 = tpu.matmul %553, %554, %cst_289 {dimension_numbers = #tpu.dot_dimension_numbers<[1], [1], [0], [0], [0, 0, 1, 0], [], []>} : vector<8x8xf32>, vector<8x8xf32>, vector<8x8xf32> -> vector<8x8xf32>
    %cst_290 = arith.constant 0.353553385 : f32
    %557 = vector.broadcast %cst_290 : f32 to vector<8x8xf32>
    %558 = arith.mulf %556, %557 : vector<8x8xf32>
    %cst_291 = arith.constant dense<0xFF800000> : vector<8xf32>
    %559 = vector.multi_reduction <maximumf>, %558, %cst_291 [1] : vector<8x8xf32> to vector<8xf32>
    %560 = vector.shape_cast %559 : vector<8xf32> to vector<8x1xf32>
    %561 = vector.broadcast %560 : vector<8x1xf32> to vector<8x8xf32>
    %562 = arith.subf %558, %561 : vector<8x8xf32>
    %563 = math.exp %562 : vector<8x8xf32>
    %cst_292 = arith.constant dense<0.000000e+00> : vector<8xf32>
    %564 = vector.multi_reduction <add>, %563, %cst_292 [1] : vector<8x8xf32> to vector<8xf32>
    %565 = vector.shape_cast %564 : vector<8xf32> to vector<8x1xf32>
    %566 = tpu.reciprocal %565 {approx = true} : vector<8x1xf32> -> vector<8x1xf32>
    %567 = vector.broadcast %566 : vector<8x1xf32> to vector<8x8xf32>
    %568 = arith.mulf %563, %567 : vector<8x8xf32>
    %cst_293 = arith.constant dense<0.000000e+00> : vector<8x8xf32>
    %569 = tpu.matmul %568, %555, %cst_293 {dimension_numbers = #tpu.dot_dimension_numbers<[1], [0], [0], [1], [0, 0, 1, 1], [], []>} : vector<8x8xf32>, vector<8x8xf32>, vector<8x8xf32> -> vector<8x8xf32>
    %c1_294 = arith.constant 1 : index
    %c0_295 = arith.constant 0 : index
    %c96_296 = arith.constant 96 : index
    %570 = vector.load %arg2[%c1_294, %c0_295, %c96_296] : memref<2x96x192xf32, #tpu.memory_space<vmem>>, vector<1x8x32xf32>
    %571 = vector.shape_cast %570 : vector<1x8x32xf32> to vector<8x32xf32>
    %cst_297 = arith.constant dense<0.000000e+00> : vector<8x32xf32>
    %572 = tpu.matmul %569, %571, %cst_297 {dimension_numbers = #tpu.dot_dimension_numbers<[1], [0], [0], [1], [0, 0, 1, 1], [], []>} : vector<8x8xf32>, vector<8x32xf32>, vector<8x32xf32> -> vector<8x32xf32>
    %573 = arith.addf %552, %572 : vector<8x32xf32>
    %574 = vector.extract_strided_slice %551 {offsets = [0, 8], sizes = [8, 8], strides = [1, 1]} : vector<8x96xf32> to vector<8x8xf32>
    %575 = vector.extract_strided_slice %551 {offsets = [0, 40], sizes = [8, 8], strides = [1, 1]} : vector<8x96xf32> to vector<8x8xf32>
    %576 = vector.extract_strided_slice %551 {offsets = [0, 72], sizes = [8, 8], strides = [1, 1]} : vector<8x96xf32> to vector<8x8xf32>
    %cst_298 = arith.constant dense<0.000000e+00> : vector<8x8xf32>
    %577 = tpu.matmul %574, %575, %cst_298 {dimension_numbers = #tpu.dot_dimension_numbers<[1], [1], [0], [0], [0, 0, 1, 0], [], []>} : vector<8x8xf32>, vector<8x8xf32>, vector<8x8xf32> -> vector<8x8xf32>
    %cst_299 = arith.constant 0.353553385 : f32
    %578 = vector.broadcast %cst_299 : f32 to vector<8x8xf32>
    %579 = arith.mulf %577, %578 : vector<8x8xf32>
    %cst_300 = arith.constant dense<0xFF800000> : vector<8xf32>
    %580 = vector.multi_reduction <maximumf>, %579, %cst_300 [1] : vector<8x8xf32> to vector<8xf32>
    %581 = vector.shape_cast %580 : vector<8xf32> to vector<8x1xf32>
    %582 = vector.broadcast %581 : vector<8x1xf32> to vector<8x8xf32>
    %583 = arith.subf %579, %582 : vector<8x8xf32>
    %584 = math.exp %583 : vector<8x8xf32>
    %cst_301 = arith.constant dense<0.000000e+00> : vector<8xf32>
    %585 = vector.multi_reduction <add>, %584, %cst_301 [1] : vector<8x8xf32> to vector<8xf32>
    %586 = vector.shape_cast %585 : vector<8xf32> to vector<8x1xf32>
    %587 = tpu.reciprocal %586 {approx = true} : vector<8x1xf32> -> vector<8x1xf32>
    %588 = vector.broadcast %587 : vector<8x1xf32> to vector<8x8xf32>
    %589 = arith.mulf %584, %588 : vector<8x8xf32>
    %cst_302 = arith.constant dense<0.000000e+00> : vector<8x8xf32>
    %590 = tpu.matmul %589, %576, %cst_302 {dimension_numbers = #tpu.dot_dimension_numbers<[1], [0], [0], [1], [0, 0, 1, 1], [], []>} : vector<8x8xf32>, vector<8x8xf32>, vector<8x8xf32> -> vector<8x8xf32>
    %c1_303 = arith.constant 1 : index
    %c8_304 = arith.constant 8 : index
    %c96_305 = arith.constant 96 : index
    %591 = vector.load %arg2[%c1_303, %c8_304, %c96_305] : memref<2x96x192xf32, #tpu.memory_space<vmem>>, vector<1x8x32xf32>
    %592 = vector.shape_cast %591 : vector<1x8x32xf32> to vector<8x32xf32>
    %cst_306 = arith.constant dense<0.000000e+00> : vector<8x32xf32>
    %593 = tpu.matmul %590, %592, %cst_306 {dimension_numbers = #tpu.dot_dimension_numbers<[1], [0], [0], [1], [0, 0, 1, 1], [], []>} : vector<8x8xf32>, vector<8x32xf32>, vector<8x32xf32> -> vector<8x32xf32>
    %594 = arith.addf %573, %593 : vector<8x32xf32>
    %595 = vector.extract_strided_slice %551 {offsets = [0, 16], sizes = [8, 8], strides = [1, 1]} : vector<8x96xf32> to vector<8x8xf32>
    %596 = vector.extract_strided_slice %551 {offsets = [0, 48], sizes = [8, 8], strides = [1, 1]} : vector<8x96xf32> to vector<8x8xf32>
    %597 = vector.extract_strided_slice %551 {offsets = [0, 80], sizes = [8, 8], strides = [1, 1]} : vector<8x96xf32> to vector<8x8xf32>
    %cst_307 = arith.constant dense<0.000000e+00> : vector<8x8xf32>
    %598 = tpu.matmul %595, %596, %cst_307 {dimension_numbers = #tpu.dot_dimension_numbers<[1], [1], [0], [0], [0, 0, 1, 0], [], []>} : vector<8x8xf32>, vector<8x8xf32>, vector<8x8xf32> -> vector<8x8xf32>
    %cst_308 = arith.constant 0.353553385 : f32
    %599 = vector.broadcast %cst_308 : f32 to vector<8x8xf32>
    %600 = arith.mulf %598, %599 : vector<8x8xf32>
    %cst_309 = arith.constant dense<0xFF800000> : vector<8xf32>
    %601 = vector.multi_reduction <maximumf>, %600, %cst_309 [1] : vector<8x8xf32> to vector<8xf32>
    %602 = vector.shape_cast %601 : vector<8xf32> to vector<8x1xf32>
    %603 = vector.broadcast %602 : vector<8x1xf32> to vector<8x8xf32>
    %604 = arith.subf %600, %603 : vector<8x8xf32>
    %605 = math.exp %604 : vector<8x8xf32>
    %cst_310 = arith.constant dense<0.000000e+00> : vector<8xf32>
    %606 = vector.multi_reduction <add>, %605, %cst_310 [1] : vector<8x8xf32> to vector<8xf32>
    %607 = vector.shape_cast %606 : vector<8xf32> to vector<8x1xf32>
    %608 = tpu.reciprocal %607 {approx = true} : vector<8x1xf32> -> vector<8x1xf32>
    %609 = vector.broadcast %608 : vector<8x1xf32> to vector<8x8xf32>
    %610 = arith.mulf %605, %609 : vector<8x8xf32>
    %cst_311 = arith.constant dense<0.000000e+00> : vector<8x8xf32>
    %611 = tpu.matmul %610, %597, %cst_311 {dimension_numbers = #tpu.dot_dimension_numbers<[1], [0], [0], [1], [0, 0, 1, 1], [], []>} : vector<8x8xf32>, vector<8x8xf32>, vector<8x8xf32> -> vector<8x8xf32>
    %c1_312 = arith.constant 1 : index
    %c16_313 = arith.constant 16 : index
    %c96_314 = arith.constant 96 : index
    %612 = vector.load %arg2[%c1_312, %c16_313, %c96_314] : memref<2x96x192xf32, #tpu.memory_space<vmem>>, vector<1x8x32xf32>
    %613 = vector.shape_cast %612 : vector<1x8x32xf32> to vector<8x32xf32>
    %cst_315 = arith.constant dense<0.000000e+00> : vector<8x32xf32>
    %614 = tpu.matmul %611, %613, %cst_315 {dimension_numbers = #tpu.dot_dimension_numbers<[1], [0], [0], [1], [0, 0, 1, 1], [], []>} : vector<8x8xf32>, vector<8x32xf32>, vector<8x32xf32> -> vector<8x32xf32>
    %615 = arith.addf %594, %614 : vector<8x32xf32>
    %616 = vector.extract_strided_slice %551 {offsets = [0, 24], sizes = [8, 8], strides = [1, 1]} : vector<8x96xf32> to vector<8x8xf32>
    %617 = vector.extract_strided_slice %551 {offsets = [0, 56], sizes = [8, 8], strides = [1, 1]} : vector<8x96xf32> to vector<8x8xf32>
    %618 = vector.extract_strided_slice %551 {offsets = [0, 88], sizes = [8, 8], strides = [1, 1]} : vector<8x96xf32> to vector<8x8xf32>
    %cst_316 = arith.constant dense<0.000000e+00> : vector<8x8xf32>
    %619 = tpu.matmul %616, %617, %cst_316 {dimension_numbers = #tpu.dot_dimension_numbers<[1], [1], [0], [0], [0, 0, 1, 0], [], []>} : vector<8x8xf32>, vector<8x8xf32>, vector<8x8xf32> -> vector<8x8xf32>
    %cst_317 = arith.constant 0.353553385 : f32
    %620 = vector.broadcast %cst_317 : f32 to vector<8x8xf32>
    %621 = arith.mulf %619, %620 : vector<8x8xf32>
    %cst_318 = arith.constant dense<0xFF800000> : vector<8xf32>
    %622 = vector.multi_reduction <maximumf>, %621, %cst_318 [1] : vector<8x8xf32> to vector<8xf32>
    %623 = vector.shape_cast %622 : vector<8xf32> to vector<8x1xf32>
    %624 = vector.broadcast %623 : vector<8x1xf32> to vector<8x8xf32>
    %625 = arith.subf %621, %624 : vector<8x8xf32>
    %626 = math.exp %625 : vector<8x8xf32>
    %cst_319 = arith.constant dense<0.000000e+00> : vector<8xf32>
    %627 = vector.multi_reduction <add>, %626, %cst_319 [1] : vector<8x8xf32> to vector<8xf32>
    %628 = vector.shape_cast %627 : vector<8xf32> to vector<8x1xf32>
    %629 = tpu.reciprocal %628 {approx = true} : vector<8x1xf32> -> vector<8x1xf32>
    %630 = vector.broadcast %629 : vector<8x1xf32> to vector<8x8xf32>
    %631 = arith.mulf %626, %630 : vector<8x8xf32>
    %cst_320 = arith.constant dense<0.000000e+00> : vector<8x8xf32>
    %632 = tpu.matmul %631, %618, %cst_320 {dimension_numbers = #tpu.dot_dimension_numbers<[1], [0], [0], [1], [0, 0, 1, 1], [], []>} : vector<8x8xf32>, vector<8x8xf32>, vector<8x8xf32> -> vector<8x8xf32>
    %c1_321 = arith.constant 1 : index
    %c24_322 = arith.constant 24 : index
    %c96_323 = arith.constant 96 : index
    %633 = vector.load %arg2[%c1_321, %c24_322, %c96_323] : memref<2x96x192xf32, #tpu.memory_space<vmem>>, vector<1x8x32xf32>
    %634 = vector.shape_cast %633 : vector<1x8x32xf32> to vector<8x32xf32>
    %cst_324 = arith.constant dense<0.000000e+00> : vector<8x32xf32>
    %635 = tpu.matmul %632, %634, %cst_324 {dimension_numbers = #tpu.dot_dimension_numbers<[1], [0], [0], [1], [0, 0, 1, 1], [], []>} : vector<8x8xf32>, vector<8x32xf32>, vector<8x32xf32> -> vector<8x32xf32>
    %636 = arith.addf %615, %635 : vector<8x32xf32>
    %637 = vector.broadcast %520 : vector<1x32xf32> to vector<8x32xf32>
    %638 = arith.addf %636, %637 : vector<8x32xf32>
    %639 = arith.addf %638, %506 : vector<8x32xf32>
    %cst_325 = arith.constant dense<0.000000e+00> : vector<8xf32>
    %640 = vector.multi_reduction <add>, %639, %cst_325 [1] : vector<8x32xf32> to vector<8xf32>
    %641 = vector.shape_cast %640 : vector<8xf32> to vector<8x1xf32>
    %cst_326 = arith.constant 3.200000e+01 : f32
    %642 = vector.broadcast %cst_326 : f32 to vector<8x1xf32>
    %643 = arith.divf %641, %642 : vector<8x1xf32>
    %644 = vector.broadcast %643 : vector<8x1xf32> to vector<8x32xf32>
    %645 = arith.subf %639, %644 : vector<8x32xf32>
    %646 = arith.mulf %645, %645 : vector<8x32xf32>
    %cst_327 = arith.constant dense<0.000000e+00> : vector<8xf32>
    %647 = vector.multi_reduction <add>, %646, %cst_327 [1] : vector<8x32xf32> to vector<8xf32>
    %648 = vector.shape_cast %647 : vector<8xf32> to vector<8x1xf32>
    %cst_328 = arith.constant 3.200000e+01 : f32
    %649 = vector.broadcast %cst_328 : f32 to vector<8x1xf32>
    %650 = arith.divf %648, %649 : vector<8x1xf32>
    %cst_329 = arith.constant 9.99999974E-6 : f32
    %651 = vector.broadcast %cst_329 : f32 to vector<8x1xf32>
    %652 = arith.addf %650, %651 : vector<8x1xf32>
    %653 = math.rsqrt %652 : vector<8x1xf32>
    %654 = vector.broadcast %653 : vector<8x1xf32> to vector<8x32xf32>
    %655 = arith.mulf %645, %654 : vector<8x32xf32>
    %656 = vector.broadcast %522 : vector<1x32xf32> to vector<8x32xf32>
    %657 = arith.mulf %655, %656 : vector<8x32xf32>
    %658 = vector.broadcast %524 : vector<1x32xf32> to vector<8x32xf32>
    %659 = arith.addf %657, %658 : vector<8x32xf32>
    %cst_330 = arith.constant dense<0.000000e+00> : vector<8x64xf32>
    %660 = tpu.matmul %659, %510, %cst_330 {dimension_numbers = #tpu.dot_dimension_numbers<[1], [0], [0], [1], [0, 0, 1, 1], [], []>} : vector<8x32xf32>, vector<32x64xf32>, vector<8x64xf32> -> vector<8x64xf32>
    %661 = vector.broadcast %526 : vector<1x64xf32> to vector<8x64xf32>
    %662 = arith.addf %660, %661 : vector<8x64xf32>
    %cst_331 = arith.constant 5.000000e-01 : f32
    %663 = vector.broadcast %cst_331 : f32 to vector<8x64xf32>
    %664 = arith.mulf %663, %662 : vector<8x64xf32>
    %cst_332 = arith.constant 0.707106769 : f32
    %665 = vector.broadcast %cst_332 : f32 to vector<8x64xf32>
    %666 = arith.mulf %662, %665 : vector<8x64xf32>
    %667 = math.erf %666 : vector<8x64xf32>
    %cst_333 = arith.constant 1.000000e+00 : f32
    %668 = vector.broadcast %cst_333 : f32 to vector<8x64xf32>
    %669 = arith.addf %668, %667 : vector<8x64xf32>
    %670 = arith.mulf %664, %669 : vector<8x64xf32>
    %cst_334 = arith.constant dense<0.000000e+00> : vector<8x32xf32>
    %671 = tpu.matmul %670, %512, %cst_334 {dimension_numbers = #tpu.dot_dimension_numbers<[1], [0], [0], [1], [0, 0, 1, 1], [], []>} : vector<8x64xf32>, vector<64x32xf32>, vector<8x32xf32> -> vector<8x32xf32>
    %672 = vector.broadcast %528 : vector<1x32xf32> to vector<8x32xf32>
    %673 = arith.addf %671, %672 : vector<8x32xf32>
    %674 = arith.addf %673, %659 : vector<8x32xf32>
    %c8_335 = arith.constant 8 : index
    %c0_336 = arith.constant 0 : index
    %675 = vector.load %arg4[%c8_335, %c0_336] : memref<16x32xf32, #tpu.memory_space<vmem>>, vector<8x32xf32>
    tpu.vector_store %arg4[%c8_335, %c0_336], %674 {strides = array<i32>} : memref<16x32xf32, #tpu.memory_space<vmem>>, vector<8x32xf32>,
    return
  }
  func.func @transform_0(%arg0: i32) -> (i32, i32) {
    %c0_i32 = arith.constant 0 : i32
    %c0_i32_0 = arith.constant 0 : i32
    return %arg0, %c0_i32 : i32, i32
  }
  func.func @transform_1(%arg0: i32) -> (i32, i32, i32) {
    %c0_i32 = arith.constant 0 : i32
    %c0_i32_0 = arith.constant 0 : i32
    %c0_i32_1 = arith.constant 0 : i32
    %c0_i32_2 = arith.constant 0 : i32
    return %c0_i32, %c0_i32_0, %c0_i32_1 : i32, i32, i32
  }
  func.func @transform_2(%arg0: i32) -> (i32, i32, i32) {
    %c0_i32 = arith.constant 0 : i32
    %c0_i32_0 = arith.constant 0 : i32
    %c0_i32_1 = arith.constant 0 : i32
    %c0_i32_2 = arith.constant 0 : i32
    return %c0_i32, %c0_i32_0, %c0_i32_1 : i32, i32, i32
  }
  func.func @transform_3(%arg0: i32) -> (i32, i32) {
    %c0_i32 = arith.constant 0 : i32
    %c0_i32_0 = arith.constant 0 : i32
    return %arg0, %c0_i32 : i32, i32
  }
}

</mosaic_0001>

<bundles_post_ra>
// kernel: tpu_custom_call.1
= control target key start
LH: loop header
LB: loop body
LE: loop exit
PB: predicated region body
PF: predicated region fallthrough
CT: control target
= control target key end

     0   :  { %8 = vsyncpa [#allocation3], 0  ;;  %s3174_s0 = inlined_call_operand.hbm [shape: f32[16,32], index: 0, kind: input, shape index: {}]   ;;  %s3175_s1 = inlined_call_operand.hbm [shape: f32[2,96,192], index: 1, kind: input, shape index: {}]   ;;  %s3176_s2 = inlined_call_operand.hbm [shape: f32[2,8,128], index: 2, kind: input, shape index: {}]   ;;  %s3177_s3 = inlined_call_operand.hbm [shape: f32[16,32], index: 3, kind: output, shape index: {}]  }
   0x1   :  { %9 = vsyncpa [#allocation6], 0  ;;  %s28_s14 = sshll.u32 %s3175_s1, 4  ;;  %s29_s14 = int_to_ptr.hbm [resolvable:$true] %s28_s14 }
   0x2   :  { %10 = vsyncpa [#allocation4], 0  ;;  %s2712_s15 = smov [#allocation5]   ;;  %s15_s19 = sshll.u32 %s3174_s0, 4  ;;  %s16_s19 = int_to_ptr.hbm [resolvable:$true] %s15_s19 }
   0x3   :  { %s30_s16 = sshll.u32 %s2712_s15, 4  ;;  %s2713_s20 = smov 256   ;;  %s31_s16 = int_to_ptr.vmem [resolvable:$true] %s30_s16 }
   0x4   :  { %s2714_s21 = smov 16   ;;  %s2715_s22 = smov [#allocation2]  }
   0x5   :  { %36 = dma.hbm_to_vmem [thread:$0]  %s29_s14, 6144, %s31_s16, [#allocation6], %s2713_s20, %s2713_s20, %s2714_s21  }
   0x6   :  { %s17_s23 = sshll.u32 %s2715_s22, 4  ;;  %s2716_s24 = smov 128   ;;  %s18_s23 = int_to_ptr.vmem [resolvable:$true] %s17_s23 }
   0x7   :  { %s2717_s25 = smov 8   ;;  %s41_s27 = sshll.u32 %s3176_s2, 4  ;;  %s42_s27 = int_to_ptr.hbm [resolvable:$true] %s41_s27 }
   0x8   :  { %23 = dma.hbm_to_vmem [thread:$0]  %s16_s19, 256, %s18_s23, [#allocation3], %s2716_s24, %s2716_s24, %s2717_s25  }
   0x9   :  { %s2718_s28 = smov [#allocation7]  }
   0xa   :  { %s43_s0 = sshll.u32 %s2718_s28, 4  ;;  %s44_s0 = int_to_ptr.vmem [resolvable:$true] %s43_s0 }
   0xb   :  { %49 = dma.hbm_to_vmem [thread:$0]  %s42_s27, 256, %s44_s0, [#allocation6], %s2716_s24, %s2716_s24, %s2717_s25  }
   0xc   :  { %2706 = dma.done.wait [#allocation3], 256  }
   0xd   :  { %2707 = vsyncadd [#allocation3], 4294967040 }
   0xe   :  { %2708 = dma.done.wait [#allocation6], 6400  }
   0xf   :  { %2709 = vsyncadd [#allocation6], 4294960896  ;;  %vm87_vm0 = vcmask 261120   ;;  %v2768_v0 = vld [vmem:[#allocation2] sm:$0xff]  ;;  %v2719_v2 = vmov 32.0   ;;  %v2780_v15 = vld [vmem:[#allocation5 + $0x20] sm:$0xff] }
  0x10   :  { %v88_v1 = vsel %vm87_vm0, %v2768_v0, 0.0  ;;  %2519 = vrcp.f32 %v2719_v2  ;;  %v2777_v14 = vld [vmem:[#allocation5 + $0x30] sm:$0xff]  ;;  %v2782_v16 = vld [vmem:[#allocation5] sm:$0xff]  ;;  %s2720_s2 = smov 32   ;;  %s2721_s29 = smov 120   ;;  %vm148_vm5 = vcmask 64512  }
  0x11   :  { %89 = vadd.xlane.f32.xlu0 %v88_v1  ;;  %137 = vmatpush.msra.mxu0 %v2777_v14  ;;  %v2784_v17 = vld [vmem:[#allocation5 + $0x10] sm:$0xff]  ;;  %v2487_v27 = vld [vmem:[#allocation7] ss:$0 sm:$0xff]  ;;  %v2488_v30 = vld [vmem:[#allocation7 + $0x1] ss:$0 sm:$0xff]  ;;  %s2722_s30 = smov 96  }
  0x12   :  { %v2489_v34 = vld [vmem:[#allocation7 + $0x2] ss:$0 sm:$0xff]  ;;  %s2723_s4 = smov 104   ;;  %s2724_s5 = smov 112   ;;  %vm620_vm13 = vcmask 523264  }
  0x13   :  { %138 = vmatpush.msra.mxu0 %v2780_v15  ;;  %s2725_s6 = smov 64   ;;  %s2726_s7 = smov 88  }
  0x14   :  { %s2727_s8 = smov 72   ;;  %s2728_s9 = smov 80  }
  0x15   :  { %139 = vmatpush.msra.mxu0 %v2784_v17  ;;  %s2729_s10 = smov 56   ;;  %s2730_s11 = smov 40  }
  0x16   :  { %v2520_v3 = vpop.eup %2519  ;;  %s2731_s12 = smov 48   ;;  %s2732_s13 = smov [#allocation8]  }
  0x17   :  { %v92_v4 = vmul.f32 32.0, %v2520_v3  ;;  %vm96_vm1 = vweird.f32 %v2520_v3  ;;  %140 = vmatpush.msra.mxu0 %v2782_v16  ;;  %s2370_s14 = sshll.u32 %s2732_s13, 4  ;;  %s2372_s17 = sshll.u32 %s3177_s3, 4  ;;  %s2371_s14 = int_to_ptr.vmem [resolvable:$true] %s2370_s14  ;;  %s2373_s17 = int_to_ptr.hbm [resolvable:$true] %s2372_s17 }
  0x19   :  { %v93_v5 = vsub.f32 1.0, %v92_v4 }
  0x1b   :  { %v94_v6 = vmul.f32 %v2520_v3, %v93_v5 }
  0x1d   :  { %v95_v7 = vadd.f32 %v2520_v3, %v94_v6 }
  0x1f   :  { %v2772_v8 = vsel %vm96_vm1, %v2520_v3, %v95_v7 }
  0x84   :  { %v90_v9 = vpop.xlane.xlu0 %89 }
  0x85   :  { %v98_v10 = vmul.f32 %v2772_v8, %v90_v9 }
  0x87   :  { %v99_v11 = vsub.f32 %v2768_v0, %v98_v10 }
  0x89   :  { %v100_v12 = vmul.f32 %v99_v11, %v99_v11 }
  0x8b   :  { %v101_v13 = vsel %vm87_vm0, %v100_v12, 0.0 }
  0x8c   :  { %102 = vadd.xlane.f32.xlu0 %v101_v13 }
  0xa0   :  { %307 = vrot.lane.b32.xlu0 %v2782_v16, %s2720_s2 }
  0xff   :  { %v103_v18 = vpop.xlane.xlu0 %102 }
 0x100   :  { %v104_v19 = vmul.f32 %v103_v18, %v2772_v8 }
 0x102   :  { %v105_v20 = vadd.f32 1e-05, %v104_v19 }
 0x104   :  { %2521 = vrsqrt.f32 %v105_v20  ;;  %vm112_vm3 = vweird.f32 %v105_v20 }
 0x10a   :  { %v2522_v21 = vpop.eup %2521 }
 0x10b   :  { %v107_v22 = vmul.f32 %v2522_v21, %v105_v20  ;;  %vm113_vm2 = vweird.f32 %v2522_v21 }
 0x10c   :  { %vm114_vm4 = vmor %vm112_vm3, %vm113_vm2 }
 0x10d   :  { %v108_v23 = vmul.f32 %v2522_v21, %v107_v22 }
 0x10f   :  { %v109_v24 = vmul.f32 0.5, %v108_v23 }
 0x111   :  { %v110_v25 = vsub.f32 1.5, %v109_v24 }
 0x112   :  { %v308_v33 = vpop.permute.xlu0 %307 }
 0x113   :  { %v111_v26 = vmul.f32 %v2522_v21, %v110_v25  ;;  %328 = vmatpush.msra.mxu3 %v308_v33 }
 0x115   :  { %v115_v28 = vsel %vm114_vm4, %v2522_v21, %v111_v26 }
 0x116   :  { %v116_v29 = vmul.f32 %v115_v28, %v99_v11 }
 0x118   :  { %v118_v31 = vmul.f32 %v2487_v27, %v116_v29 }
 0x11a   :  { %v120_v32 = vadd.f32 %v2488_v30, %v118_v31 }
 0x11c   :  { %2386 = vmatmul.msk.f32.vlgmr.msra.gmra.mxu0 %vm87_vm0, %v120_v32 }
 0x199   :  { %v142_v35 = vpop.f32.mrf.mxu0 }
 0x19a   :  { %v2793_v36 = vadd.f32 %v2489_v34, %v142_v35 }
 0x19c   :  { %212 = vrot.lane.b32.xlu0 %v2793_v36, %s2721_s29  ;;  %146 = vrot.lane.b32.xlu1 %v2793_v36, %s2722_s30 }
 0x1a4   :  { %428 = vrot.lane.b32.xlu0 %v2793_v36, %s2723_s4 }
 0x20e   :  { %v147_v37 = vpop.permute.xlu1 %146  ;;  %v213_v51 = vpop.permute.xlu0 %212 }
 0x20f   :  { %2387 = vmatpush.xpose.msk.msra.mxu1 %vm148_vm5, %v147_v37 }
 0x212   :  { %2388 = vmatmul.msk.f32.vlgmr.msra.gmra.mxu1 %vm148_vm5, %v2793_v36 }
 0x216   :  { %v429_v59 = vpop.permute.xlu0 %428 }
 0x28f   :  { %v170_v38 = vpop.f32.mrf.mxu1 }
 0x290   :  { %v173_v39 = vmul.f32 0.35355338, %v170_v38 }
 0x292   :  { %v174_v40 = vsel %vm148_vm5, %v173_v39, -inf }
 0x293   :  { %175 = vmax.xlane.f32.xlu1 %v174_v40 }
 0x2ac   :  { %333 = vrot.lane.b32.xlu1 %v2793_v36, %s2724_s5 }
 0x306   :  { %v176_v41 = vpop.xlane.xlu1 %175 }
 0x307   :  { %v177_v42 = vsub.f32 %v173_v39, %v176_v41 }
 0x309   :  { %v178_v43 = vmul.f32 1.442695, %v177_v42 }
 0x30b   :  { %2523 = vpow2.f32 %v178_v43 }
 0x311   :  { %v2524_v44 = vpop.eup %2523 }
 0x312   :  { %v180_v45 = vsel %vm148_vm5, %v2524_v44, 0.0 }
 0x313   :  { %181 = vadd.xlane.f32.xlu2 %v180_v45 }
 0x31e   :  { %v334_v54 = vpop.permute.xlu1 %333 }
 0x32b   :  { %185 = vrot.lane.b32.xlu2 %v2793_v36, %s2725_s6 }
 0x333   :  { %214 = vrot.lane.b32.xlu2 %v2793_v36, %s2726_s7 }
 0x33b   :  { %430 = vrot.lane.b32.xlu2 %v2793_v36, %s2727_s8 }
 0x343   :  { %335 = vrot.lane.b32.xlu2 %v2793_v36, %s2728_s9 }
 0x386   :  { %v182_v46 = vpop.xlane.xlu2 %181 }
 0x387   :  { %2525 = vrcp.f32 %v182_v46  ;;  %v2490_v46 = vld [vmem:[#allocation7 + $0x3] ss:$0 sm:$0xff] }
 0x38d   :  { %v2526_v47 = vpop.eup %2525 }
 0x38e   :  { %v186_v48 = vpop.permute.xlu2 %185  ;;  %v184_v49 = vmul.f32 %v2526_v47, %v2524_v44 }
 0x38f   :  { %206 = vmatpush.msra.mxu2 %v186_v48 }
 0x390   :  { %2389 = vmatmul.msk.f32.vlgmr.msra.gmra.mxu2 %vm148_vm5, %v184_v49 }
 0x396   :  { %v215_v50 = vpop.permute.xlu2 %214 }
 0x397   :  { %2390 = vmatpush.xpose.msk.msrb.mxu0 %vm148_vm5, %v215_v50 }
 0x39a   :  { %2391 = vmatmul.msk.f32.vlgmr.msrb.gmra.mxu0 %vm148_vm5, %v213_v51 }
 0x39e   :  { %v431_v52 = vpop.permute.xlu2 %430 }
 0x39f   :  { %2399 = vmatpush.xpose.msk.msrb.mxu3 %vm148_vm5, %v431_v52 }
 0x3a6   :  { %v336_v53 = vpop.permute.xlu2 %335 }
 0x3a7   :  { %2395 = vmatpush.xpose.msk.msra.mxu0 %vm148_vm5, %v336_v53 }
 0x3aa   :  { %2396 = vmatmul.msk.f32.vlgmr.msra.gmra.mxu0 %vm148_vm5, %v334_v54 }
 0x413   :  { %v208_v55 = vpop.f32.mrf.mxu2 }
 0x414   :  { %2394 = vmatmul.msk.f32.vlgmr.msra.gmra.mxu3 %vm148_vm5, %v208_v55 }
 0x417   :  { %v237_v56 = vpop.f32.mrf.mxu0 }
 0x418   :  { %v240_v57 = vmul.f32 0.35355338, %v237_v56 }
 0x41a   :  { %v241_v58 = vsel %vm148_vm5, %v240_v57, -inf }
 0x41b   :  { %242 = vmax.xlane.f32.xlu0 %v241_v58  ;;  %v69_v58 = vld [vmem:[#allocation5 + $0x28] sm:$0xff] }
 0x41c   :  { %2400 = vmatmul.msk.f32.vlgmr.msrb.gmra.mxu3 %vm148_vm5, %v429_v59  ;;  %v68_v59 = vld [vmem:[#allocation5 + $0x18] sm:$0xff] }
 0x427   :  { %v358_v60 = vpop.f32.mrf.mxu0 }
 0x428   :  { %v361_v61 = vmul.f32 0.35355338, %v358_v60  ;;  %v67_v60 = vld [vmem:[#allocation5 + $0x8] sm:$0xff] }
 0x42a   :  { %v362_v62 = vsel %vm148_vm5, %v361_v61, -inf }
 0x42b   :  { %363 = vmax.xlane.f32.xlu2 %v362_v62 }
 0x48e   :  { %v243_v63 = vpop.xlane.xlu0 %242 }
 0x48f   :  { %v244_v1 = vsub.f32 %v240_v57, %v243_v63  ;;  %v70_v57 = vld [vmem:[#allocation5 + $0x38] sm:$0xff] }
 0x491   :  { %v245_v2 = vmul.f32 1.442695, %v244_v1 }
 0x493   :  { %2527 = vpow2.f32 %v245_v2 }
 0x497   :  { %v2826_v3 = vpop.f32.mrf.mxu3 }
 0x499   :  { %v2528_v4 = vpop.eup %2527 }
 0x49a   :  { %v247_v5 = vsel %vm148_vm5, %v2528_v4, 0.0 }
 0x49b   :  { %248 = vadd.xlane.f32.xlu0 %v247_v5 }
 0x49e   :  { %v364_v6 = vpop.xlane.xlu2 %363 }
 0x49f   :  { %v365_v7 = vsub.f32 %v361_v61, %v364_v6  ;;  %v453_v9 = vpop.f32.mrf.mxu3  ;;  %v2491_v6 = vld [vmem:[#allocation7 + $0x4] ss:$0 sm:$0xff] }
 0x4a0   :  { %v456_v10 = vmul.f32 0.35355338, %v453_v9 }
 0x4a1   :  { %v366_v11 = vmul.f32 1.442695, %v365_v7 }
 0x4a2   :  { %v457_v12 = vsel %vm148_vm5, %v456_v10, -inf }
 0x4a3   :  { %2529 = vpow2.f32 %v366_v11  ;;  %458 = vmax.xlane.f32.xlu1 %v457_v12 }
 0x4a9   :  { %v2530_v13 = vpop.eup %2529 }
 0x4aa   :  { %v368_v18 = vsel %vm148_vm5, %v2530_v13, 0.0 }
 0x4ab   :  { %369 = vadd.xlane.f32.xlu2 %v368_v18 }
 0x4af   :  { %252 = vrot.lane.b32.xlu0 %v2793_v36, %s2729_s10 }
 0x4b7   :  { %280 = vrot.lane.b32.xlu0 %v2784_v17, %s2720_s2 }
 0x4bc   :  { %468 = vrot.lane.b32.xlu1 %v2793_v36, %s2730_s11 }
 0x4bf   :  { %495 = vrot.lane.b32.xlu0 %v2777_v14, %s2720_s2 }
 0x50e   :  { %v249_v19 = vpop.xlane.xlu0 %248 }
 0x50f   :  { %2531 = vrcp.f32 %v249_v19 }
 0x515   :  { %v2532_v23 = vpop.eup %2531 }
 0x516   :  { %v459_v20 = vpop.xlane.xlu1 %458  ;;  %v251_v26 = vmul.f32 %v2532_v23, %v2528_v4  ;;  %v78_v23 = vld [vmem:[#allocation5 + $0xb0] sm:$0xff] }
 0x517   :  { %v460_v21 = vsub.f32 %v456_v10, %v459_v20  ;;  %v2492_v10 = vld [vmem:[#allocation7 + $0x5] ss:$0 sm:$0xff]  ;;  %632 = vmatpush.msra.mxu3 %v78_v23 }
 0x519   :  { %v461_v22 = vmul.f32 1.442695, %v460_v21 }
 0x51b   :  { %2533 = vpow2.f32 %v461_v22 }
 0x51e   :  { %v370_v30 = vpop.xlane.xlu2 %369 }
 0x51f   :  { %2535 = vrcp.f32 %v370_v30 }
 0x521   :  { %v2534_v24 = vpop.eup %2533  ;;  %v253_v25 = vpop.permute.xlu0 %252 }
 0x522   :  { %273 = vmatpush.msrb.mxu2 %v253_v25  ;;  %v463_v27 = vsel %vm148_vm5, %v2534_v24, 0.0 }
 0x523   :  { %464 = vadd.xlane.f32.xlu2 %v463_v27  ;;  %2392 = vmatmul.msk.f32.vlgmr.msrb.gmra.mxu2 %vm148_vm5, %v251_v26  ;;  %v77_v26 = vld [vmem:[#allocation5 + $0xa0] sm:$0xff] }
 0x524   :  { %633 = vmatpush.msra.mxu3 %v77_v26 }
 0x525   :  { %v2536_v32 = vpop.eup %2535 }
 0x526   :  { %v372_v34 = vmul.f32 %v2536_v32, %v2530_v13  ;;  %v2493_v13 = vld [vmem:[#allocation7 + $0x6] ss:$0 sm:$0xff] }
 0x527   :  { %v75_v32 = vld [vmem:[#allocation5 + $0x80] sm:$0xff] }
 0x529   :  { %v281_v29 = vpop.permute.xlu0 %280 }
 0x52a   :  { %301 = vmatpush.msrb.mxu1 %v281_v29  ;;  %v76_v29 = vld [vmem:[#allocation5 + $0x90] sm:$0xff] }
 0x52b   :  { %634 = vmatpush.msra.mxu3 %v76_v29 }
 0x52d   :  { %635 = vmatpush.msra.mxu3 %v75_v32 }
 0x52e   :  { %v469_v28 = vpop.permute.xlu1 %468 }
 0x52f   :  { %489 = vmatpush.msrb.mxu0 %v469_v28 }
 0x531   :  { %v496_v38 = vpop.permute.xlu0 %495 }
 0x53b   :  { %373 = vrot.lane.b32.xlu2 %v2793_v36, %s2731_s12 }
 0x543   :  { %401 = vrot.lane.b32.xlu2 %v2780_v15, %s2720_s2 }
 0x596   :  { %v465_v31 = vpop.xlane.xlu2 %464 }
 0x597   :  { %2537 = vrcp.f32 %v465_v31 }
 0x59d   :  { %v2538_v33 = vpop.eup %2537 }
 0x59e   :  { %v467_v35 = vmul.f32 %v2538_v33, %v2534_v24  ;;  %v374_v37 = vpop.permute.xlu2 %373 }
 0x59f   :  { %394 = vmatpush.msra.mxu2 %v374_v37 }
 0x5a0   :  { %2397 = vmatmul.msk.f32.vlgmr.msra.gmra.mxu2 %vm148_vm5, %v372_v34  ;;  %2401 = vmatmul.msk.f32.vlgmr.msrb.gmra.mxu0 %vm148_vm5, %v467_v35  ;;  %v74_v34 = vld [vmem:[#allocation5 + $0x70] sm:$0xff] }
 0x5a1   :  { %516 = vmatpush.msrb.mxu2 %v496_v38  ;;  %636 = vmatpush.msra.mxu3 %v74_v34  ;;  %v73_v38 = vld [vmem:[#allocation5 + $0x60] sm:$0xff]  ;;  %v2496_v34 = vld [vmem:[#allocation7 + $0x9] ss:$0 sm:$0xff] }
 0x5a3   :  { %637 = vmatpush.msra.mxu3 %v73_v38  ;;  %v2497_v38 = vld [vmem:[#allocation7 + $0xa] ss:$0 sm:$0xff] }
 0x5a6   :  { %v275_v36 = vpop.f32.mrf.mxu2  ;;  %v402_v39 = vpop.permute.xlu2 %401 }
 0x5a7   :  { %2393 = vmatmul.msk.f32.vlgmr.msrb.gmra.mxu1 %vm148_vm5, %v275_v36 }
 0x5a8   :  { %422 = vmatpush.msra.mxu1 %v402_v39  ;;  %v72_v39 = vld [vmem:[#allocation5 + $0x50] sm:$0xff] }
 0x5a9   :  { %638 = vmatpush.msra.mxu3 %v72_v39 }
 0x5aa   :  { %567 = vmatpush.msrb.mxu1 %v70_v57 }
 0x5ac   :  { %568 = vmatpush.msrb.mxu1 %v69_v58 }
 0x5ae   :  { %569 = vmatpush.msrb.mxu1 %v68_v59 }
 0x5b0   :  { %570 = vmatpush.msrb.mxu1 %v67_v60 }
 0x61d   :  { %v491_v40 = vpop.f32.mrf.mxu0 }
 0x61e   :  { %2402 = vmatmul.msk.f32.vlgmr.msrb.gmra.mxu2 %vm148_vm5, %v491_v40 }
 0x623   :  { %v396_v41 = vpop.f32.mrf.mxu2 }
 0x624   :  { %2398 = vmatmul.msk.f32.vlgmr.msra.gmra.mxu1 %vm148_vm5, %v396_v41  ;;  %v303_v42 = vpop.f32.mrf.mxu1  ;;  %v71_v41 = vld [vmem:[#allocation5 + $0x40] sm:$0xff] }
 0x625   :  { %v331_v43 = vadd.f32 %v2826_v3, %v303_v42  ;;  %639 = vmatpush.msra.mxu3 %v71_v41 }
 0x6a1   :  { %v424_v44 = vpop.f32.mrf.mxu1  ;;  %v518_v47 = vpop.f32.mrf.mxu2 }
 0x6a2   :  { %v427_v45 = vadd.f32 %v424_v44, %v331_v43 }
 0x6a4   :  { %v521_v48 = vadd.f32 %v518_v47, %v427_v45 }
 0x6a6   :  { %v523_v49 = vadd.f32 %v2490_v46, %v521_v48 }
 0x6a8   :  { %v524_v50 = vadd.f32 %v523_v49, %v2768_v0 }
 0x6aa   :  { %v525_v51 = vsel %vm87_vm0, %v524_v50, 0.0 }
 0x6ab   :  { %526 = vadd.xlane.f32.xlu0 %v525_v51 }
 0x71e   :  { %v527_v52 = vpop.xlane.xlu0 %526 }
 0x71f   :  { %v528_v53 = vmul.f32 %v527_v52, %v2772_v8 }
 0x721   :  { %v529_v54 = vsub.f32 %v524_v50, %v528_v53 }
 0x723   :  { %v530_v55 = vmul.f32 %v529_v54, %v529_v54 }
 0x725   :  { %v531_v56 = vsel %vm87_vm0, %v530_v55, 0.0 }
 0x726   :  { %532 = vadd.xlane.f32.xlu1 %v531_v56 }
 0x799   :  { %v533_v0 = vpop.xlane.xlu1 %532 }
 0x79a   :  { %v534_v61 = vmul.f32 %v533_v0, %v2772_v8 }
 0x79c   :  { %v535_v62 = vadd.f32 1e-05, %v534_v61 }
 0x79e   :  { %2539 = vrsqrt.f32 %v535_v62  ;;  %vm542_vm7 = vweird.f32 %v535_v62 }
 0x7a4   :  { %v2540_v63 = vpop.eup %2539 }
 0x7a5   :  { %v537_v1 = vmul.f32 %v2540_v63, %v535_v62  ;;  %vm543_vm6 = vweird.f32 %v2540_v63 }
 0x7a6   :  { %vm544_vm8 = vmor %vm542_vm7, %vm543_vm6 }
 0x7a7   :  { %v538_v2 = vmul.f32 %v2540_v63, %v537_v1 }
 0x7a9   :  { %v539_v3 = vmul.f32 0.5, %v538_v2 }
 0x7ab   :  { %v540_v4 = vsub.f32 1.5, %v539_v3  ;;  %v2494_v3 = vld [vmem:[#allocation7 + $0x7] ss:$0 sm:$0xff] }
 0x7ad   :  { %v541_v5 = vmul.f32 %v2540_v63, %v540_v4 }
 0x7af   :  { %v545_v7 = vsel %vm544_vm8, %v2540_v63, %v541_v5 }
 0x7b0   :  { %v546_v9 = vmul.f32 %v545_v7, %v529_v54 }
 0x7b2   :  { %v548_v11 = vmul.f32 %v2491_v6, %v546_v9 }
 0x7b4   :  { %v2856_v12 = vadd.f32 %v2492_v10, %v548_v11 }
 0x7b6   :  { %2403 = vmatmul.msk.f32.vlgmr.msrb.gmra.mxu1 %vm87_vm0, %v2856_v12 }
 0x833   :  { %v572_v18 = vpop.f32.mrf.mxu1 }
 0x834   :  { %v573_v19 = vadd.f32 %v2493_v13, %v572_v18 }
 0x836   :  { %v576_v20 = vmul.f32 0.70710677, %v573_v19  ;;  %v575_v63 = vmul.f32 0.5, %v573_v19  ;;  %v2869_v19 = vld [vmem:[#allocation5 + $0xf0] sm:$0xff] }
 0x837   :  { %713 = vmatpush.msra.mxu0 %v2869_v19 }
 0x838   :  { %v577_v21 = vmul.f32 %v576_v20, %v576_v20 }
 0x83a   :  { %v578_v22 = vmin.f32 %v577_v21, 16.0  ;;  %v646_v21 = vld [vmem:[#allocation5 + $0xc0] sm:$0xff] }
 0x83c   :  { %v579_v24 = vmul.f32 2.1237322e-06, %v578_v22  ;;  %v590_v25 = vmul.f32 3.8918573e-05, %v578_v22 }
 0x83e   :  { %v580_v27 = vadd.f32 0.00028619796, %v579_v24  ;;  %v591_v28 = vadd.f32 0.001143296, %v590_v25 }
 0x840   :  { %v581_v30 = vmul.f32 %v580_v27, %v578_v22  ;;  %v592_v31 = vmul.f32 %v591_v28, %v578_v22 }
 0x842   :  { %v593_v33 = vadd.f32 0.014752088, %v592_v31  ;;  %v582_v35 = vadd.f32 0.0036580483, %v581_v30  ;;  %v2495_v31 = vld [vmem:[#allocation7 + $0x8] ss:$0 sm:$0xff] }
 0x844   :  { %v594_v37 = vmul.f32 %v593_v33, %v578_v22  ;;  %v583_v40 = vmul.f32 %v582_v35, %v578_v22 }
 0x846   :  { %v595_v36 = vadd.f32 0.112945676, %v594_v37  ;;  %v584_v44 = vadd.f32 0.05243302, %v583_v40 }
 0x848   :  { %v596_v42 = vmul.f32 %v595_v36, %v578_v22  ;;  %v585_v47 = vmul.f32 %v584_v44, %v578_v22 }
 0x84a   :  { %v597_v43 = vadd.f32 0.4994258, %v596_v42  ;;  %v586_v48 = vadd.f32 0.18741608, %v585_v47 }
 0x84c   :  { %v598_v45 = vmul.f32 %v597_v43, %v578_v22  ;;  %v587_v50 = vmul.f32 %v586_v48, %v578_v22 }
 0x84e   :  { %v599_v46 = vadd.f32 1.0, %v598_v45  ;;  %v588_v54 = vadd.f32 1.1283791, %v587_v50 }
 0x850   :  { %2541 = vrcp.f32 %v599_v46  ;;  %v611_v53 = vand.u32 2147483648, %v599_v46  ;;  %v609_v56 = vand.u32 2147483647, %v599_v46  ;;  %vm605_vm10 = vweird.f32 %v599_v46 }
 0x851   :  { %v589_v59 = vmul.f32 %v588_v54, %v576_v20  ;;  %v2872_v20 = vld [vmem:[#allocation5 + $0xe0] sm:$0xff] }
 0x852   :  { %v612_v58 = vor.u32 1.1754944e-38, %v611_v53  ;;  %vm610_vm12 = vcmp.eq.f32.partialorder %v609_v56, 8.507059e+37  ;;  %714 = vmatpush.msra.mxu0 %v2872_v20 }
 0x856   :  { %v2542_v49 = vpop.eup %2541 }
 0x857   :  { %v601_v51 = vmul.f32 %v2542_v49, %v599_v46  ;;  %vm606_vm9 = vweird.f32 %v2542_v49 }
 0x858   :  { %vm607_vm11 = vmor %vm605_vm10, %vm606_vm9 }
 0x859   :  { %v602_v52 = vsub.f32 1.0, %v601_v51 }
 0x85b   :  { %v603_v55 = vmul.f32 %v2542_v49, %v602_v52 }
 0x85d   :  { %v604_v57 = vadd.f32 %v2542_v49, %v603_v55 }
 0x85f   :  { %v608_v60 = vsel %vm607_vm11, %v2542_v49, %v604_v57 }
 0x860   :  { %v613_v0 = vsel %vm610_vm12, %v612_v58, %v608_v60 }
 0x861   :  { %v614_v61 = vmul.f32 %v613_v0, %v589_v59 }
 0x863   :  { %v2404_v62 = vclamps-f32 %v614_v61, 1.0 }
 0x865   :  { %v617_v1 = vadd.f32 1.0, %v2404_v62 }
 0x867   :  { %v618_v2 = vmul.f32 %v617_v1, %v575_v63  ;;  %v2913_v63 = vld [vmem:[#allocation2 + $0x8] sm:$0xff] }
 0x868   :  { %v1245_v1 = vsel %vm87_vm0, %v2913_v63, 0.0 }
 0x869   :  { %2405 = vmatmul.msk.f32.vlgmr.msra.gmra.mxu3 %vm620_vm13, %v618_v2 }
 0x8ec   :  { %v641_v4 = vpop.f32.mrf.mxu3 }
 0x8ed   :  { %v642_v5 = vadd.f32 %v2494_v3, %v641_v4 }
 0x8ef   :  { %v2862_v6 = vadd.f32 %v642_v5, %v2856_v12  ;;  %v2875_v12 = vld [vmem:[#allocation5 + $0xd0] sm:$0xff] }
 0x8f0   :  { %715 = vmatpush.msra.mxu0 %v2875_v12 }
 0x8f1   :  { %v671_v7 = vsel %vm87_vm0, %v2862_v6, 0.0 }
 0x8f2   :  { %672 = vadd.xlane.f32.xlu2 %v671_v7  ;;  %716 = vmatpush.msra.mxu0 %v646_v21 }
 0x965   :  { %v673_v9 = vpop.xlane.xlu2 %672 }
 0x966   :  { %v674_v10 = vmul.f32 %v673_v9, %v2772_v8 }
 0x968   :  { %v675_v11 = vsub.f32 %v2862_v6, %v674_v10 }
 0x96a   :  { %v676_v13 = vmul.f32 %v675_v11, %v675_v11 }
 0x96c   :  { %v677_v18 = vsel %vm87_vm0, %v676_v13, 0.0 }
 0x96d   :  { %678 = vadd.xlane.f32.xlu0 %v677_v18 }
 0x9e0   :  { %v679_v22 = vpop.xlane.xlu0 %678 }
 0x9e1   :  { %v680_v23 = vmul.f32 %v679_v22, %v2772_v8 }
 0x9e3   :  { %v681_v24 = vadd.f32 1e-05, %v680_v23 }
 0x9e5   :  { %2543 = vrsqrt.f32 %v681_v24  ;;  %vm688_vm15 = vweird.f32 %v681_v24 }
 0x9eb   :  { %v2544_v25 = vpop.eup %2543 }
 0x9ec   :  { %v683_v26 = vmul.f32 %v2544_v25, %v681_v24  ;;  %vm689_vm14 = vweird.f32 %v2544_v25 }
 0x9ed   :  { %vm690_vm1 = vmor %vm688_vm15, %vm689_vm14 }
 0x9ee   :  { %v684_v27 = vmul.f32 %v2544_v25, %v683_v26 }
 0x9f0   :  { %v685_v28 = vmul.f32 0.5, %v684_v27 }
 0x9f2   :  { %v686_v29 = vsub.f32 1.5, %v685_v28 }
 0x9f4   :  { %v687_v30 = vmul.f32 %v2544_v25, %v686_v29 }
 0x9f6   :  { %v691_v32 = vsel %vm690_vm1, %v2544_v25, %v687_v30 }
 0x9f7   :  { %v692_v33 = vmul.f32 %v691_v32, %v675_v11 }
 0x9f9   :  { %v694_v35 = vmul.f32 %v2495_v31, %v692_v33 }
 0x9fb   :  { %v696_v37 = vadd.f32 %v2496_v34, %v694_v35 }
 0x9fd   :  { %2406 = vmatmul.msk.f32.vlgmr.msra.gmra.mxu0 %vm87_vm0, %v696_v37 }
 0xa7a   :  { %v718_v36 = vpop.f32.mrf.mxu0 }
 0xa7b   :  { %v2880_v39 = vadd.f32 %v2497_v38, %v718_v36 }
 0xa7d   :  { %722 = vrot.lane.b32.xlu1 %v2880_v39, %s2722_s30 }
 0xa85   :  { %789 = vrot.lane.b32.xlu1 %v2880_v39, %s2726_s7 }
 0xa8d   :  { %1005 = vrot.lane.b32.xlu1 %v2880_v39, %s2727_s8 }
 0xa95   :  { %908 = vrot.lane.b32.xlu1 %v2880_v39, %s2724_s5 }
 0xaef   :  { %v723_v40 = vpop.permute.xlu1 %722 }
 0xaf0   :  { %2407 = vmatpush.xpose.msk.msra.mxu2 %vm148_vm5, %v723_v40 }
 0xaf3   :  { %2408 = vmatmul.msk.f32.vlgmr.msra.gmra.mxu2 %vm148_vm5, %v2880_v39 }
 0xaf7   :  { %v790_v41 = vpop.permute.xlu1 %789 }
 0xaf8   :  { %2410 = vmatpush.xpose.msk.msrb.mxu0 %vm148_vm5, %v790_v41 }
 0xaff   :  { %v1006_v55 = vpop.permute.xlu1 %1005 }
 0xb07   :  { %v909_v58 = vpop.permute.xlu1 %908 }
 0xb76   :  { %v745_v42 = vpop.f32.mrf.mxu2 }
 0xb77   :  { %v748_v43 = vmul.f32 0.35355338, %v745_v42 }
 0xb79   :  { %v749_v44 = vsel %vm148_vm5, %v748_v43, -inf }
 0xb7a   :  { %750 = vmax.xlane.f32.xlu2 %v749_v44 }
 0xb92   :  { %760 = vrot.lane.b32.xlu2 %v2880_v39, %s2725_s6 }
 0xb9a   :  { %1003 = vrot.lane.b32.xlu2 %v2880_v39, %s2723_s4 }
 0xbed   :  { %v751_v45 = vpop.xlane.xlu2 %750 }
 0xbee   :  { %v752_v46 = vsub.f32 %v748_v43, %v751_v45 }
 0xbf0   :  { %v753_v47 = vmul.f32 1.442695, %v752_v46 }
 0xbf2   :  { %2545 = vpow2.f32 %v753_v47 }
 0xbf5   :  { %v761_v48 = vpop.permute.xlu2 %760 }
 0xbf6   :  { %781 = vmatpush.msra.mxu1 %v761_v48 }
 0xbf8   :  { %v2546_v49 = vpop.eup %2545 }
 0xbf9   :  { %v755_v50 = vsel %vm148_vm5, %v2546_v49, 0.0 }
 0xbfa   :  { %756 = vadd.xlane.f32.xlu0 %v755_v50 }
 0xbfd   :  { %v1004_v60 = vpop.permute.xlu2 %1003 }
 0xc0e   :  { %882 = vrot.lane.b32.xlu0 %v646_v21, %s2720_s2 }
 0xc16   :  { %787 = vrot.lane.b32.xlu0 %v2880_v39, %s2721_s29 }
 0xc1e   :  { %910 = vrot.lane.b32.xlu0 %v2880_v39, %s2728_s9 }
 0xc6d   :  { %v757_v51 = vpop.xlane.xlu0 %756 }
 0xc6e   :  { %2547 = vrcp.f32 %v757_v51 }
 0xc74   :  { %v2548_v52 = vpop.eup %2547 }
 0xc75   :  { %v759_v53 = vmul.f32 %v2548_v52, %v2546_v49 }
 0xc77   :  { %2409 = vmatmul.msk.f32.vlgmr.msra.gmra.mxu1 %vm148_vm5, %v759_v53 }
 0xc80   :  { %v883_v54 = vpop.permute.xlu0 %882 }
 0xc81   :  { %903 = vmatpush.msrb.mxu3 %v883_v54 }
 0xc83   :  { %2419 = vmatpush.xpose.msk.msra.mxu3 %vm148_vm5, %v1006_v55 }
 0xc88   :  { %v788_v56 = vpop.permute.xlu0 %787 }
 0xc89   :  { %2411 = vmatmul.msk.f32.vlgmr.msrb.gmra.mxu0 %vm148_vm5, %v788_v56 }
 0xc90   :  { %v911_v57 = vpop.permute.xlu0 %910 }
 0xc91   :  { %2415 = vmatpush.xpose.msk.msra.mxu0 %vm148_vm5, %v911_v57  ;;  %v2498_v57 = vld [vmem:[#allocation7] ss:$0 sm:$0xff] }
 0xc94   :  { %2416 = vmatmul.msk.f32.vlgmr.msra.gmra.mxu0 %vm148_vm5, %v909_v58 }
 0xcf4   :  { %v783_v59 = vpop.f32.mrf.mxu1 }
 0xcf5   :  { %2414 = vmatmul.msk.f32.vlgmr.msrb.gmra.mxu3 %vm148_vm5, %v783_v59 }
 0xcfd   :  { %2420 = vmatmul.msk.f32.vlgmr.msra.gmra.mxu3 %vm148_vm5, %v1004_v60 }
 0xd06   :  { %v812_v0 = vpop.f32.mrf.mxu0 }
 0xd07   :  { %v815_v61 = vmul.f32 0.35355338, %v812_v0 }
 0xd09   :  { %v816_v62 = vsel %vm148_vm5, %v815_v61, -inf }
 0xd0a   :  { %817 = vmax.xlane.f32.xlu2 %v816_v62  ;;  %v2499_v62 = vld [vmem:[#allocation7 + $0x1] ss:$0 sm:$0xff] }
 0xd11   :  { %v933_v2 = vpop.f32.mrf.mxu0 }
 0xd12   :  { %v936_v3 = vmul.f32 0.35355338, %v933_v2  ;;  %1246 = vadd.xlane.f32.xlu2 %v1245_v1 }
 0xd14   :  { %v937_v4 = vsel %vm148_vm5, %v936_v3, -inf }
 0xd15   :  { %938 = vmax.xlane.f32.xlu0 %v937_v4 }
 0xd2a   :  { %827 = vrot.lane.b32.xlu2 %v2880_v39, %s2729_s10 }
 0xd78   :  { %v2920_v5 = vpop.f32.mrf.mxu3 }
 0xd7d   :  { %v818_v7 = vpop.xlane.xlu2 %817 }
 0xd7e   :  { %v819_v9 = vsub.f32 %v815_v61, %v818_v7 }
 0xd80   :  { %v820_v10 = vmul.f32 1.442695, %v819_v9  ;;  %v1028_v11 = vpop.f32.mrf.mxu3 }
 0xd81   :  { %v1031_v13 = vmul.f32 0.35355338, %v1028_v11 }
 0xd82   :  { %2549 = vpow2.f32 %v820_v10 }
 0xd83   :  { %v1032_v18 = vsel %vm148_vm5, %v1031_v13, -inf }
 0xd84   :  { %1033 = vmax.xlane.f32.xlu1 %v1032_v18  ;;  %v2501_v18 = vld [vmem:[#allocation7 + $0xb] ss:$0 sm:$0xff] }
 0xd85   :  { %v1247_v21 = vpop.xlane.xlu2 %1246 }
 0xd86   :  { %v1248_v22 = vmul.f32 %v1247_v21, %v2772_v8 }
 0xd88   :  { %v2550_v23 = vpop.eup %2549  ;;  %v1249_v24 = vsub.f32 %v2913_v63, %v1248_v22  ;;  %v939_v25 = vpop.xlane.xlu0 %938 }
 0xd89   :  { %v940_v26 = vsub.f32 %v936_v3, %v939_v25  ;;  %v822_v27 = vsel %vm148_vm5, %v2550_v23, 0.0 }
 0xd8a   :  { %823 = vadd.xlane.f32.xlu0 %v822_v27  ;;  %v1250_v28 = vmul.f32 %v1249_v24, %v1249_v24 }
 0xd8b   :  { %v941_v29 = vmul.f32 1.442695, %v940_v26 }
 0xd8c   :  { %v1251_v30 = vsel %vm87_vm0, %v1250_v28, 0.0 }
 0xd8d   :  { %2551 = vpow2.f32 %v941_v29  ;;  %1252 = vadd.xlane.f32.xlu2 %v1251_v30  ;;  %v828_v31 = vpop.permute.xlu2 %827 }
 0xd8e   :  { %848 = vmatpush.msrb.mxu2 %v828_v31 }
 0xd93   :  { %v2552_v32 = vpop.eup %2551 }
 0xd94   :  { %v943_v33 = vsel %vm148_vm5, %v2552_v32, 0.0 }
 0xd95   :  { %944 = vadd.xlane.f32.xlu1 %v943_v33  ;;  %v2980_v33 = vld [vmem:[#allocation5 + $0xd8] sm:$0xff] }
 0xdae   :  { %948 = vrot.lane.b32.xlu1 %v2880_v39, %s2731_s12 }
 0xdb6   :  { %855 = vrot.lane.b32.xlu1 %v2875_v12, %s2720_s2 }
 0xdbe   :  { %976 = vrot.lane.b32.xlu1 %v2872_v20, %s2720_s2 }
 0xdf7   :  { %v1034_v34 = vpop.xlane.xlu1 %1033 }
 0xdf8   :  { %v1035_v35 = vsub.f32 %v1031_v13, %v1034_v34  ;;  %v2983_v34 = vld [vmem:[#allocation5 + $0xc8] sm:$0xff] }
 0xdfa   :  { %v1036_v37 = vmul.f32 1.442695, %v1035_v35 }
 0xdfc   :  { %2553 = vpow2.f32 %v1036_v37 }
 0xdfd   :  { %v824_v38 = vpop.xlane.xlu0 %823 }
 0xdfe   :  { %2555 = vrcp.f32 %v824_v38 }
 0xe00   :  { %v1253_v45 = vpop.xlane.xlu2 %1252 }
 0xe01   :  { %v1254_v47 = vmul.f32 %v1253_v45, %v2772_v8 }
 0xe02   :  { %v2554_v36 = vpop.eup %2553 }
 0xe03   :  { %v1038_v40 = vsel %vm148_vm5, %v2554_v36, 0.0  ;;  %v1255_v48 = vadd.f32 1e-05, %v1254_v47 }
 0xe04   :  { %v2556_v41 = vpop.eup %2555  ;;  %1039 = vadd.xlane.f32.xlu0 %v1038_v40 }
 0xe05   :  { %v826_v42 = vmul.f32 %v2556_v41, %v2550_v23  ;;  %vm1262_vm2 = vweird.f32 %v1255_v48 }
 0xe07   :  { %2412 = vmatmul.msk.f32.vlgmr.msrb.gmra.mxu2 %vm148_vm5, %v826_v42 }
 0xe08   :  { %v945_v43 = vpop.xlane.xlu1 %944 }
 0xe09   :  { %2557 = vrcp.f32 %v945_v43 }
 0xe0a   :  { %2559 = vrsqrt.f32 %v1255_v48 }
 0xe0f   :  { %v2558_v20 = vpop.eup %2557 }
 0xe10   :  { %v947_v12 = vmul.f32 %v2558_v20, %v2552_v32  ;;  %v2560_v49 = vpop.eup %2559  ;;  %v2977_v32 = vld [vmem:[#allocation5 + $0xe8] sm:$0xff] }
 0xe11   :  { %v1257_v50 = vmul.f32 %v2560_v49, %v1255_v48  ;;  %vm1263_vm3 = vweird.f32 %v2560_v49 }
 0xe12   :  { %vm1264_vm4 = vmor %vm1262_vm2, %vm1263_vm3 }
 0xe18   :  { %1043 = vrot.lane.b32.xlu0 %v2880_v39, %s2730_s11  ;;  %v1258_v39 = vmul.f32 %v2560_v49, %v1257_v50 }
 0xe1a   :  { %v1259_v52 = vmul.f32 0.5, %v1258_v39 }
 0xe1c   :  { %v1260_v54 = vsub.f32 1.5, %v1259_v52 }
 0xe20   :  { %v949_v44 = vpop.permute.xlu1 %948  ;;  %1070 = vrot.lane.b32.xlu0 %v2869_v19, %s2720_s2  ;;  %v1261_v19 = vmul.f32 %v2560_v49, %v1260_v54 }
 0xe21   :  { %969 = vmatpush.msra.mxu2 %v949_v44 }
 0xe22   :  { %2417 = vmatmul.msk.f32.vlgmr.msra.gmra.mxu2 %vm148_vm5, %v947_v12  ;;  %v1265_v56 = vsel %vm1264_vm4, %v2560_v49, %v1261_v19 }
 0xe23   :  { %v1266_v58 = vmul.f32 %v1265_v56, %v1249_v24 }
 0xe25   :  { %v1268_v61 = vmul.f32 %v2498_v57, %v1266_v58 }
 0xe27   :  { %v1270_v1 = vadd.f32 %v2499_v62, %v1268_v61 }
 0xe28   :  { %v856_v46 = vpop.permute.xlu1 %855 }
 0xe29   :  { %876 = vmatpush.msrb.mxu1 %v856_v46 }
 0xe30   :  { %v977_v51 = vpop.permute.xlu1 %976 }
 0xe31   :  { %997 = vmatpush.msra.mxu1 %v977_v51  ;;  %v2502_v51 = vld [vmem:[#allocation7 + $0xc] ss:$0 sm:$0xff] }
 0xe77   :  { %v1040_v53 = vpop.xlane.xlu0 %1039 }
 0xe78   :  { %2561 = vrcp.f32 %v1040_v53  ;;  %v2503_v53 = vld [vmem:[#allocation7 + $0xd] ss:$0 sm:$0xff] }
 0xe7e   :  { %v2562_v55 = vpop.eup %2561 }
 0xe7f   :  { %v1042_v59 = vmul.f32 %v2562_v55, %v2554_v36 }
 0xe8a   :  { %v850_v60 = vpop.f32.mrf.mxu2  ;;  %v1044_v0 = vpop.permute.xlu0 %1043 }
 0xe8b   :  { %2413 = vmatmul.msk.f32.vlgmr.msrb.gmra.mxu1 %vm148_vm5, %v850_v60  ;;  %1064 = vmatpush.msrb.mxu0 %v1044_v0  ;;  %v2504_v0 = vld [vmem:[#allocation7 + $0xe] ss:$0 sm:$0xff] }
 0xe8c   :  { %2421 = vmatmul.msk.f32.vlgmr.msrb.gmra.mxu0 %vm148_vm5, %v1042_v59 }
 0xe8d   :  { %1287 = vmatpush.msra.mxu0 %v2777_v14  ;;  %v2500_v14 = vld [vmem:[#allocation7 + $0x2] ss:$0 sm:$0xff] }
 0xe8f   :  { %1288 = vmatpush.msra.mxu0 %v2780_v15 }
 0xe91   :  { %1289 = vmatpush.msra.mxu0 %v2784_v17 }
 0xe92   :  { %v1071_v2 = vpop.permute.xlu0 %1070 }
 0xe93   :  { %1290 = vmatpush.msra.mxu0 %v2782_v16  ;;  %1091 = vmatpush.msrb.mxu2 %v1071_v2 }
 0xe94   :  { %2426 = vmatmul.msk.f32.vlgmr.msra.gmra.mxu0 %vm87_vm0, %v1270_v1 }
 0xea5   :  { %v971_v3 = vpop.f32.mrf.mxu2 }
 0xea6   :  { %2418 = vmatmul.msk.f32.vlgmr.msra.gmra.mxu1 %vm148_vm5, %v971_v3 }
 0xf08   :  { %v878_v15 = vpop.f32.mrf.mxu1 }
 0xf09   :  { %v1066_v4 = vpop.f32.mrf.mxu0  ;;  %v906_v11 = vadd.f32 %v2920_v5, %v878_v15 }
 0xf0a   :  { %2422 = vmatmul.msk.f32.vlgmr.msrb.gmra.mxu2 %vm148_vm5, %v1066_v4  ;;  %v3007_v4 = vld [vmem:[#allocation5 + $0x170] sm:$0xff] }
 0xf0b   :  { %1206 = vmatpush.msrb.mxu3 %v3007_v4 }
 0xf11   :  { %v1292_v7 = vpop.f32.mrf.mxu0 }
 0xf12   :  { %v2951_v9 = vadd.f32 %v2500_v14, %v1292_v7  ;;  %v3010_v7 = vld [vmem:[#allocation5 + $0x160] sm:$0xff] }
 0xf13   :  { %1207 = vmatpush.msrb.mxu3 %v3010_v7 }
 0xf14   :  { %1296 = vrot.lane.b32.xlu0 %v2951_v9, %s2722_s30 }
 0xf23   :  { %v999_v10 = vpop.f32.mrf.mxu1 }
 0xf24   :  { %v1002_v13 = vadd.f32 %v999_v10, %v906_v11  ;;  %v3013_v10 = vld [vmem:[#allocation5 + $0x150] sm:$0xff] }
 0xf25   :  { %1208 = vmatpush.msrb.mxu3 %v3013_v10 }
 0xf86   :  { %v1297_v17 = vpop.permute.xlu0 %1296 }
 0xf87   :  { %2427 = vmatpush.xpose.msk.msra.mxu2 %vm148_vm5, %v1297_v17 }
 0xf8a   :  { %2428 = vmatmul.msk.f32.vlgmr.msra.gmra.mxu2 %vm148_vm5, %v2951_v9 }
 0xf8d   :  { %v1093_v21 = vpop.f32.mrf.mxu2 }
 0xf8e   :  { %v1096_v22 = vadd.f32 %v1093_v21, %v1002_v13 }
 0xf90   :  { %v1098_v23 = vadd.f32 %v2501_v18, %v1096_v22  ;;  %v3016_v18 = vld [vmem:[#allocation5 + $0x140] sm:$0xff] }
 0xf91   :  { %1209 = vmatpush.msrb.mxu3 %v3016_v18 }
 0xf92   :  { %v1099_v24 = vadd.f32 %v1098_v23, %v2862_v6  ;;  %v3019_v23 = vld [vmem:[#allocation5 + $0x130] sm:$0xff] }
 0xf93   :  { %1210 = vmatpush.msrb.mxu3 %v3019_v23 }
 0xf94   :  { %v1100_v25 = vsel %vm87_vm0, %v1099_v24, 0.0 }
 0xf95   :  { %1101 = vadd.xlane.f32.xlu1 %v1100_v25 }
 0xfae   :  { %1456 = vrot.lane.b32.xlu1 %v2782_v16, %s2720_s2  ;;  %v2974_v16 = vld [vmem:[#allocation5 + $0xf8] sm:$0xff] }
 0xfaf   :  { %1142 = vmatpush.msrb.mxu1 %v2974_v16 }
 0xfb1   :  { %1143 = vmatpush.msrb.mxu1 %v2977_v32 }
 0xfb3   :  { %1144 = vmatpush.msrb.mxu1 %v2980_v33 }
 0xfb5   :  { %1145 = vmatpush.msrb.mxu1 %v2983_v34 }
 0xfb6   :  { %1484 = vrot.lane.b32.xlu1 %v2951_v9, %s2728_s9 }
0x1008   :  { %v1102_v5 = vpop.xlane.xlu1 %1101 }
0x1009   :  { %v1103_v26 = vmul.f32 %v1102_v5, %v2772_v8  ;;  %v3022_v5 = vld [vmem:[#allocation5 + $0x120] sm:$0xff] }
0x100a   :  { %1211 = vmatpush.msrb.mxu3 %v3022_v5 }
0x100b   :  { %v1104_v27 = vsub.f32 %v1099_v24, %v1103_v26 }
0x100d   :  { %v1319_v28 = vpop.f32.mrf.mxu2  ;;  %v1105_v29 = vmul.f32 %v1104_v27, %v1104_v27 }
0x100e   :  { %v1322_v30 = vmul.f32 0.35355338, %v1319_v28 }
0x100f   :  { %v1106_v31 = vsel %vm87_vm0, %v1105_v29, 0.0 }
0x1010   :  { %1107 = vadd.xlane.f32.xlu0 %v1106_v31  ;;  %v1323_v6 = vsel %vm148_vm5, %v1322_v30, -inf }
0x1011   :  { %1324 = vmax.xlane.f32.xlu2 %v1323_v6 }
0x1020   :  { %v2987_v42 = vpop.permute.xlu1 %1456 }
0x1024   :  { %1363 = vrot.lane.b32.xlu0 %v2951_v9, %s2726_s7 }
0x1028   :  { %v1485_v49 = vpop.permute.xlu1 %1484 }
0x102c   :  { %1579 = vrot.lane.b32.xlu0 %v2951_v9, %s2727_s8 }
0x1034   :  { %1482 = vrot.lane.b32.xlu0 %v2951_v9, %s2724_s5 }
0x1083   :  { %v1108_v35 = vpop.xlane.xlu0 %1107 }
0x1084   :  { %v1109_v37 = vmul.f32 %v1108_v35, %v2772_v8  ;;  %v1325_v38 = vpop.xlane.xlu2 %1324 }
0x1085   :  { %v1326_v36 = vsub.f32 %v1322_v30, %v1325_v38  ;;  %v3028_v30 = vld [vmem:[#allocation5 + $0x100] sm:$0xff] }
0x1086   :  { %v1110_v40 = vadd.f32 1e-05, %v1109_v37 }
0x1087   :  { %v1327_v41 = vmul.f32 1.442695, %v1326_v36 }
0x1088   :  { %2563 = vrsqrt.f32 %v1110_v40  ;;  %vm1117_vm7 = vweird.f32 %v1110_v40 }
0x1089   :  { %2565 = vpow2.f32 %v1327_v41 }
0x108e   :  { %v2564_v43 = vpop.eup %2563 }
0x108f   :  { %v2566_v20 = vpop.eup %2565  ;;  %v1112_v12 = vmul.f32 %v2564_v43, %v1110_v40  ;;  %vm1118_vm6 = vweird.f32 %v2564_v43 }
0x1090   :  { %v1329_v44 = vsel %vm148_vm5, %v2566_v20, 0.0  ;;  %vm1119_vm8 = vmor %vm1117_vm7, %vm1118_vm6 }
0x1091   :  { %v1113_v45 = vmul.f32 %v2564_v43, %v1112_v12  ;;  %1330 = vadd.xlane.f32.xlu2 %v1329_v44 }
0x1093   :  { %v1114_v46 = vmul.f32 0.5, %v1113_v45 }
0x1095   :  { %v1115_v47 = vsub.f32 1.5, %v1114_v46 }
0x1096   :  { %v1364_v48 = vpop.permute.xlu0 %1363 }
0x1097   :  { %v1116_v50 = vmul.f32 %v2564_v43, %v1115_v47  ;;  %2430 = vmatpush.xpose.msk.msrb.mxu0 %vm148_vm5, %v1364_v48 }
0x1099   :  { %v1120_v39 = vsel %vm1119_vm8, %v2564_v43, %v1116_v50 }
0x109a   :  { %v1121_v52 = vmul.f32 %v1120_v39, %v1104_v27  ;;  %v3025_v27 = vld [vmem:[#allocation5 + $0x110] sm:$0xff] }
0x109b   :  { %2435 = vmatpush.xpose.msk.msra.mxu0 %vm148_vm5, %v1485_v49  ;;  %1212 = vmatpush.msrb.mxu3 %v3025_v27 }
0x109c   :  { %v1123_v54 = vmul.f32 %v2502_v51, %v1121_v52 }
0x109d   :  { %1213 = vmatpush.msrb.mxu3 %v3028_v30 }
0x109e   :  { %v2992_v19 = vadd.f32 %v2503_v53, %v1123_v54  ;;  %v3003_v59 = vpop.permute.xlu0 %1579 }
0x109f   :  { %1477 = vmatpush.msra.mxu3 %v2987_v42 }
0x10a0   :  { %2423 = vmatmul.msk.f32.vlgmr.msrb.gmra.mxu1 %vm87_vm0, %v2992_v19 }
0x10a6   :  { %v1483_v61 = vpop.permute.xlu0 %1482 }
0x10a9   :  { %1334 = vrot.lane.b32.xlu2 %v2951_v9, %s2725_s6 }
0x10b1   :  { %1361 = vrot.lane.b32.xlu2 %v2951_v9, %s2721_s29 }
0x10b9   :  { %1577 = vrot.lane.b32.xlu2 %v2951_v9, %s2723_s4 }
0x1104   :  { %v1331_v55 = vpop.xlane.xlu2 %1330 }
0x1105   :  { %2567 = vrcp.f32 %v1331_v55 }
0x110b   :  { %v2568_v56 = vpop.eup %2567 }
0x110c   :  { %v1333_v57 = vmul.f32 %v2568_v56, %v2566_v20  ;;  %v1335_v58 = vpop.permute.xlu2 %1334 }
0x110d   :  { %1355 = vmatpush.msra.mxu1 %v1335_v58 }
0x110e   :  { %2429 = vmatmul.msk.f32.vlgmr.msra.gmra.mxu1 %vm148_vm5, %v1333_v57 }
0x1114   :  { %v1362_v60 = vpop.permute.xlu2 %1361 }
0x1115   :  { %2431 = vmatmul.msk.f32.vlgmr.msrb.gmra.mxu0 %vm148_vm5, %v1362_v60 }
0x111c   :  { %v1578_v58 = vpop.permute.xlu2 %1577 }
0x111d   :  { %v1147_v62 = vpop.f32.mrf.mxu1  ;;  %2436 = vmatmul.msk.f32.vlgmr.msra.gmra.mxu0 %vm148_vm5, %v1483_v61 }
0x111e   :  { %v1148_v1 = vadd.f32 %v2504_v0, %v1147_v62 }
0x1120   :  { %v1151_v2 = vmul.f32 0.70710677, %v1148_v1  ;;  %v1150_v53 = vmul.f32 0.5, %v1148_v1 }
0x1122   :  { %v1152_v3 = vmul.f32 %v1151_v2, %v1151_v2 }
0x1124   :  { %v1153_v14 = vmin.f32 %v1152_v3, 16.0 }
0x1126   :  { %v1154_v15 = vmul.f32 2.1237322e-06, %v1153_v14  ;;  %v1165_v17 = vmul.f32 3.8918573e-05, %v1153_v14 }
0x1128   :  { %v1155_v11 = vadd.f32 0.00028619796, %v1154_v15  ;;  %v1166_v13 = vadd.f32 0.001143296, %v1165_v17 }
0x112a   :  { %v1156_v21 = vmul.f32 %v1155_v11, %v1153_v14  ;;  %v1167_v22 = vmul.f32 %v1166_v13, %v1153_v14 }
0x112c   :  { %v1168_v24 = vadd.f32 0.014752088, %v1167_v22  ;;  %v1157_v25 = vadd.f32 0.0036580483, %v1156_v21 }
0x112e   :  { %v1169_v26 = vmul.f32 %v1168_v24, %v1153_v14  ;;  %v1158_v29 = vmul.f32 %v1157_v25, %v1153_v14 }
0x1130   :  { %v1170_v28 = vadd.f32 0.112945676, %v1169_v26  ;;  %v1159_v35 = vadd.f32 0.05243302, %v1158_v29 }
0x1132   :  { %v1171_v31 = vmul.f32 %v1170_v28, %v1153_v14  ;;  %v1160_v36 = vmul.f32 %v1159_v35, %v1153_v14 }
0x1134   :  { %v1172_v6 = vadd.f32 0.4994258, %v1171_v31  ;;  %v1161_v40 = vadd.f32 0.18741608, %v1160_v36  ;;  %v1427_v36 = vld [vmem:[#allocation5 + $0x10] sm:$0xff] }
0x1136   :  { %v1173_v37 = vmul.f32 %v1172_v6, %v1153_v14  ;;  %v1162_v43 = vmul.f32 %v1161_v40, %v1153_v14  ;;  %v1548_v40 = vld [vmem:[#allocation5 + $0x20] sm:$0xff] }
0x1138   :  { %v1174_v38 = vadd.f32 1.0, %v1173_v37  ;;  %v1163_v45 = vadd.f32 1.1283791, %v1162_v43 }
0x113a   :  { %2569 = vrcp.f32 %v1174_v38  ;;  %v1186_v44 = vand.u32 2147483648, %v1174_v38  ;;  %v1184_v47 = vand.u32 2147483647, %v1174_v38  ;;  %vm1180_vm10 = vweird.f32 %v1174_v38 }
0x113b   :  { %v1164_v49 = vmul.f32 %v1163_v45, %v1151_v2  ;;  %v2505_v2 = vld [vmem:[#allocation7 + $0xf] ss:$0 sm:$0xff] }
0x113c   :  { %v1187_v42 = vor.u32 1.1754944e-38, %v1186_v44  ;;  %vm1185_vm12 = vcmp.eq.f32.partialorder %v1184_v47, 8.507059e+37 }
0x1140   :  { %v2570_v41 = vpop.eup %2569 }
0x1141   :  { %v1176_v20 = vmul.f32 %v2570_v41, %v1174_v38  ;;  %vm1181_vm9 = vweird.f32 %v2570_v41 }
0x1142   :  { %vm1182_vm11 = vmor %vm1180_vm10, %vm1181_vm9 }
0x1143   :  { %v1177_v12 = vsub.f32 1.0, %v1176_v20 }
0x1145   :  { %v1178_v46 = vmul.f32 %v2570_v41, %v1177_v12 }
0x1147   :  { %v1179_v48 = vadd.f32 %v2570_v41, %v1178_v46 }
0x1149   :  { %v1183_v50 = vsel %vm1182_vm11, %v2570_v41, %v1179_v48 }
0x114a   :  { %v1188_v51 = vsel %vm1185_vm12, %v1187_v42, %v1183_v50 }
0x114b   :  { %v1189_v39 = vmul.f32 %v1188_v51, %v1164_v49  ;;  %v2609_v49 = vld [vmem:[#allocation5 + $0x30] sm:$0xff] }
0x114d   :  { %v2424_v52 = vclamps-f32 %v1189_v39, 1.0 }
0x114f   :  { %v1192_v54 = vadd.f32 1.0, %v2424_v52 }
0x1151   :  { %v1193_v55 = vmul.f32 %v1192_v54, %v1150_v53 }
0x1153   :  { %2425 = vmatmul.msk.f32.vlgmr.msrb.gmra.mxu3 %vm620_vm13, %v1193_v55 }
0x1154   :  { %2439 = vmatpush.xpose.msk.msrb.mxu3 %vm148_vm5, %v3003_v59 }
0x118b   :  { %v1357_v56 = vpop.f32.mrf.mxu1 }
0x118c   :  { %2434 = vmatmul.msk.f32.vlgmr.msra.gmra.mxu3 %vm148_vm5, %v1357_v56 }
0x1192   :  { %v1386_v57 = vpop.f32.mrf.mxu0 }
0x1193   :  { %v1389_v60 = vmul.f32 0.35355338, %v1386_v57 }
0x1194   :  { %2440 = vmatmul.msk.f32.vlgmr.msrb.gmra.mxu3 %vm148_vm5, %v1578_v58 }
0x1195   :  { %v1390_v0 = vsel %vm148_vm5, %v1389_v60, -inf }
0x1196   :  { %1391 = vmax.xlane.f32.xlu2 %v1390_v0 }
0x119a   :  { %v1507_v61 = vpop.f32.mrf.mxu0 }
0x119b   :  { %v1510_v62 = vmul.f32 0.35355338, %v1507_v61 }
0x119d   :  { %v1511_v1 = vsel %vm148_vm5, %v1510_v62, -inf }
0x119e   :  { %1512 = vmax.xlane.f32.xlu1 %v1511_v1 }
0x11d6   :  { %v1215_v3 = vpop.f32.mrf.mxu3 }
0x11d7   :  { %v1216_v14 = vadd.f32 %v2505_v2, %v1215_v3 }
0x11d9   :  { %v1218_v59 = vadd.f32 %v1216_v14, %v2992_v19 }
0x11db   :  { %1219 = vst.msk [vmem:[#allocation8] sm:$0xff] %vm87_vm0, %v1218_v59 }
0x1209   :  { %v1392_v15 = vpop.xlane.xlu2 %1391 }
0x120a   :  { %v1393_v17 = vsub.f32 %v1389_v60, %v1392_v15 }
0x120c   :  { %v1394_v11 = vmul.f32 1.442695, %v1393_v17 }
0x120e   :  { %2571 = vpow2.f32 %v1394_v11 }
0x120f   :  { %v3041_v13 = vpop.f32.mrf.mxu3 }
0x1211   :  { %v1513_v21 = vpop.xlane.xlu1 %1512 }
0x1212   :  { %v1514_v22 = vsub.f32 %v1510_v62, %v1513_v21  ;;  %v2506_v62 = vld [vmem:[#allocation7 + $0x3] ss:$0 sm:$0xff] }
0x1214   :  { %v2572_v24 = vpop.eup %2571  ;;  %v1515_v25 = vmul.f32 1.442695, %v1514_v22 }
0x1215   :  { %v1396_v26 = vsel %vm148_vm5, %v2572_v24, 0.0 }
0x1216   :  { %2573 = vpow2.f32 %v1515_v25  ;;  %1397 = vadd.xlane.f32.xlu2 %v1396_v26  ;;  %v1226_v25 = vld [vmem:[#allocation5 + $0x18] sm:$0xff]  ;;  %v1225_v26 = vld [vmem:[#allocation5 + $0x8] sm:$0xff] }
0x1217   :  { %v1602_v28 = vpop.f32.mrf.mxu3 }
0x1218   :  { %v1605_v29 = vmul.f32 0.35355338, %v1602_v28 }
0x121a   :  { %v1606_v19 = vsel %vm148_vm5, %v1605_v29, -inf }
0x121b   :  { %1607 = vmax.xlane.f32.xlu0 %v1606_v19 }
0x121c   :  { %v2574_v31 = vpop.eup %2573 }
0x121d   :  { %v1517_v6 = vsel %vm148_vm5, %v2574_v31, 0.0 }
0x121e   :  { %1518 = vadd.xlane.f32.xlu1 %v1517_v6 }
0x122e   :  { %1401 = vrot.lane.b32.xlu2 %v2951_v9, %s2729_s10 }
0x1236   :  { %1429 = vrot.lane.b32.xlu2 %v1427_v36, %s2720_s2  ;;  %v2507_v36 = vld [vmem:[#allocation7 + $0x4] ss:$0 sm:$0xff] }
0x1237   :  { %1522 = vrot.lane.b32.xlu1 %v2951_v9, %s2731_s12 }
0x123f   :  { %1550 = vrot.lane.b32.xlu1 %v1548_v40, %s2720_s2 }
0x1289   :  { %v1398_v35 = vpop.xlane.xlu2 %1397 }
0x128a   :  { %2575 = vrcp.f32 %v1398_v35 }
0x128e   :  { %v1608_v37 = vpop.xlane.xlu0 %1607 }
0x128f   :  { %v1609_v38 = vsub.f32 %v1605_v29, %v1608_v37 }
0x1290   :  { %v2576_v41 = vpop.eup %2575 }
0x1291   :  { %v1400_v43 = vmul.f32 %v2576_v41, %v2572_v24  ;;  %v1610_v20 = vmul.f32 1.442695, %v1609_v38  ;;  %v1402_v12 = vpop.permute.xlu2 %1401  ;;  %v1519_v46 = vpop.xlane.xlu1 %1518  ;;  %v1228_v24 = vld [vmem:[#allocation5 + $0x38] sm:$0xff] }
0x1292   :  { %1422 = vmatpush.msrb.mxu2 %v1402_v12 }
0x1293   :  { %2577 = vpow2.f32 %v1610_v20  ;;  %2432 = vmatmul.msk.f32.vlgmr.msrb.gmra.mxu2 %vm148_vm5, %v1400_v43  ;;  %v2508_v43 = vld [vmem:[#allocation7 + $0x5] ss:$0 sm:$0xff] }
0x1294   :  { %2579 = vrcp.f32 %v1519_v46 }
0x1299   :  { %v2578_v44 = vpop.eup %2577  ;;  %v1430_v50 = vpop.permute.xlu2 %1429 }
0x129a   :  { %v1612_v45 = vsel %vm148_vm5, %v2578_v44, 0.0  ;;  %v2580_v47 = vpop.eup %2579  ;;  %1450 = vmatpush.msrb.mxu1 %v1430_v50 }
0x129b   :  { %1613 = vadd.xlane.f32.xlu0 %v1612_v45  ;;  %v1521_v48 = vmul.f32 %v2580_v47, %v2574_v31 }
0x12a9   :  { %v1523_v42 = vpop.permute.xlu1 %1522 }
0x12aa   :  { %1543 = vmatpush.msra.mxu2 %v1523_v42 }
0x12ab   :  { %2437 = vmatmul.msk.f32.vlgmr.msra.gmra.mxu2 %vm148_vm5, %v1521_v48 }
0x12af   :  { %1617 = vrot.lane.b32.xlu0 %v2951_v9, %s2730_s11 }
0x12b1   :  { %v1551_v51 = vpop.permute.xlu1 %1550 }
0x12b2   :  { %1571 = vmatpush.msra.mxu1 %v1551_v51 }
0x12b7   :  { %1644 = vrot.lane.b32.xlu0 %v2609_v49, %s2720_s2  ;;  %v1236_v49 = vld [vmem:[#allocation5 + $0xb0] sm:$0xff] }
0x12b8   :  { %1780 = vmatpush.msra.mxu3 %v1236_v49 }
0x130e   :  { %v1614_v39 = vpop.xlane.xlu0 %1613 }
0x130f   :  { %2581 = vrcp.f32 %v1614_v39  ;;  %v1235_v39 = vld [vmem:[#allocation5 + $0xa0] sm:$0xff] }
0x1310   :  { %1781 = vmatpush.msra.mxu3 %v1235_v39 }
0x1315   :  { %v2582_v53 = vpop.eup %2581 }
0x1316   :  { %v1424_v52 = vpop.f32.mrf.mxu2  ;;  %v1616_v54 = vmul.f32 %v2582_v53, %v2578_v44  ;;  %v2509_v44 = vld [vmem:[#allocation7 + $0x6] ss:$0 sm:$0xff] }
0x1317   :  { %2433 = vmatmul.msk.f32.vlgmr.msrb.gmra.mxu1 %vm148_vm5, %v1424_v52 }
0x1318   :  { %1716 = vmatpush.msrb.mxu1 %v1228_v24 }
0x1321   :  { %v1618_v55 = vpop.permute.xlu0 %1617 }
0x1322   :  { %1638 = vmatpush.msrb.mxu0 %v1618_v55 }
0x1323   :  { %2441 = vmatmul.msk.f32.vlgmr.msrb.gmra.mxu0 %vm148_vm5, %v1616_v54  ;;  %v1234_v54 = vld [vmem:[#allocation5 + $0x90] sm:$0xff] }
0x1324   :  { %1782 = vmatpush.msra.mxu3 %v1234_v54  ;;  %v1793_v54 = vld [vmem:[#allocation5 + $0xc0] sm:$0xff] }
0x1329   :  { %v1645_v9 = vpop.permute.xlu0 %1644 }
0x132a   :  { %1665 = vmatpush.msrb.mxu2 %v1645_v9  ;;  %v1233_v9 = vld [vmem:[#allocation5 + $0x80] sm:$0xff] }
0x132b   :  { %1783 = vmatpush.msra.mxu3 %v1233_v9 }
0x132e   :  { %v1545_v56 = vpop.f32.mrf.mxu2 }
0x132f   :  { %2438 = vmatmul.msk.f32.vlgmr.msra.gmra.mxu1 %vm148_vm5, %v1545_v56 }
0x1394   :  { %v1452_v58 = vpop.f32.mrf.mxu1 }
0x1395   :  { %v1480_v0 = vadd.f32 %v3041_v13, %v1452_v58  ;;  %v1227_v13 = vld [vmem:[#allocation5 + $0x28] sm:$0xff]  ;;  %v1232_v58 = vld [vmem:[#allocation5 + $0x70] sm:$0xff] }
0x1396   :  { %1717 = vmatpush.msrb.mxu1 %v1227_v13  ;;  %1784 = vmatpush.msra.mxu3 %v1232_v58 }
0x1398   :  { %1718 = vmatpush.msrb.mxu1 %v1226_v25 }
0x139a   :  { %1719 = vmatpush.msrb.mxu1 %v1225_v26 }
0x13a0   :  { %v1640_v57 = vpop.f32.mrf.mxu0 }
0x13a1   :  { %2442 = vmatmul.msk.f32.vlgmr.msrb.gmra.mxu2 %vm148_vm5, %v1640_v57 }
0x13ac   :  { %v1573_v60 = vpop.f32.mrf.mxu1 }
0x13ad   :  { %v1576_v61 = vadd.f32 %v1573_v60, %v1480_v0 }
0x1424   :  { %v1667_v1 = vpop.f32.mrf.mxu2 }
0x1425   :  { %v1670_v2 = vadd.f32 %v1667_v1, %v1576_v61  ;;  %v1231_v61 = vld [vmem:[#allocation5 + $0x60] sm:$0xff]  ;;  %v1230_v1 = vld [vmem:[#allocation5 + $0x50] sm:$0xff] }
0x1426   :  { %1785 = vmatpush.msra.mxu3 %v1231_v61 }
0x1427   :  { %v1672_v3 = vadd.f32 %v2506_v62, %v1670_v2 }
0x1428   :  { %1786 = vmatpush.msra.mxu3 %v1230_v1  ;;  %v2511_v1 = vld [vmem:[#allocation7 + $0x8] ss:$0 sm:$0xff] }
0x1429   :  { %v1673_v14 = vadd.f32 %v1672_v3, %v2913_v63  ;;  %v1229_v3 = vld [vmem:[#allocation5 + $0x40] sm:$0xff] }
0x142a   :  { %1787 = vmatpush.msra.mxu3 %v1229_v3 }
0x142b   :  { %v1674_v59 = vsel %vm87_vm0, %v1673_v14, 0.0 }
0x142c   :  { %1675 = vadd.xlane.f32.xlu2 %v1674_v59 }
0x149f   :  { %v1676_v15 = vpop.xlane.xlu2 %1675 }
0x14a0   :  { %v1677_v17 = vmul.f32 %v1676_v15, %v2772_v8 }
0x14a2   :  { %v1678_v11 = vsub.f32 %v1673_v14, %v1677_v17 }
0x14a4   :  { %v1679_v21 = vmul.f32 %v1678_v11, %v1678_v11 }
0x14a6   :  { %v1680_v22 = vsel %vm87_vm0, %v1679_v21, 0.0 }
0x14a7   :  { %1681 = vadd.xlane.f32.xlu0 %v1680_v22 }
0x151a   :  { %v1682_v63 = vpop.xlane.xlu0 %1681 }
0x151b   :  { %v1683_v28 = vmul.f32 %v1682_v63, %v2772_v8 }
0x151d   :  { %v1684_v29 = vadd.f32 1e-05, %v1683_v28 }
0x151f   :  { %2583 = vrsqrt.f32 %v1684_v29  ;;  %vm1691_vm15 = vweird.f32 %v1684_v29 }
0x1525   :  { %v2584_v19 = vpop.eup %2583 }
0x1526   :  { %v1686_v31 = vmul.f32 %v2584_v19, %v1684_v29  ;;  %vm1692_vm14 = vweird.f32 %v2584_v19 }
0x1527   :  { %vm1693_vm1 = vmor %vm1691_vm15, %vm1692_vm14 }
0x1528   :  { %v1687_v6 = vmul.f32 %v2584_v19, %v1686_v31 }
0x152a   :  { %v1688_v35 = vmul.f32 0.5, %v1687_v6 }
0x152c   :  { %v1689_v37 = vsub.f32 1.5, %v1688_v35 }
0x152e   :  { %v1690_v38 = vmul.f32 %v2584_v19, %v1689_v37 }
0x1530   :  { %v1694_v40 = vsel %vm1693_vm1, %v2584_v19, %v1690_v38 }
0x1531   :  { %v1695_v41 = vmul.f32 %v1694_v40, %v1678_v11 }
0x1533   :  { %v1697_v20 = vmul.f32 %v2507_v36, %v1695_v41 }
0x1535   :  { %v3068_v12 = vadd.f32 %v2508_v43, %v1697_v20 }
0x1537   :  { %2443 = vmatmul.msk.f32.vlgmr.msrb.gmra.mxu1 %vm87_vm0, %v3068_v12 }
0x15b4   :  { %v1721_v45 = vpop.f32.mrf.mxu1 }
0x15b5   :  { %v1722_v46 = vadd.f32 %v2509_v44, %v1721_v45  ;;  %v2510_v44 = vld [vmem:[#allocation7 + $0x7] ss:$0 sm:$0xff] }
0x15b7   :  { %v1725_v47 = vmul.f32 0.70710677, %v1722_v46  ;;  %v1724_v41 = vmul.f32 0.5, %v1722_v46 }
0x15b9   :  { %v1726_v48 = vmul.f32 %v1725_v47, %v1725_v47 }
0x15bb   :  { %v1727_v42 = vmin.f32 %v1726_v48, 16.0 }
0x15bd   :  { %v1728_v50 = vmul.f32 2.1237322e-06, %v1727_v42  ;;  %v1739_v51 = vmul.f32 3.8918573e-05, %v1727_v42 }
0x15bf   :  { %v1729_v52 = vadd.f32 0.00028619796, %v1728_v50  ;;  %v1740_v53 = vadd.f32 0.001143296, %v1739_v51 }
0x15c1   :  { %v1730_v55 = vmul.f32 %v1729_v52, %v1727_v42  ;;  %v1741_v56 = vmul.f32 %v1740_v53, %v1727_v42  ;;  %v3081_v52 = vld [vmem:[#allocation5 + $0xf0] sm:$0xff]  ;;  %v3084_v53 = vld [vmem:[#allocation5 + $0xe0] sm:$0xff] }
0x15c2   :  { %1859 = vmatpush.msra.mxu0 %v3081_v52 }
0x15c3   :  { %v1742_v57 = vadd.f32 0.014752088, %v1741_v56  ;;  %v1731_v60 = vadd.f32 0.0036580483, %v1730_v55 }
0x15c4   :  { %1860 = vmatpush.msra.mxu0 %v3084_v53 }
0x15c5   :  { %v1743_v0 = vmul.f32 %v1742_v57, %v1727_v42  ;;  %v1732_v2 = vmul.f32 %v1731_v60, %v1727_v42 }
0x15c7   :  { %v1744_v62 = vadd.f32 0.112945676, %v1743_v0  ;;  %v1733_v15 = vadd.f32 0.05243302, %v1732_v2 }
0x15c9   :  { %v1745_v14 = vmul.f32 %v1744_v62, %v1727_v42  ;;  %v1734_v21 = vmul.f32 %v1733_v15, %v1727_v42 }
0x15cb   :  { %v1746_v59 = vadd.f32 0.4994258, %v1745_v14  ;;  %v1735_v22 = vadd.f32 0.18741608, %v1734_v21  ;;  %v2512_v14 = vld [vmem:[#allocation7 + $0x9] ss:$0 sm:$0xff] }
0x15cd   :  { %v1747_v17 = vmul.f32 %v1746_v59, %v1727_v42  ;;  %v1736_v13 = vmul.f32 %v1735_v22, %v1727_v42 }
0x15cf   :  { %v1748_v11 = vadd.f32 1.0, %v1747_v17  ;;  %v1737_v28 = vadd.f32 1.1283791, %v1736_v13  ;;  %v2513_v17 = vld [vmem:[#allocation7 + $0xa] ss:$0 sm:$0xff] }
0x15d1   :  { %2585 = vrcp.f32 %v1748_v11  ;;  %v1760_v63 = vand.u32 2147483648, %v1748_v11  ;;  %v1758_v19 = vand.u32 2147483647, %v1748_v11  ;;  %vm1754_vm3 = vweird.f32 %v1748_v11 }
0x15d2   :  { %v1738_v35 = vmul.f32 %v1737_v28, %v1725_v47 }
0x15d3   :  { %v1761_v6 = vor.u32 1.1754944e-38, %v1760_v63  ;;  %vm1759_vm6 = vcmp.eq.f32.partialorder %v1758_v19, 8.507059e+37 }
0x15d7   :  { %v2586_v24 = vpop.eup %2585 }
0x15d8   :  { %v1750_v25 = vmul.f32 %v2586_v24, %v1748_v11  ;;  %vm1755_vm2 = vweird.f32 %v2586_v24 }
0x15d9   :  { %vm1756_vm4 = vmor %vm1754_vm3, %vm1755_vm2 }
0x15da   :  { %v1751_v26 = vsub.f32 1.0, %v1750_v25 }
0x15dc   :  { %v1752_v29 = vmul.f32 %v2586_v24, %v1751_v26 }
0x15de   :  { %v1753_v31 = vadd.f32 %v2586_v24, %v1752_v29 }
0x15e0   :  { %v1757_v37 = vsel %vm1756_vm4, %v2586_v24, %v1753_v31 }
0x15e1   :  { %v1762_v38 = vsel %vm1759_vm6, %v1761_v6, %v1757_v37 }
0x15e2   :  { %v1763_v36 = vmul.f32 %v1762_v38, %v1738_v35 }
0x15e4   :  { %v2444_v40 = vclamps-f32 %v1763_v36, 1.0 }
0x15e6   :  { %v1766_v43 = vadd.f32 1.0, %v2444_v40 }
0x15e8   :  { %v1767_v20 = vmul.f32 %v1766_v43, %v1724_v41 }
0x15ea   :  { %2445 = vmatmul.msk.f32.vlgmr.msra.gmra.mxu3 %vm620_vm13, %v1767_v20 }
0x166d   :  { %v1789_v45 = vpop.f32.mrf.mxu3 }
0x166e   :  { %v1790_v48 = vadd.f32 %v2510_v44, %v1789_v45 }
0x1670   :  { %v3074_v42 = vadd.f32 %v1790_v48, %v3068_v12  ;;  %v3087_v12 = vld [vmem:[#allocation5 + $0xd0] sm:$0xff] }
0x1671   :  { %1861 = vmatpush.msra.mxu0 %v3087_v12 }
0x1672   :  { %v1817_v49 = vsel %vm87_vm0, %v3074_v42, 0.0 }
0x1673   :  { %1818 = vadd.xlane.f32.xlu1 %v1817_v49  ;;  %1862 = vmatpush.msra.mxu0 %v1793_v54 }
0x16e6   :  { %v1819_v47 = vpop.xlane.xlu1 %1818 }
0x16e7   :  { %v1820_v50 = vmul.f32 %v1819_v47, %v2772_v8 }
0x16e9   :  { %v1821_v51 = vsub.f32 %v3074_v42, %v1820_v50 }
0x16eb   :  { %v1822_v46 = vmul.f32 %v1821_v51, %v1821_v51 }
0x16ed   :  { %v1823_v39 = vsel %vm87_vm0, %v1822_v46, 0.0 }
0x16ee   :  { %1824 = vadd.xlane.f32.xlu2 %v1823_v39 }
0x1761   :  { %v1825_v55 = vpop.xlane.xlu2 %1824 }
0x1762   :  { %v1826_v56 = vmul.f32 %v1825_v55, %v2772_v8 }
0x1764   :  { %v1827_v9 = vadd.f32 1e-05, %v1826_v56 }
0x1766   :  { %2587 = vrsqrt.f32 %v1827_v9  ;;  %vm1834_vm8 = vweird.f32 %v1827_v9 }
0x176c   :  { %v2588_v57 = vpop.eup %2587 }
0x176d   :  { %v1829_v58 = vmul.f32 %v2588_v57, %v1827_v9  ;;  %vm1835_vm7 = vweird.f32 %v2588_v57 }
0x176e   :  { %vm1836_vm9 = vmor %vm1834_vm8, %vm1835_vm7 }
0x176f   :  { %v1830_v60 = vmul.f32 %v2588_v57, %v1829_v58 }
0x1771   :  { %v1831_v0 = vmul.f32 0.5, %v1830_v60 }
0x1773   :  { %v1832_v61 = vsub.f32 1.5, %v1831_v0 }
0x1775   :  { %v1833_v62 = vmul.f32 %v2588_v57, %v1832_v61 }
0x1777   :  { %v1837_v2 = vsel %vm1836_vm9, %v2588_v57, %v1833_v62 }
0x1778   :  { %v1838_v3 = vmul.f32 %v1837_v2, %v1821_v51 }
0x177a   :  { %v1840_v59 = vmul.f32 %v2511_v1, %v1838_v3 }
0x177c   :  { %v1842_v15 = vadd.f32 %v2512_v14, %v1840_v59 }
0x177e   :  { %2446 = vmatmul.msk.f32.vlgmr.msra.gmra.mxu0 %vm87_vm0, %v1842_v15 }
0x17fb   :  { %v1864_v11 = vpop.f32.mrf.mxu0 }
0x17fc   :  { %v3092_v21 = vadd.f32 %v2513_v17, %v1864_v11 }
0x17fe   :  { %1868 = vrot.lane.b32.xlu0 %v3092_v21, %s2722_s30 }
0x1806   :  { %1935 = vrot.lane.b32.xlu0 %v3092_v21, %s2726_s7 }
0x180e   :  { %1933 = vrot.lane.b32.xlu0 %v3092_v21, %s2721_s29 }
0x1816   :  { %2056 = vrot.lane.b32.xlu0 %v3092_v21, %s2728_s9 }
0x1870   :  { %v1869_v22 = vpop.permute.xlu0 %1868 }
0x1871   :  { %2447 = vmatpush.xpose.msk.msra.mxu2 %vm148_vm5, %v1869_v22 }
0x1874   :  { %2448 = vmatmul.msk.f32.vlgmr.msra.gmra.mxu2 %vm148_vm5, %v3092_v21 }
0x1878   :  { %v1936_v24 = vpop.permute.xlu0 %1935 }
0x1879   :  { %2450 = vmatpush.xpose.msk.msrb.mxu0 %vm148_vm5, %v1936_v24 }
0x1880   :  { %v1934_v13 = vpop.permute.xlu0 %1933 }
0x1881   :  { %2451 = vmatmul.msk.f32.vlgmr.msrb.gmra.mxu0 %vm148_vm5, %v1934_v13 }
0x1888   :  { %v2057_v25 = vpop.permute.xlu0 %2056 }
0x1889   :  { %2455 = vmatpush.xpose.msk.msra.mxu0 %vm148_vm5, %v2057_v25 }
0x18f7   :  { %v1891_v26 = vpop.f32.mrf.mxu2 }
0x18f8   :  { %v1894_v63 = vmul.f32 0.35355338, %v1891_v26 }
0x18fa   :  { %v1895_v28 = vsel %vm148_vm5, %v1894_v63, -inf }
0x18fb   :  { %1896 = vmax.xlane.f32.xlu1 %v1895_v28 }
0x18fe   :  { %v1958_v40 = vpop.f32.mrf.mxu0 }
0x18ff   :  { %v1961_v41 = vmul.f32 0.35355338, %v1958_v40 }
0x1901   :  { %v1962_v43 = vsel %vm148_vm5, %v1961_v41, -inf }
0x1914   :  { %1906 = vrot.lane.b32.xlu1 %v3092_v21, %s2725_s6 }
0x191c   :  { %2151 = vrot.lane.b32.xlu1 %v3092_v21, %s2727_s8 }
0x1924   :  { %2054 = vrot.lane.b32.xlu1 %v3092_v21, %s2724_s5 }
0x196e   :  { %v1897_v29 = vpop.xlane.xlu1 %1896 }
0x196f   :  { %v1898_v19 = vsub.f32 %v1894_v63, %v1897_v29 }
0x1971   :  { %v1899_v31 = vmul.f32 1.442695, %v1898_v19 }
0x1973   :  { %2589 = vpow2.f32 %v1899_v31 }
0x1979   :  { %v2590_v6 = vpop.eup %2589 }
0x197a   :  { %v1901_v35 = vsel %vm148_vm5, %v2590_v6, 0.0 }
0x197b   :  { %1902 = vadd.xlane.f32.xlu2 %v1901_v35 }
0x1986   :  { %v1907_v37 = vpop.permute.xlu1 %1906 }
0x1987   :  { %1927 = vmatpush.msra.mxu1 %v1907_v37 }
0x198e   :  { %v2152_v38 = vpop.permute.xlu1 %2151 }
0x1993   :  { %2028 = vrot.lane.b32.xlu2 %v1793_v54, %s2720_s2 }
0x1996   :  { %v2055_v36 = vpop.permute.xlu1 %2054 }
0x1997   :  { %2456 = vmatmul.msk.f32.vlgmr.msra.gmra.mxu0 %vm148_vm5, %v2055_v36 }
0x199b   :  { %2149 = vrot.lane.b32.xlu2 %v3092_v21, %s2723_s4 }
0x19c4   :  { %1963 = vmax.xlane.f32.xlu2 %v1962_v43 }
0x19ee   :  { %v1903_v20 = vpop.xlane.xlu2 %1902 }
0x19ef   :  { %2591 = vrcp.f32 %v1903_v20 }
0x19f5   :  { %v2592_v44 = vpop.eup %2591 }
0x19f6   :  { %v1905_v45 = vmul.f32 %v2592_v44, %v2590_v6  ;;  %v2029_v48 = vpop.permute.xlu2 %2028  ;;  %v2514_v6 = vld [vmem:[#allocation7 + $0xb] ss:$0 sm:$0xff] }
0x19f7   :  { %2049 = vmatpush.msrb.mxu3 %v2029_v48 }
0x19f8   :  { %2449 = vmatmul.msk.f32.vlgmr.msra.gmra.mxu1 %vm148_vm5, %v1905_v45 }
0x19f9   :  { %2459 = vmatpush.xpose.msk.msra.mxu3 %vm148_vm5, %v2152_v38 }
0x19fe   :  { %v2150_v51 = vpop.permute.xlu2 %2149 }
0x1a14   :  { %v2079_v49 = vpop.f32.mrf.mxu0 }
0x1a15   :  { %v2082_v47 = vmul.f32 0.35355338, %v2079_v49 }
0x1a17   :  { %v2083_v50 = vsel %vm148_vm5, %v2082_v47, -inf }
0x1a18   :  { %2084 = vmax.xlane.f32.xlu0 %v2083_v50 }
0x1a37   :  { %v1964_v46 = vpop.xlane.xlu2 %1963 }
0x1a38   :  { %v1965_v39 = vsub.f32 %v1961_v41, %v1964_v46 }
0x1a3a   :  { %v1966_v54 = vmul.f32 1.442695, %v1965_v39 }
0x1a3c   :  { %2593 = vpow2.f32 %v1966_v54  ;;  %v2516_v54 = vld [vmem:[#allocation7 + $0xd] ss:$0 sm:$0xff] }
0x1a42   :  { %v2594_v55 = vpop.eup %2593 }
0x1a43   :  { %v1968_v56 = vsel %vm148_vm5, %v2594_v55, 0.0 }
0x1a44   :  { %1969 = vadd.xlane.f32.xlu2 %v1968_v56 }
0x1a75   :  { %v1929_v9 = vpop.f32.mrf.mxu1 }
0x1a76   :  { %2454 = vmatmul.msk.f32.vlgmr.msrb.gmra.mxu3 %vm148_vm5, %v1929_v9 }
0x1a77   :  { %2352 = vmatpush.msrb.mxu3 %v3007_v4 }
0x1a79   :  { %2353 = vmatpush.msrb.mxu3 %v3010_v7 }
0x1a7b   :  { %2354 = vmatpush.msrb.mxu3 %v3013_v10 }
0x1a7d   :  { %2355 = vmatpush.msrb.mxu3 %v3016_v18 }
0x1a7e   :  { %2460 = vmatmul.msk.f32.vlgmr.msra.gmra.mxu3 %vm148_vm5, %v2150_v51  ;;  %v2515_v51 = vld [vmem:[#allocation7 + $0xc] ss:$0 sm:$0xff] }
0x1a7f   :  { %2356 = vmatpush.msrb.mxu3 %v3019_v23 }
0x1a81   :  { %2357 = vmatpush.msrb.mxu3 %v3022_v5 }
0x1a83   :  { %2358 = vmatpush.msrb.mxu3 %v3025_v27 }
0x1a85   :  { %2359 = vmatpush.msrb.mxu3 %v3028_v30 }
0x1a8b   :  { %v2085_v57 = vpop.xlane.xlu0 %2084 }
0x1a8c   :  { %v2086_v58 = vsub.f32 %v2082_v47, %v2085_v57 }
0x1a8e   :  { %v2087_v60 = vmul.f32 1.442695, %v2086_v58 }
0x1a90   :  { %2595 = vpow2.f32 %v2087_v60 }
0x1a96   :  { %v2596_v4 = vpop.eup %2595 }
0x1a97   :  { %v2089_v7 = vsel %vm148_vm5, %v2596_v4, 0.0 }
0x1a98   :  { %2090 = vadd.xlane.f32.xlu0 %v2089_v7 }
0x1aac   :  { %2094 = vrot.lane.b32.xlu0 %v3092_v21, %s2731_s12 }
0x1ab4   :  { %2001 = vrot.lane.b32.xlu0 %v3087_v12, %s2720_s2 }
0x1ab7   :  { %v1970_v61 = vpop.xlane.xlu2 %1969 }
0x1abc   :  { %2122 = vrot.lane.b32.xlu0 %v3084_v53, %s2720_s2 }
0x1af9   :  { %v2051_v10 = vpop.f32.mrf.mxu3 }
0x1b01   :  { %v2174_v18 = vpop.f32.mrf.mxu3 }
0x1b02   :  { %v2177_v23 = vmul.f32 0.35355338, %v2174_v18 }
0x1b04   :  { %v2178_v5 = vsel %vm148_vm5, %v2177_v23, -inf }
0x1b05   :  { %2179 = vmax.xlane.f32.xlu1 %v2178_v5 }
0x1b0b   :  { %v2091_v62 = vpop.xlane.xlu0 %2090 }
0x1b1e   :  { %1973 = vrot.lane.b32.xlu1 %v3092_v21, %s2729_s10  ;;  %v2095_v14 = vpop.permute.xlu0 %2094 }
0x1b26   :  { %2216 = vrot.lane.b32.xlu1 %v3081_v52, %s2720_s2  ;;  %v2002_v15 = vpop.permute.xlu0 %2001 }
0x1b27   :  { %2022 = vmatpush.msrb.mxu1 %v2002_v15 }
0x1b2e   :  { %v2123_v17 = vpop.permute.xlu0 %2122 }
0x1b2f   :  { %2143 = vmatpush.msra.mxu1 %v2123_v17 }
0x1b78   :  { %v2180_v27 = vpop.xlane.xlu1 %2179 }
0x1b79   :  { %v2181_v30 = vsub.f32 %v2177_v23, %v2180_v27 }
0x1b7b   :  { %v2182_v0 = vmul.f32 1.442695, %v2181_v30 }
0x1b7d   :  { %2597 = vpow2.f32 %v2182_v0 }
0x1b7e   :  { %2599 = vrcp.f32 %v1970_v61 }
0x1b7f   :  { %2601 = vrcp.f32 %v2091_v62 }
0x1b83   :  { %v2598_v12 = vpop.eup %2597 }
0x1b84   :  { %v2184_v53 = vsel %vm148_vm5, %v2598_v12, 0.0  ;;  %v2600_v1 = vpop.eup %2599 }
0x1b85   :  { %2185 = vadd.xlane.f32.xlu2 %v2184_v53  ;;  %v1972_v2 = vmul.f32 %v2600_v1, %v2594_v55  ;;  %v2602_v52 = vpop.eup %2601 }
0x1b86   :  { %v2093_v59 = vmul.f32 %v2602_v52, %v2596_v4 }
0x1b90   :  { %v1974_v3 = vpop.permute.xlu1 %1973 }
0x1b91   :  { %1994 = vmatpush.msrb.mxu2 %v1974_v3 }
0x1b92   :  { %2452 = vmatmul.msk.f32.vlgmr.msrb.gmra.mxu2 %vm148_vm5, %v1972_v2 }
0x1b93   :  { %2115 = vmatpush.msra.mxu2 %v2095_v14 }
0x1b98   :  { %v2217_v22 = vpop.permute.xlu1 %2216 }
0x1b99   :  { %2237 = vmatpush.msrb.mxu2 %v2217_v22 }
0x1b9a   :  { %2457 = vmatmul.msk.f32.vlgmr.msra.gmra.mxu2 %vm148_vm5, %v2093_v59 }
0x1b9d   :  { %2189 = vrot.lane.b32.xlu2 %v3092_v21, %s2730_s11 }
0x1bf8   :  { %v2186_v11 = vpop.xlane.xlu2 %2185 }
0x1bf9   :  { %2603 = vrcp.f32 %v2186_v11 }
0x1bff   :  { %v2604_v24 = vpop.eup %2603 }
0x1c00   :  { %v2188_v13 = vmul.f32 %v2604_v24, %v2598_v12  ;;  %v2190_v25 = vpop.permute.xlu2 %2189 }
0x1c01   :  { %2210 = vmatpush.msrb.mxu0 %v2190_v25 }
0x1c02   :  { %2461 = vmatmul.msk.f32.vlgmr.msrb.gmra.mxu0 %vm148_vm5, %v2188_v13 }
0x1c15   :  { %v1996_v26 = vpop.f32.mrf.mxu2 }
0x1c16   :  { %2453 = vmatmul.msk.f32.vlgmr.msrb.gmra.mxu1 %vm148_vm5, %v1996_v26 }
0x1c17   :  { %2288 = vmatpush.msrb.mxu1 %v2974_v16 }
0x1c19   :  { %2289 = vmatpush.msrb.mxu1 %v2977_v32 }
0x1c1b   :  { %2290 = vmatpush.msrb.mxu1 %v2980_v33 }
0x1c1d   :  { %v2117_v21 = vpop.f32.mrf.mxu2  ;;  %2291 = vmatpush.msrb.mxu1 %v2983_v34 }
0x1c1e   :  { %2458 = vmatmul.msk.f32.vlgmr.msra.gmra.mxu1 %vm148_vm5, %v2117_v21 }
0x1c7f   :  { %v2212_v63 = vpop.f32.mrf.mxu0 }
0x1c80   :  { %2462 = vmatmul.msk.f32.vlgmr.msrb.gmra.mxu2 %vm148_vm5, %v2212_v63 }
0x1c93   :  { %v2024_v28 = vpop.f32.mrf.mxu1 }
0x1c94   :  { %v2052_v19 = vadd.f32 %v2051_v10, %v2024_v28 }
0x1c9b   :  { %v2145_v29 = vpop.f32.mrf.mxu1 }
0x1c9c   :  { %v2148_v31 = vadd.f32 %v2145_v29, %v2052_v19 }
0x1d03   :  { %v2239_v35 = vpop.f32.mrf.mxu2 }
0x1d04   :  { %v2242_v37 = vadd.f32 %v2239_v35, %v2148_v31 }
0x1d06   :  { %v2244_v16 = vadd.f32 %v2514_v6, %v2242_v37 }
0x1d08   :  { %v2245_v32 = vadd.f32 %v2244_v16, %v3074_v42 }
0x1d0a   :  { %v2246_v33 = vsel %vm87_vm0, %v2245_v32, 0.0 }
0x1d0b   :  { %2247 = vadd.xlane.f32.xlu2 %v2246_v33 }
0x1d7e   :  { %v2248_v38 = vpop.xlane.xlu2 %2247 }
0x1d7f   :  { %v2249_v34 = vmul.f32 %v2248_v38, %v2772_v8 }
0x1d81   :  { %v2250_v36 = vsub.f32 %v2245_v32, %v2249_v34  ;;  %v2518_v32 = vld [vmem:[#allocation7 + $0xf] ss:$0 sm:$0xff] }
0x1d83   :  { %v2251_v40 = vmul.f32 %v2250_v36, %v2250_v36 }
0x1d85   :  { %v2252_v41 = vsel %vm87_vm0, %v2251_v40, 0.0 }
0x1d86   :  { %2253 = vadd.xlane.f32.xlu1 %v2252_v41 }
0x1df9   :  { %v2254_v43 = vpop.xlane.xlu1 %2253 }
0x1dfa   :  { %v2255_v20 = vmul.f32 %v2254_v43, %v2772_v8  ;;  %v2517_v8 = vld [vmem:[#allocation7 + $0xe] ss:$0 sm:$0xff] }
0x1dfc   :  { %v2256_v44 = vadd.f32 1e-05, %v2255_v20 }
0x1dfe   :  { %2605 = vrsqrt.f32 %v2256_v44  ;;  %vm2263_vm10 = vweird.f32 %v2256_v44 }
0x1e04   :  { %v2606_v45 = vpop.eup %2605 }
0x1e05   :  { %v2258_v48 = vmul.f32 %v2606_v45, %v2256_v44  ;;  %vm2264_vm5 = vweird.f32 %v2606_v45 }
0x1e06   :  { %vm2265_vm11 = vmor %vm2263_vm10, %vm2264_vm5 }
0x1e07   :  { %v2259_v49 = vmul.f32 %v2606_v45, %v2258_v48 }
0x1e09   :  { %v2260_v42 = vmul.f32 0.5, %v2259_v49 }
0x1e0b   :  { %v2261_v47 = vsub.f32 1.5, %v2260_v42 }
0x1e0d   :  { %v2262_v50 = vmul.f32 %v2606_v45, %v2261_v47 }
0x1e0f   :  { %v2266_v46 = vsel %vm2265_vm11, %v2606_v45, %v2262_v50 }
0x1e10   :  { %v2267_v39 = vmul.f32 %v2266_v46, %v2250_v36 }
0x1e12   :  { %v2269_v55 = vmul.f32 %v2515_v51, %v2267_v39 }
0x1e14   :  { %v2271_v56 = vadd.f32 %v2516_v54, %v2269_v55 }
0x1e16   :  { %2463 = vmatmul.msk.f32.vlgmr.msrb.gmra.mxu1 %vm87_vm0, %v2271_v56 }
0x1e93   :  { %v2293_v9 = vpop.f32.mrf.mxu1 }
0x1e94   :  { %v2294_v57 = vadd.f32 %v2517_v8, %v2293_v9 }
0x1e96   :  { %v2297_v58 = vmul.f32 0.70710677, %v2294_v57  ;;  %v2296_v35 = vmul.f32 0.5, %v2294_v57 }
0x1e98   :  { %v2298_v60 = vmul.f32 %v2297_v58, %v2297_v58 }
0x1e9a   :  { %v2299_v4 = vmin.f32 %v2298_v60, 16.0 }
0x1e9c   :  { %v2300_v7 = vmul.f32 2.1237322e-06, %v2299_v4  ;;  %v2311_v10 = vmul.f32 3.8918573e-05, %v2299_v4 }
0x1e9e   :  { %v2301_v18 = vadd.f32 0.00028619796, %v2300_v7  ;;  %v2312_v23 = vadd.f32 0.001143296, %v2311_v10 }
0x1ea0   :  { %v2302_v5 = vmul.f32 %v2301_v18, %v2299_v4  ;;  %v2313_v27 = vmul.f32 %v2312_v23, %v2299_v4 }
0x1ea2   :  { %v2314_v30 = vadd.f32 0.014752088, %v2313_v27  ;;  %v2303_v0 = vadd.f32 0.0036580483, %v2302_v5 }
0x1ea4   :  { %v2315_v12 = vmul.f32 %v2314_v30, %v2299_v4  ;;  %v2304_v53 = vmul.f32 %v2303_v0, %v2299_v4 }
0x1ea6   :  { %v2316_v61 = vadd.f32 0.112945676, %v2315_v12  ;;  %v2305_v2 = vadd.f32 0.05243302, %v2304_v53 }
0x1ea8   :  { %v2317_v62 = vmul.f32 %v2316_v61, %v2299_v4  ;;  %v2306_v52 = vmul.f32 %v2305_v2, %v2299_v4 }
0x1eaa   :  { %v2318_v1 = vadd.f32 0.4994258, %v2317_v62  ;;  %v2307_v59 = vadd.f32 0.18741608, %v2306_v52 }
0x1eac   :  { %v2319_v3 = vmul.f32 %v2318_v1, %v2299_v4  ;;  %v2308_v17 = vmul.f32 %v2307_v59, %v2299_v4 }
0x1eae   :  { %v2320_v14 = vadd.f32 1.0, %v2319_v3  ;;  %v2309_v13 = vadd.f32 1.1283791, %v2308_v17 }
0x1eb0   :  { %2607 = vrcp.f32 %v2320_v14  ;;  %v2332_v24 = vand.u32 2147483648, %v2320_v14  ;;  %v2330_v26 = vand.u32 2147483647, %v2320_v14  ;;  %vm2326_vm14 = vweird.f32 %v2320_v14 }
0x1eb1   :  { %v2310_v28 = vmul.f32 %v2309_v13, %v2297_v58 }
0x1eb2   :  { %v2333_v63 = vor.u32 1.1754944e-38, %v2332_v24  ;;  %vm2331_vm1 = vcmp.eq.f32.partialorder %v2330_v26, 8.507059e+37 }
0x1eb6   :  { %v2608_v15 = vpop.eup %2607 }
0x1eb7   :  { %v2322_v11 = vmul.f32 %v2608_v15, %v2320_v14  ;;  %vm2327_vm12 = vweird.f32 %v2608_v15 }
0x1eb8   :  { %vm2328_vm15 = vmor %vm2326_vm14, %vm2327_vm12 }
0x1eb9   :  { %v2323_v22 = vsub.f32 1.0, %v2322_v11 }
0x1ebb   :  { %v2324_v25 = vmul.f32 %v2608_v15, %v2323_v22 }
0x1ebd   :  { %v2325_v21 = vadd.f32 %v2608_v15, %v2324_v25 }
0x1ebf   :  { %v2329_v29 = vsel %vm2328_vm15, %v2608_v15, %v2325_v21 }
0x1ec0   :  { %v2334_v19 = vsel %vm2331_vm1, %v2333_v63, %v2329_v29 }
0x1ec1   :  { %v2335_v31 = vmul.f32 %v2334_v19, %v2310_v28 }
0x1ec3   :  { %v2464_v6 = vclamps-f32 %v2335_v31, 1.0 }
0x1ec5   :  { %v2338_v37 = vadd.f32 1.0, %v2464_v6 }
0x1ec7   :  { %v2339_v16 = vmul.f32 %v2338_v37, %v2296_v35 }
0x1ec9   :  { %2465 = vmatmul.msk.f32.vlgmr.msrb.gmra.mxu3 %vm620_vm13, %v2339_v16 }
0x1f4c   :  { %v2361_v33 = vpop.f32.mrf.mxu3 }
0x1f4d   :  { %v2362_v38 = vadd.f32 %v2518_v32, %v2361_v33 }
0x1f4f   :  { %v2364_v34 = vadd.f32 %v2362_v38, %v2271_v56 }
0x1f51   :  { %2365 = vst.msk [vmem:[#allocation8 + $0x8] sm:$0xff] %vm87_vm0, %v2364_v34 }
0x1f52   :  { %2378 = dma.vmem_to_hbm [thread:$0]  %s2371_s14, 256, %s2373_s17, [#allocation4], %s2716_s24, %s2716_s24, %s2717_s25  }
0x1f53   :  { %2710 = dma.done.wait [#allocation4], 256  }
0x1f54   :  { %2711 = vsyncadd [#allocation4], 4294967040 }
0x1f55   :  { %2383 = vsyncpa [#allocation3], 1 }
0x1f56   :  { %2384 = vsyncpa [#allocation6], 1 }
0x1f57   :  { %2385 = vsyncpa [#allocation4], 1 }

</bundles_post_ra>
